<compile_context>
chip_gen: v7x
topology: tpu7x:2x2x1
jax: 0.10.0
libtpu: 0.0.40
codegen_flags: <defaults>
</compile_context>

<pallas_src>
import functools

import jax
import jax.numpy as jnp
from jax import lax
from jax.experimental import pallas as pl
from jax.experimental.pallas import tpu as pltpu


def _branch_kernel(x_ref,
                   wq_ref, wk_ref, wv_ref, bq_ref, bk_ref, bv_ref,
                   wo_ref, bo_ref,
                   w1_ref, b1_ref, g1_ref, be1_ref,
                   w2_ref, b2_ref, g2_ref, be2_ref,
                   o_ref, *, num_heads, eps):
    x = x_ref[0]                                        # (S, E) for this batch element
    S, E = x.shape
    head_dim = E // num_heads
    scale = 1.0 / (head_dim ** 0.5)

    # ---- multi-head self-attention (head-major weights, no concat/lane slicing) ----
    attn = jnp.zeros((S, E), dtype=jnp.float32)
    for h in range(num_heads):                          # static unroll, H = 8
        q = jnp.dot(x, wq_ref[h], preferred_element_type=jnp.float32) + bq_ref[h]
        k = jnp.dot(x, wk_ref[h], preferred_element_type=jnp.float32) + bk_ref[h]
        v = jnp.dot(x, wv_ref[h], preferred_element_type=jnp.float32) + bv_ref[h]
        s = jnp.einsum('sd,td->st', q * scale, k,
                       preferred_element_type=jnp.float32)            # (S, S)
        s = s - jnp.max(s, axis=-1, keepdims=True)
        p = jnp.exp(s)
        p = p / jnp.sum(p, axis=-1, keepdims=True)
        # TODO(synk): training-mode dropout on attention weights (p=0.5) and the
        # key_padding_mask path are not implemented (eval mode, mask=None).
        o_h = jnp.dot(p, v, preferred_element_type=jnp.float32)       # (S, Dh)
        attn = attn + jnp.dot(o_h, wo_ref[h], preferred_element_type=jnp.float32)
    attn = attn + bo_ref[...]                                          # (S, E)

    def layer_norm(y, gamma, beta):
        mu = jnp.mean(y, axis=-1, keepdims=True)
        yc = y - mu
        var = jnp.mean(yc * yc, axis=-1, keepdims=True)
        return yc * lax.rsqrt(var + eps) * gamma + beta

    # ---- MLP: Linear -> LayerNorm -> ReLU -> (Dropout = identity) -> Linear -> LN -> ReLU
    h1 = jnp.dot(attn, w1_ref[...], preferred_element_type=jnp.float32) + b1_ref[...]
    h1 = jnp.maximum(layer_norm(h1, g1_ref[...], be1_ref[...]), 0.0)
    h2 = jnp.dot(h1, w2_ref[...], preferred_element_type=jnp.float32) + b2_ref[...]
    h2 = jnp.maximum(layer_norm(h2, g2_ref[...], be2_ref[...]), 0.0)

    o_ref[...] = h2[None].astype(o_ref.dtype)


def space_encoder_branch(x, params, *, num_heads=8, eps=1e-5):
    """One branch of Space_Encoder: self-attention + shared-space MLP.

    x: (B, S, E) float32.  params: dict of kernel-layout weights (see init)."""
    B, S, E = x.shape
    assert E % num_heads == 0
    hidden = params['w1'].shape[-1]
    shared = params['w2'].shape[-1]

    weight_names = ('wq', 'wk', 'wv', 'bq', 'bk', 'bv', 'wo', 'bo',
                    'w1', 'b1', 'g1', 'be1', 'w2', 'b2', 'g2', 'be2')
    weights = [params[n] for n in weight_names]

    def full_spec(a):
        nd = a.ndim
        # Full-array block, constant index map -> resident across grid steps.
        return pl.BlockSpec(a.shape, lambda b, _nd=nd: (0,) * _nd)

    flops = B * (
        3 * 2 * S * E * E          # q/k/v projections
        + 2 * 2 * S * S * E        # scores + attn @ v (summed over heads)
        + 2 * S * E * E            # output projection
        + 2 * S * E * hidden       # MLP layer 1
        + 2 * S * hidden * shared  # MLP layer 2
    )
    transcendentals = B * (num_heads * S * S + 2 * S)
    bytes_accessed = (x.size + sum(int(w.size) for w in weights) + B * S * shared) * 4

    kernel = functools.partial(_branch_kernel, num_heads=num_heads, eps=eps)
    return pl.pallas_call(
        kernel,
        out_shape=jax.ShapeDtypeStruct((B, S, shared), x.dtype),
        grid_spec=pltpu.PrefetchScalarGridSpec(
            num_scalar_prefetch=0,
            grid=(B,),
            in_specs=[pl.BlockSpec((1, S, E), lambda b: (b, 0, 0))]
                     + [full_spec(w) for w in weights],
            out_specs=pl.BlockSpec((1, S, shared), lambda b: (b, 0, 0)),
        ),
        compiler_params=pltpu.CompilerParams(
            dimension_semantics=("parallel",),
        ),
        cost_estimate=pl.CostEstimate(
            flops=flops,
            transcendentals=transcendentals,
            bytes_accessed=bytes_accessed,
        ),
    )(x, *weights)


def _init_branch_params(key, embed_dim, hidden, shared, num_heads):
    """Random weights; returns (kernel-layout params, reference-layout params)."""
    head_dim = embed_dim // num_heads
    ks = jax.random.split(key, 12)
    s_e = 1.0 / (embed_dim ** 0.5)
    s_h = 1.0 / (hidden ** 0.5)

    wq_full = jax.random.normal(ks[0], (embed_dim, embed_dim), jnp.float32) * s_e
    wk_full = jax.random.normal(ks[1], (embed_dim, embed_dim), jnp.float32) * s_e
    wv_full = jax.random.normal(ks[2], (embed_dim, embed_dim), jnp.float32) * s_e
    wo_full = jax.random.normal(ks[3], (embed_dim, embed_dim), jnp.float32) * s_e
    bq_full = jax.random.normal(ks[4], (embed_dim,), jnp.float32) * 0.02
    bk_full = jax.random.normal(ks[5], (embed_dim,), jnp.float32) * 0.02
    bv_full = jax.random.normal(ks[6], (embed_dim,), jnp.float32) * 0.02
    bo = jax.random.normal(ks[7], (embed_dim,), jnp.float32) * 0.02
    w1 = jax.random.normal(ks[8], (embed_dim, hidden), jnp.float32) * s_e
    b1 = jax.random.normal(ks[9], (hidden,), jnp.float32) * 0.02
    w2 = jax.random.normal(ks[10], (hidden, shared), jnp.float32) * s_h
    b2 = jax.random.normal(ks[11], (shared,), jnp.float32) * 0.02
    g1 = jnp.ones((hidden,), jnp.float32)
    be1 = jnp.zeros((hidden,), jnp.float32)
    g2 = jnp.ones((shared,), jnp.float32)
    be2 = jnp.zeros((shared,), jnp.float32)

    kernel_params = dict(
        wq=wq_full.reshape(embed_dim, num_heads, head_dim).transpose(1, 0, 2),
        wk=wk_full.reshape(embed_dim, num_heads, head_dim).transpose(1, 0, 2),
        wv=wv_full.reshape(embed_dim, num_heads, head_dim).transpose(1, 0, 2),
        bq=bq_full.reshape(num_heads, 1, head_dim),
        bk=bk_full.reshape(num_heads, 1, head_dim),
        bv=bv_full.reshape(num_heads, 1, head_dim),
        wo=wo_full.reshape(num_heads, head_dim, embed_dim),
        bo=bo.reshape(1, embed_dim),
        w1=w1, b1=b1.reshape(1, hidden), g1=g1.reshape(1, hidden), be1=be1.reshape(1, hidden),
        w2=w2, b2=b2.reshape(1, shared), g2=g2.reshape(1, shared), be2=be2.reshape(1, shared),
    )
    ref_params = dict(
        wq_full=wq_full, wk_full=wk_full, wv_full=wv_full, wo_full=wo_full,
        bq_full=bq_full, bk_full=bk_full, bv_full=bv_full, bo=bo,
        w1=w1, b1=b1, g1=g1, be1=be1, w2=w2, b2=b2, g2=g2, be2=be2,
    )
    return kernel_params, ref_params


def _reference_branch(x, p, *, num_heads=8, eps=1e-5):
    """Plain-JAX reference of one branch (eval-mode PyTorch semantics)."""
    B, S, E = x.shape
    Dh = E // num_heads
    q = (x @ p['wq_full'] + p['bq_full']).reshape(B, S, num_heads, Dh).transpose(0, 2, 1, 3)
    k = (x @ p['wk_full'] + p['bk_full']).reshape(B, S, num_heads, Dh).transpose(0, 2, 1, 3)
    v = (x @ p['wv_full'] + p['bv_full']).reshape(B, S, num_heads, Dh).transpose(0, 2, 1, 3)
    s = jnp.einsum('bhsd,bhtd->bhst', q, k) / (Dh ** 0.5)
    a = jax.nn.softmax(s, axis=-1)
    o = jnp.einsum('bhst,bhtd->bhsd', a, v).transpose(0, 2, 1, 3).reshape(B, S, E)
    attn = o @ p['wo_full'] + p['bo']

    def ln(y, g, b):
        mu = y.mean(-1, keepdims=True)
        var = ((y - mu) ** 2).mean(-1, keepdims=True)
        return (y - mu) / jnp.sqrt(var + eps) * g + b

    h1 = jax.nn.relu(ln(attn @ p['w1'] + p['b1'], p['g1'], p['be1']))
    h2 = jax.nn.relu(ln(h1 @ p['w2'] + p['b2'], p['g2'], p['be2']))
    return h2


if __name__ == "__main__":
    # Small shapes consistent with the module: num_heads = 8, MLP hidden = 256
    # and shared_dim = 128 are fixed by the module; input_dim is a constructor
    # argument, scaled down to 256 (head_dim = 32).  batch = 2, seq = 8.
    batch, seq = 2, 8
    input_dim, hidden, shared_dim, num_heads = 256, 256, 128, 8

    key = jax.random.PRNGKey(0)
    k_post, k_img, k_tw, k_iw = jax.random.split(key, 4)
    post = jax.random.normal(k_post, (batch, seq, input_dim), jnp.float32)
    image = jax.random.normal(k_img, (batch, seq, input_dim), jnp.float32)

    text_kp, text_rp = _init_branch_params(k_tw, input_dim, hidden, shared_dim, num_heads)
    img_kp, img_rp = _init_branch_params(k_iw, input_dim, hidden, shared_dim, num_heads)

    text_shared = space_encoder_branch(post, text_kp, num_heads=num_heads)
    image_shared = space_encoder_branch(image, img_kp, num_heads=num_heads)
    text_shared, image_shared = jax.block_until_ready((text_shared, image_shared))

    ref_text = _reference_branch(post, text_rp, num_heads=num_heads)
    ref_image = _reference_branch(image, img_rp, num_heads=num_heads)

    assert text_shared.shape == (batch, seq, shared_dim)
    assert image_shared.shape == (batch, seq, shared_dim)
    assert jnp.allclose(text_shared, ref_text, atol=1e-4, rtol=1e-4), "text branch mismatch"
    assert jnp.allclose(image_shared, ref_image, atol=1e-4, rtol=1e-4), "image branch mismatch"

    print("KERNEL_OK")
</pallas_src>

<mosaic_0001>
module attributes {stable_mosaic.version = 11 : i64} {
  func.func @_branch_kernel(%arg0: i32, %arg1: memref<1x8x256xf32, #tpu.memory_space<vmem>>, %arg2: memref<8x256x32xf32, #tpu.memory_space<vmem>>, %arg3: memref<8x256x32xf32, #tpu.memory_space<vmem>>, %arg4: memref<8x256x32xf32, #tpu.memory_space<vmem>>, %arg5: memref<8x1x32xf32, #tpu.memory_space<vmem>>, %arg6: memref<8x1x32xf32, #tpu.memory_space<vmem>>, %arg7: memref<8x1x32xf32, #tpu.memory_space<vmem>>, %arg8: memref<8x32x256xf32, #tpu.memory_space<vmem>>, %arg9: memref<1x256xf32, #tpu.memory_space<vmem>>, %arg10: memref<256x256xf32, #tpu.memory_space<vmem>>, %arg11: memref<1x256xf32, #tpu.memory_space<vmem>>, %arg12: memref<1x256xf32, #tpu.memory_space<vmem>>, %arg13: memref<1x256xf32, #tpu.memory_space<vmem>>, %arg14: memref<256x128xf32, #tpu.memory_space<vmem>>, %arg15: memref<1x128xf32, #tpu.memory_space<vmem>>, %arg16: memref<1x128xf32, #tpu.memory_space<vmem>>, %arg17: memref<1x128xf32, #tpu.memory_space<vmem>>, %arg18: memref<1x8x128xf32, #tpu.memory_space<vmem>>) attributes {dimension_semantics = [#tpu.dimension_semantics<parallel>], iteration_bounds = array<i64: 2>, scalar_prefetch = 0 : i64, scratch_operands = 0 : i64, tpu.core_type = #tpu.core_type<tc>, window_params = [{transform_indices = @transform_0, window_bounds = array<i64: 1, 8, 256>}, {pipeline_mode = #tpu.pipeline_mode<synchronous>, transform_indices = @transform_1, window_bounds = array<i64: 8, 256, 32>}, {pipeline_mode = #tpu.pipeline_mode<synchronous>, transform_indices = @transform_2, window_bounds = array<i64: 8, 256, 32>}, {pipeline_mode = #tpu.pipeline_mode<synchronous>, transform_indices = @transform_3, window_bounds = array<i64: 8, 256, 32>}, {pipeline_mode = #tpu.pipeline_mode<synchronous>, transform_indices = @transform_4, window_bounds = array<i64: 8, 1, 32>}, {pipeline_mode = #tpu.pipeline_mode<synchronous>, transform_indices = @transform_5, window_bounds = array<i64: 8, 1, 32>}, {pipeline_mode = #tpu.pipeline_mode<synchronous>, transform_indices = @transform_6, window_bounds = array<i64: 8, 1, 32>}, {pipeline_mode = #tpu.pipeline_mode<synchronous>, transform_indices = @transform_7, window_bounds = array<i64: 8, 32, 256>}, {pipeline_mode = #tpu.pipeline_mode<synchronous>, transform_indices = @transform_8, window_bounds = array<i64: 1, 256>}, {pipeline_mode = #tpu.pipeline_mode<synchronous>, transform_indices = @transform_9, window_bounds = array<i64: 256, 256>}, {pipeline_mode = #tpu.pipeline_mode<synchronous>, transform_indices = @transform_10, window_bounds = array<i64: 1, 256>}, {pipeline_mode = #tpu.pipeline_mode<synchronous>, transform_indices = @transform_11, window_bounds = array<i64: 1, 256>}, {pipeline_mode = #tpu.pipeline_mode<synchronous>, transform_indices = @transform_12, window_bounds = array<i64: 1, 256>}, {pipeline_mode = #tpu.pipeline_mode<synchronous>, transform_indices = @transform_13, window_bounds = array<i64: 256, 128>}, {pipeline_mode = #tpu.pipeline_mode<synchronous>, transform_indices = @transform_14, window_bounds = array<i64: 1, 128>}, {pipeline_mode = #tpu.pipeline_mode<synchronous>, transform_indices = @transform_15, window_bounds = array<i64: 1, 128>}, {pipeline_mode = #tpu.pipeline_mode<synchronous>, transform_indices = @transform_16, window_bounds = array<i64: 1, 128>}, {transform_indices = @transform_17, window_bounds = array<i64: 1, 8, 128>}]} {
    %c0 = arith.constant 0 : index
    %c0_0 = arith.constant 0 : index
    %c0_1 = arith.constant 0 : index
    %0 = vector.load %arg1[%c0, %c0_0, %c0_1] : memref<1x8x256xf32, #tpu.memory_space<vmem>>, vector<1x8x256xf32>
    %1 = vector.shape_cast %0 : vector<1x8x256xf32> to vector<8x256xf32>
    %cst = arith.constant 0.000000e+00 : f32
    %2 = vector.broadcast %cst : f32 to vector<8x256xf32>
    %c0_2 = arith.constant 0 : index
    %c0_3 = arith.constant 0 : index
    %c0_4 = arith.constant 0 : index
    %3 = vector.load %arg2[%c0_2, %c0_3, %c0_4] : memref<8x256x32xf32, #tpu.memory_space<vmem>>, vector<1x256x32xf32>
    %4 = vector.shape_cast %3 : vector<1x256x32xf32> to vector<256x32xf32>
    %cst_5 = arith.constant dense<0.000000e+00> : vector<8x32xf32>
    %5 = tpu.matmul %1, %4, %cst_5 {dimension_numbers = #tpu.dot_dimension_numbers<[1], [0], [0], [1], [0, 0, 1, 1], [], []>} : vector<8x256xf32>, vector<256x32xf32>, vector<8x32xf32> -> vector<8x32xf32>
    %c0_6 = arith.constant 0 : index
    %c0_7 = arith.constant 0 : index
    %c0_8 = arith.constant 0 : index
    %6 = vector.load %arg5[%c0_6, %c0_7, %c0_8] : memref<8x1x32xf32, #tpu.memory_space<vmem>>, vector<1x1x32xf32>
    %7 = vector.shape_cast %6 : vector<1x1x32xf32> to vector<1x32xf32>
    %8 = vector.broadcast %7 : vector<1x32xf32> to vector<8x32xf32>
    %9 = arith.addf %5, %8 : vector<8x32xf32>
    %c0_9 = arith.constant 0 : index
    %c0_10 = arith.constant 0 : index
    %c0_11 = arith.constant 0 : index
    %10 = vector.load %arg3[%c0_9, %c0_10, %c0_11] : memref<8x256x32xf32, #tpu.memory_space<vmem>>, vector<1x256x32xf32>
    %11 = vector.shape_cast %10 : vector<1x256x32xf32> to vector<256x32xf32>
    %cst_12 = arith.constant dense<0.000000e+00> : vector<8x32xf32>
    %12 = tpu.matmul %1, %11, %cst_12 {dimension_numbers = #tpu.dot_dimension_numbers<[1], [0], [0], [1], [0, 0, 1, 1], [], []>} : vector<8x256xf32>, vector<256x32xf32>, vector<8x32xf32> -> vector<8x32xf32>
    %c0_13 = arith.constant 0 : index
    %c0_14 = arith.constant 0 : index
    %c0_15 = arith.constant 0 : index
    %13 = vector.load %arg6[%c0_13, %c0_14, %c0_15] : memref<8x1x32xf32, #tpu.memory_space<vmem>>, vector<1x1x32xf32>
    %14 = vector.shape_cast %13 : vector<1x1x32xf32> to vector<1x32xf32>
    %15 = vector.broadcast %14 : vector<1x32xf32> to vector<8x32xf32>
    %16 = arith.addf %12, %15 : vector<8x32xf32>
    %c0_16 = arith.constant 0 : index
    %c0_17 = arith.constant 0 : index
    %c0_18 = arith.constant 0 : index
    %17 = vector.load %arg4[%c0_16, %c0_17, %c0_18] : memref<8x256x32xf32, #tpu.memory_space<vmem>>, vector<1x256x32xf32>
    %18 = vector.shape_cast %17 : vector<1x256x32xf32> to vector<256x32xf32>
    %cst_19 = arith.constant dense<0.000000e+00> : vector<8x32xf32>
    %19 = tpu.matmul %1, %18, %cst_19 {dimension_numbers = #tpu.dot_dimension_numbers<[1], [0], [0], [1], [0, 0, 1, 1], [], []>} : vector<8x256xf32>, vector<256x32xf32>, vector<8x32xf32> -> vector<8x32xf32>
    %c0_20 = arith.constant 0 : index
    %c0_21 = arith.constant 0 : index
    %c0_22 = arith.constant 0 : index
    %20 = vector.load %arg7[%c0_20, %c0_21, %c0_22] : memref<8x1x32xf32, #tpu.memory_space<vmem>>, vector<1x1x32xf32>
    %21 = vector.shape_cast %20 : vector<1x1x32xf32> to vector<1x32xf32>
    %22 = vector.broadcast %21 : vector<1x32xf32> to vector<8x32xf32>
    %23 = arith.addf %19, %22 : vector<8x32xf32>
    %cst_23 = arith.constant 0.176776692 : f32
    %24 = vector.broadcast %cst_23 : f32 to vector<8x32xf32>
    %25 = arith.mulf %9, %24 : vector<8x32xf32>
    "tpu.trace_start"() <{level = 10 : i32, message = "sd,td->st"}> : () -> ()
    %cst_24 = arith.constant dense<0.000000e+00> : vector<8x8xf32>
    %26 = tpu.matmul %25, %16, %cst_24 {dimension_numbers = #tpu.dot_dimension_numbers<[1], [1], [0], [0], [0, 0, 1, 0], [], []>} : vector<8x32xf32>, vector<8x32xf32>, vector<8x8xf32> -> vector<8x8xf32>
    "tpu.trace_stop"() : () -> ()
    %cst_25 = arith.constant dense<0xFF800000> : vector<8xf32>
    %27 = vector.multi_reduction <maximumf>, %26, %cst_25 [1] : vector<8x8xf32> to vector<8xf32>
    %28 = vector.shape_cast %27 : vector<8xf32> to vector<8x1xf32>
    %29 = vector.broadcast %28 : vector<8x1xf32> to vector<8x8xf32>
    %30 = arith.subf %26, %29 : vector<8x8xf32>
    %31 = math.exp %30 : vector<8x8xf32>
    %cst_26 = arith.constant dense<0.000000e+00> : vector<8xf32>
    %32 = vector.multi_reduction <add>, %31, %cst_26 [1] : vector<8x8xf32> to vector<8xf32>
    %33 = vector.shape_cast %32 : vector<8xf32> to vector<8x1xf32>
    %34 = vector.broadcast %33 : vector<8x1xf32> to vector<8x8xf32>
    %35 = arith.divf %31, %34 : vector<8x8xf32>
    %cst_27 = arith.constant dense<0.000000e+00> : vector<8x32xf32>
    %36 = tpu.matmul %35, %23, %cst_27 {dimension_numbers = #tpu.dot_dimension_numbers<[1], [0], [0], [1], [0, 0, 1, 1], [], []>} : vector<8x8xf32>, vector<8x32xf32>, vector<8x32xf32> -> vector<8x32xf32>
    %c0_28 = arith.constant 0 : index
    %c0_29 = arith.constant 0 : index
    %c0_30 = arith.constant 0 : index
    %37 = vector.load %arg8[%c0_28, %c0_29, %c0_30] : memref<8x32x256xf32, #tpu.memory_space<vmem>>, vector<1x32x256xf32>
    %38 = vector.shape_cast %37 : vector<1x32x256xf32> to vector<32x256xf32>
    %cst_31 = arith.constant dense<0.000000e+00> : vector<8x256xf32>
    %39 = tpu.matmul %36, %38, %cst_31 {dimension_numbers = #tpu.dot_dimension_numbers<[1], [0], [0], [1], [0, 0, 1, 1], [], []>} : vector<8x32xf32>, vector<32x256xf32>, vector<8x256xf32> -> vector<8x256xf32>
    %40 = arith.addf %2, %39 : vector<8x256xf32>
    %c1 = arith.constant 1 : index
    %c0_32 = arith.constant 0 : index
    %c0_33 = arith.constant 0 : index
    %41 = vector.load %arg2[%c1, %c0_32, %c0_33] : memref<8x256x32xf32, #tpu.memory_space<vmem>>, vector<1x256x32xf32>
    %42 = vector.shape_cast %41 : vector<1x256x32xf32> to vector<256x32xf32>
    %cst_34 = arith.constant dense<0.000000e+00> : vector<8x32xf32>
    %43 = tpu.matmul %1, %42, %cst_34 {dimension_numbers = #tpu.dot_dimension_numbers<[1], [0], [0], [1], [0, 0, 1, 1], [], []>} : vector<8x256xf32>, vector<256x32xf32>, vector<8x32xf32> -> vector<8x32xf32>
    %c1_35 = arith.constant 1 : index
    %c0_36 = arith.constant 0 : index
    %c0_37 = arith.constant 0 : index
    %44 = vector.load %arg5[%c1_35, %c0_36, %c0_37] : memref<8x1x32xf32, #tpu.memory_space<vmem>>, vector<1x1x32xf32>
    %45 = vector.shape_cast %44 : vector<1x1x32xf32> to vector<1x32xf32>
    %46 = vector.broadcast %45 : vector<1x32xf32> to vector<8x32xf32>
    %47 = arith.addf %43, %46 : vector<8x32xf32>
    %c1_38 = arith.constant 1 : index
    %c0_39 = arith.constant 0 : index
    %c0_40 = arith.constant 0 : index
    %48 = vector.load %arg3[%c1_38, %c0_39, %c0_40] : memref<8x256x32xf32, #tpu.memory_space<vmem>>, vector<1x256x32xf32>
    %49 = vector.shape_cast %48 : vector<1x256x32xf32> to vector<256x32xf32>
    %cst_41 = arith.constant dense<0.000000e+00> : vector<8x32xf32>
    %50 = tpu.matmul %1, %49, %cst_41 {dimension_numbers = #tpu.dot_dimension_numbers<[1], [0], [0], [1], [0, 0, 1, 1], [], []>} : vector<8x256xf32>, vector<256x32xf32>, vector<8x32xf32> -> vector<8x32xf32>
    %c1_42 = arith.constant 1 : index
    %c0_43 = arith.constant 0 : index
    %c0_44 = arith.constant 0 : index
    %51 = vector.load %arg6[%c1_42, %c0_43, %c0_44] : memref<8x1x32xf32, #tpu.memory_space<vmem>>, vector<1x1x32xf32>
    %52 = vector.shape_cast %51 : vector<1x1x32xf32> to vector<1x32xf32>
    %53 = vector.broadcast %52 : vector<1x32xf32> to vector<8x32xf32>
    %54 = arith.addf %50, %53 : vector<8x32xf32>
    %c1_45 = arith.constant 1 : index
    %c0_46 = arith.constant 0 : index
    %c0_47 = arith.constant 0 : index
    %55 = vector.load %arg4[%c1_45, %c0_46, %c0_47] : memref<8x256x32xf32, #tpu.memory_space<vmem>>, vector<1x256x32xf32>
    %56 = vector.shape_cast %55 : vector<1x256x32xf32> to vector<256x32xf32>
    %cst_48 = arith.constant dense<0.000000e+00> : vector<8x32xf32>
    %57 = tpu.matmul %1, %56, %cst_48 {dimension_numbers = #tpu.dot_dimension_numbers<[1], [0], [0], [1], [0, 0, 1, 1], [], []>} : vector<8x256xf32>, vector<256x32xf32>, vector<8x32xf32> -> vector<8x32xf32>
    %c1_49 = arith.constant 1 : index
    %c0_50 = arith.constant 0 : index
    %c0_51 = arith.constant 0 : index
    %58 = vector.load %arg7[%c1_49, %c0_50, %c0_51] : memref<8x1x32xf32, #tpu.memory_space<vmem>>, vector<1x1x32xf32>
    %59 = vector.shape_cast %58 : vector<1x1x32xf32> to vector<1x32xf32>
    %60 = vector.broadcast %59 : vector<1x32xf32> to vector<8x32xf32>
    %61 = arith.addf %57, %60 : vector<8x32xf32>
    %cst_52 = arith.constant 0.176776692 : f32
    %62 = vector.broadcast %cst_52 : f32 to vector<8x32xf32>
    %63 = arith.mulf %47, %62 : vector<8x32xf32>
    "tpu.trace_start"() <{level = 10 : i32, message = "sd,td->st"}> : () -> ()
    %cst_53 = arith.constant dense<0.000000e+00> : vector<8x8xf32>
    %64 = tpu.matmul %63, %54, %cst_53 {dimension_numbers = #tpu.dot_dimension_numbers<[1], [1], [0], [0], [0, 0, 1, 0], [], []>} : vector<8x32xf32>, vector<8x32xf32>, vector<8x8xf32> -> vector<8x8xf32>
    "tpu.trace_stop"() : () -> ()
    %cst_54 = arith.constant dense<0xFF800000> : vector<8xf32>
    %65 = vector.multi_reduction <maximumf>, %64, %cst_54 [1] : vector<8x8xf32> to vector<8xf32>
    %66 = vector.shape_cast %65 : vector<8xf32> to vector<8x1xf32>
    %67 = vector.broadcast %66 : vector<8x1xf32> to vector<8x8xf32>
    %68 = arith.subf %64, %67 : vector<8x8xf32>
    %69 = math.exp %68 : vector<8x8xf32>
    %cst_55 = arith.constant dense<0.000000e+00> : vector<8xf32>
    %70 = vector.multi_reduction <add>, %69, %cst_55 [1] : vector<8x8xf32> to vector<8xf32>
    %71 = vector.shape_cast %70 : vector<8xf32> to vector<8x1xf32>
    %72 = vector.broadcast %71 : vector<8x1xf32> to vector<8x8xf32>
    %73 = arith.divf %69, %72 : vector<8x8xf32>
    %cst_56 = arith.constant dense<0.000000e+00> : vector<8x32xf32>
    %74 = tpu.matmul %73, %61, %cst_56 {dimension_numbers = #tpu.dot_dimension_numbers<[1], [0], [0], [1], [0, 0, 1, 1], [], []>} : vector<8x8xf32>, vector<8x32xf32>, vector<8x32xf32> -> vector<8x32xf32>
    %c1_57 = arith.constant 1 : index
    %c0_58 = arith.constant 0 : index
    %c0_59 = arith.constant 0 : index
    %75 = vector.load %arg8[%c1_57, %c0_58, %c0_59] : memref<8x32x256xf32, #tpu.memory_space<vmem>>, vector<1x32x256xf32>
    %76 = vector.shape_cast %75 : vector<1x32x256xf32> to vector<32x256xf32>
    %cst_60 = arith.constant dense<0.000000e+00> : vector<8x256xf32>
    %77 = tpu.matmul %74, %76, %cst_60 {dimension_numbers = #tpu.dot_dimension_numbers<[1], [0], [0], [1], [0, 0, 1, 1], [], []>} : vector<8x32xf32>, vector<32x256xf32>, vector<8x256xf32> -> vector<8x256xf32>
    %78 = arith.addf %40, %77 : vector<8x256xf32>
    %c2 = arith.constant 2 : index
    %c0_61 = arith.constant 0 : index
    %c0_62 = arith.constant 0 : index
    %79 = vector.load %arg2[%c2, %c0_61, %c0_62] : memref<8x256x32xf32, #tpu.memory_space<vmem>>, vector<1x256x32xf32>
    %80 = vector.shape_cast %79 : vector<1x256x32xf32> to vector<256x32xf32>
    %cst_63 = arith.constant dense<0.000000e+00> : vector<8x32xf32>
    %81 = tpu.matmul %1, %80, %cst_63 {dimension_numbers = #tpu.dot_dimension_numbers<[1], [0], [0], [1], [0, 0, 1, 1], [], []>} : vector<8x256xf32>, vector<256x32xf32>, vector<8x32xf32> -> vector<8x32xf32>
    %c2_64 = arith.constant 2 : index
    %c0_65 = arith.constant 0 : index
    %c0_66 = arith.constant 0 : index
    %82 = vector.load %arg5[%c2_64, %c0_65, %c0_66] : memref<8x1x32xf32, #tpu.memory_space<vmem>>, vector<1x1x32xf32>
    %83 = vector.shape_cast %82 : vector<1x1x32xf32> to vector<1x32xf32>
    %84 = vector.broadcast %83 : vector<1x32xf32> to vector<8x32xf32>
    %85 = arith.addf %81, %84 : vector<8x32xf32>
    %c2_67 = arith.constant 2 : index
    %c0_68 = arith.constant 0 : index
    %c0_69 = arith.constant 0 : index
    %86 = vector.load %arg3[%c2_67, %c0_68, %c0_69] : memref<8x256x32xf32, #tpu.memory_space<vmem>>, vector<1x256x32xf32>
    %87 = vector.shape_cast %86 : vector<1x256x32xf32> to vector<256x32xf32>
    %cst_70 = arith.constant dense<0.000000e+00> : vector<8x32xf32>
    %88 = tpu.matmul %1, %87, %cst_70 {dimension_numbers = #tpu.dot_dimension_numbers<[1], [0], [0], [1], [0, 0, 1, 1], [], []>} : vector<8x256xf32>, vector<256x32xf32>, vector<8x32xf32> -> vector<8x32xf32>
    %c2_71 = arith.constant 2 : index
    %c0_72 = arith.constant 0 : index
    %c0_73 = arith.constant 0 : index
    %89 = vector.load %arg6[%c2_71, %c0_72, %c0_73] : memref<8x1x32xf32, #tpu.memory_space<vmem>>, vector<1x1x32xf32>
    %90 = vector.shape_cast %89 : vector<1x1x32xf32> to vector<1x32xf32>
    %91 = vector.broadcast %90 : vector<1x32xf32> to vector<8x32xf32>
    %92 = arith.addf %88, %91 : vector<8x32xf32>
    %c2_74 = arith.constant 2 : index
    %c0_75 = arith.constant 0 : index
    %c0_76 = arith.constant 0 : index
    %93 = vector.load %arg4[%c2_74, %c0_75, %c0_76] : memref<8x256x32xf32, #tpu.memory_space<vmem>>, vector<1x256x32xf32>
    %94 = vector.shape_cast %93 : vector<1x256x32xf32> to vector<256x32xf32>
    %cst_77 = arith.constant dense<0.000000e+00> : vector<8x32xf32>
    %95 = tpu.matmul %1, %94, %cst_77 {dimension_numbers = #tpu.dot_dimension_numbers<[1], [0], [0], [1], [0, 0, 1, 1], [], []>} : vector<8x256xf32>, vector<256x32xf32>, vector<8x32xf32> -> vector<8x32xf32>
    %c2_78 = arith.constant 2 : index
    %c0_79 = arith.constant 0 : index
    %c0_80 = arith.constant 0 : index
    %96 = vector.load %arg7[%c2_78, %c0_79, %c0_80] : memref<8x1x32xf32, #tpu.memory_space<vmem>>, vector<1x1x32xf32>
    %97 = vector.shape_cast %96 : vector<1x1x32xf32> to vector<1x32xf32>
    %98 = vector.broadcast %97 : vector<1x32xf32> to vector<8x32xf32>
    %99 = arith.addf %95, %98 : vector<8x32xf32>
    %cst_81 = arith.constant 0.176776692 : f32
    %100 = vector.broadcast %cst_81 : f32 to vector<8x32xf32>
    %101 = arith.mulf %85, %100 : vector<8x32xf32>
    "tpu.trace_start"() <{level = 10 : i32, message = "sd,td->st"}> : () -> ()
    %cst_82 = arith.constant dense<0.000000e+00> : vector<8x8xf32>
    %102 = tpu.matmul %101, %92, %cst_82 {dimension_numbers = #tpu.dot_dimension_numbers<[1], [1], [0], [0], [0, 0, 1, 0], [], []>} : vector<8x32xf32>, vector<8x32xf32>, vector<8x8xf32> -> vector<8x8xf32>
    "tpu.trace_stop"() : () -> ()
    %cst_83 = arith.constant dense<0xFF800000> : vector<8xf32>
    %103 = vector.multi_reduction <maximumf>, %102, %cst_83 [1] : vector<8x8xf32> to vector<8xf32>
    %104 = vector.shape_cast %103 : vector<8xf32> to vector<8x1xf32>
    %105 = vector.broadcast %104 : vector<8x1xf32> to vector<8x8xf32>
    %106 = arith.subf %102, %105 : vector<8x8xf32>
    %107 = math.exp %106 : vector<8x8xf32>
    %cst_84 = arith.constant dense<0.000000e+00> : vector<8xf32>
    %108 = vector.multi_reduction <add>, %107, %cst_84 [1] : vector<8x8xf32> to vector<8xf32>
    %109 = vector.shape_cast %108 : vector<8xf32> to vector<8x1xf32>
    %110 = vector.broadcast %109 : vector<8x1xf32> to vector<8x8xf32>
    %111 = arith.divf %107, %110 : vector<8x8xf32>
    %cst_85 = arith.constant dense<0.000000e+00> : vector<8x32xf32>
    %112 = tpu.matmul %111, %99, %cst_85 {dimension_numbers = #tpu.dot_dimension_numbers<[1], [0], [0], [1], [0, 0, 1, 1], [], []>} : vector<8x8xf32>, vector<8x32xf32>, vector<8x32xf32> -> vector<8x32xf32>
    %c2_86 = arith.constant 2 : index
    %c0_87 = arith.constant 0 : index
    %c0_88 = arith.constant 0 : index
    %113 = vector.load %arg8[%c2_86, %c0_87, %c0_88] : memref<8x32x256xf32, #tpu.memory_space<vmem>>, vector<1x32x256xf32>
    %114 = vector.shape_cast %113 : vector<1x32x256xf32> to vector<32x256xf32>
    %cst_89 = arith.constant dense<0.000000e+00> : vector<8x256xf32>
    %115 = tpu.matmul %112, %114, %cst_89 {dimension_numbers = #tpu.dot_dimension_numbers<[1], [0], [0], [1], [0, 0, 1, 1], [], []>} : vector<8x32xf32>, vector<32x256xf32>, vector<8x256xf32> -> vector<8x256xf32>
    %116 = arith.addf %78, %115 : vector<8x256xf32>
    %c3 = arith.constant 3 : index
    %c0_90 = arith.constant 0 : index
    %c0_91 = arith.constant 0 : index
    %117 = vector.load %arg2[%c3, %c0_90, %c0_91] : memref<8x256x32xf32, #tpu.memory_space<vmem>>, vector<1x256x32xf32>
    %118 = vector.shape_cast %117 : vector<1x256x32xf32> to vector<256x32xf32>
    %cst_92 = arith.constant dense<0.000000e+00> : vector<8x32xf32>
    %119 = tpu.matmul %1, %118, %cst_92 {dimension_numbers = #tpu.dot_dimension_numbers<[1], [0], [0], [1], [0, 0, 1, 1], [], []>} : vector<8x256xf32>, vector<256x32xf32>, vector<8x32xf32> -> vector<8x32xf32>
    %c3_93 = arith.constant 3 : index
    %c0_94 = arith.constant 0 : index
    %c0_95 = arith.constant 0 : index
    %120 = vector.load %arg5[%c3_93, %c0_94, %c0_95] : memref<8x1x32xf32, #tpu.memory_space<vmem>>, vector<1x1x32xf32>
    %121 = vector.shape_cast %120 : vector<1x1x32xf32> to vector<1x32xf32>
    %122 = vector.broadcast %121 : vector<1x32xf32> to vector<8x32xf32>
    %123 = arith.addf %119, %122 : vector<8x32xf32>
    %c3_96 = arith.constant 3 : index
    %c0_97 = arith.constant 0 : index
    %c0_98 = arith.constant 0 : index
    %124 = vector.load %arg3[%c3_96, %c0_97, %c0_98] : memref<8x256x32xf32, #tpu.memory_space<vmem>>, vector<1x256x32xf32>
    %125 = vector.shape_cast %124 : vector<1x256x32xf32> to vector<256x32xf32>
    %cst_99 = arith.constant dense<0.000000e+00> : vector<8x32xf32>
    %126 = tpu.matmul %1, %125, %cst_99 {dimension_numbers = #tpu.dot_dimension_numbers<[1], [0], [0], [1], [0, 0, 1, 1], [], []>} : vector<8x256xf32>, vector<256x32xf32>, vector<8x32xf32> -> vector<8x32xf32>
    %c3_100 = arith.constant 3 : index
    %c0_101 = arith.constant 0 : index
    %c0_102 = arith.constant 0 : index
    %127 = vector.load %arg6[%c3_100, %c0_101, %c0_102] : memref<8x1x32xf32, #tpu.memory_space<vmem>>, vector<1x1x32xf32>
    %128 = vector.shape_cast %127 : vector<1x1x32xf32> to vector<1x32xf32>
    %129 = vector.broadcast %128 : vector<1x32xf32> to vector<8x32xf32>
    %130 = arith.addf %126, %129 : vector<8x32xf32>
    %c3_103 = arith.constant 3 : index
    %c0_104 = arith.constant 0 : index
    %c0_105 = arith.constant 0 : index
    %131 = vector.load %arg4[%c3_103, %c0_104, %c0_105] : memref<8x256x32xf32, #tpu.memory_space<vmem>>, vector<1x256x32xf32>
    %132 = vector.shape_cast %131 : vector<1x256x32xf32> to vector<256x32xf32>
    %cst_106 = arith.constant dense<0.000000e+00> : vector<8x32xf32>
    %133 = tpu.matmul %1, %132, %cst_106 {dimension_numbers = #tpu.dot_dimension_numbers<[1], [0], [0], [1], [0, 0, 1, 1], [], []>} : vector<8x256xf32>, vector<256x32xf32>, vector<8x32xf32> -> vector<8x32xf32>
    %c3_107 = arith.constant 3 : index
    %c0_108 = arith.constant 0 : index
    %c0_109 = arith.constant 0 : index
    %134 = vector.load %arg7[%c3_107, %c0_108, %c0_109] : memref<8x1x32xf32, #tpu.memory_space<vmem>>, vector<1x1x32xf32>
    %135 = vector.shape_cast %134 : vector<1x1x32xf32> to vector<1x32xf32>
    %136 = vector.broadcast %135 : vector<1x32xf32> to vector<8x32xf32>
    %137 = arith.addf %133, %136 : vector<8x32xf32>
    %cst_110 = arith.constant 0.176776692 : f32
    %138 = vector.broadcast %cst_110 : f32 to vector<8x32xf32>
    %139 = arith.mulf %123, %138 : vector<8x32xf32>
    "tpu.trace_start"() <{level = 10 : i32, message = "sd,td->st"}> : () -> ()
    %cst_111 = arith.constant dense<0.000000e+00> : vector<8x8xf32>
    %140 = tpu.matmul %139, %130, %cst_111 {dimension_numbers = #tpu.dot_dimension_numbers<[1], [1], [0], [0], [0, 0, 1, 0], [], []>} : vector<8x32xf32>, vector<8x32xf32>, vector<8x8xf32> -> vector<8x8xf32>
    "tpu.trace_stop"() : () -> ()
    %cst_112 = arith.constant dense<0xFF800000> : vector<8xf32>
    %141 = vector.multi_reduction <maximumf>, %140, %cst_112 [1] : vector<8x8xf32> to vector<8xf32>
    %142 = vector.shape_cast %141 : vector<8xf32> to vector<8x1xf32>
    %143 = vector.broadcast %142 : vector<8x1xf32> to vector<8x8xf32>
    %144 = arith.subf %140, %143 : vector<8x8xf32>
    %145 = math.exp %144 : vector<8x8xf32>
    %cst_113 = arith.constant dense<0.000000e+00> : vector<8xf32>
    %146 = vector.multi_reduction <add>, %145, %cst_113 [1] : vector<8x8xf32> to vector<8xf32>
    %147 = vector.shape_cast %146 : vector<8xf32> to vector<8x1xf32>
    %148 = vector.broadcast %147 : vector<8x1xf32> to vector<8x8xf32>
    %149 = arith.divf %145, %148 : vector<8x8xf32>
    %cst_114 = arith.constant dense<0.000000e+00> : vector<8x32xf32>
    %150 = tpu.matmul %149, %137, %cst_114 {dimension_numbers = #tpu.dot_dimension_numbers<[1], [0], [0], [1], [0, 0, 1, 1], [], []>} : vector<8x8xf32>, vector<8x32xf32>, vector<8x32xf32> -> vector<8x32xf32>
    %c3_115 = arith.constant 3 : index
    %c0_116 = arith.constant 0 : index
    %c0_117 = arith.constant 0 : index
    %151 = vector.load %arg8[%c3_115, %c0_116, %c0_117] : memref<8x32x256xf32, #tpu.memory_space<vmem>>, vector<1x32x256xf32>
    %152 = vector.shape_cast %151 : vector<1x32x256xf32> to vector<32x256xf32>
    %cst_118 = arith.constant dense<0.000000e+00> : vector<8x256xf32>
    %153 = tpu.matmul %150, %152, %cst_118 {dimension_numbers = #tpu.dot_dimension_numbers<[1], [0], [0], [1], [0, 0, 1, 1], [], []>} : vector<8x32xf32>, vector<32x256xf32>, vector<8x256xf32> -> vector<8x256xf32>
    %154 = arith.addf %116, %153 : vector<8x256xf32>
    %c4 = arith.constant 4 : index
    %c0_119 = arith.constant 0 : index
    %c0_120 = arith.constant 0 : index
    %155 = vector.load %arg2[%c4, %c0_119, %c0_120] : memref<8x256x32xf32, #tpu.memory_space<vmem>>, vector<1x256x32xf32>
    %156 = vector.shape_cast %155 : vector<1x256x32xf32> to vector<256x32xf32>
    %cst_121 = arith.constant dense<0.000000e+00> : vector<8x32xf32>
    %157 = tpu.matmul %1, %156, %cst_121 {dimension_numbers = #tpu.dot_dimension_numbers<[1], [0], [0], [1], [0, 0, 1, 1], [], []>} : vector<8x256xf32>, vector<256x32xf32>, vector<8x32xf32> -> vector<8x32xf32>
    %c4_122 = arith.constant 4 : index
    %c0_123 = arith.constant 0 : index
    %c0_124 = arith.constant 0 : index
    %158 = vector.load %arg5[%c4_122, %c0_123, %c0_124] : memref<8x1x32xf32, #tpu.memory_space<vmem>>, vector<1x1x32xf32>
    %159 = vector.shape_cast %158 : vector<1x1x32xf32> to vector<1x32xf32>
    %160 = vector.broadcast %159 : vector<1x32xf32> to vector<8x32xf32>
    %161 = arith.addf %157, %160 : vector<8x32xf32>
    %c4_125 = arith.constant 4 : index
    %c0_126 = arith.constant 0 : index
    %c0_127 = arith.constant 0 : index
    %162 = vector.load %arg3[%c4_125, %c0_126, %c0_127] : memref<8x256x32xf32, #tpu.memory_space<vmem>>, vector<1x256x32xf32>
    %163 = vector.shape_cast %162 : vector<1x256x32xf32> to vector<256x32xf32>
    %cst_128 = arith.constant dense<0.000000e+00> : vector<8x32xf32>
    %164 = tpu.matmul %1, %163, %cst_128 {dimension_numbers = #tpu.dot_dimension_numbers<[1], [0], [0], [1], [0, 0, 1, 1], [], []>} : vector<8x256xf32>, vector<256x32xf32>, vector<8x32xf32> -> vector<8x32xf32>
    %c4_129 = arith.constant 4 : index
    %c0_130 = arith.constant 0 : index
    %c0_131 = arith.constant 0 : index
    %165 = vector.load %arg6[%c4_129, %c0_130, %c0_131] : memref<8x1x32xf32, #tpu.memory_space<vmem>>, vector<1x1x32xf32>
    %166 = vector.shape_cast %165 : vector<1x1x32xf32> to vector<1x32xf32>
    %167 = vector.broadcast %166 : vector<1x32xf32> to vector<8x32xf32>
    %168 = arith.addf %164, %167 : vector<8x32xf32>
    %c4_132 = arith.constant 4 : index
    %c0_133 = arith.constant 0 : index
    %c0_134 = arith.constant 0 : index
    %169 = vector.load %arg4[%c4_132, %c0_133, %c0_134] : memref<8x256x32xf32, #tpu.memory_space<vmem>>, vector<1x256x32xf32>
    %170 = vector.shape_cast %169 : vector<1x256x32xf32> to vector<256x32xf32>
    %cst_135 = arith.constant dense<0.000000e+00> : vector<8x32xf32>
    %171 = tpu.matmul %1, %170, %cst_135 {dimension_numbers = #tpu.dot_dimension_numbers<[1], [0], [0], [1], [0, 0, 1, 1], [], []>} : vector<8x256xf32>, vector<256x32xf32>, vector<8x32xf32> -> vector<8x32xf32>
    %c4_136 = arith.constant 4 : index
    %c0_137 = arith.constant 0 : index
    %c0_138 = arith.constant 0 : index
    %172 = vector.load %arg7[%c4_136, %c0_137, %c0_138] : memref<8x1x32xf32, #tpu.memory_space<vmem>>, vector<1x1x32xf32>
    %173 = vector.shape_cast %172 : vector<1x1x32xf32> to vector<1x32xf32>
    %174 = vector.broadcast %173 : vector<1x32xf32> to vector<8x32xf32>
    %175 = arith.addf %171, %174 : vector<8x32xf32>
    %cst_139 = arith.constant 0.176776692 : f32
    %176 = vector.broadcast %cst_139 : f32 to vector<8x32xf32>
    %177 = arith.mulf %161, %176 : vector<8x32xf32>
    "tpu.trace_start"() <{level = 10 : i32, message = "sd,td->st"}> : () -> ()
    %cst_140 = arith.constant dense<0.000000e+00> : vector<8x8xf32>
    %178 = tpu.matmul %177, %168, %cst_140 {dimension_numbers = #tpu.dot_dimension_numbers<[1], [1], [0], [0], [0, 0, 1, 0], [], []>} : vector<8x32xf32>, vector<8x32xf32>, vector<8x8xf32> -> vector<8x8xf32>
    "tpu.trace_stop"() : () -> ()
    %cst_141 = arith.constant dense<0xFF800000> : vector<8xf32>
    %179 = vector.multi_reduction <maximumf>, %178, %cst_141 [1] : vector<8x8xf32> to vector<8xf32>
    %180 = vector.shape_cast %179 : vector<8xf32> to vector<8x1xf32>
    %181 = vector.broadcast %180 : vector<8x1xf32> to vector<8x8xf32>
    %182 = arith.subf %178, %181 : vector<8x8xf32>
    %183 = math.exp %182 : vector<8x8xf32>
    %cst_142 = arith.constant dense<0.000000e+00> : vector<8xf32>
    %184 = vector.multi_reduction <add>, %183, %cst_142 [1] : vector<8x8xf32> to vector<8xf32>
    %185 = vector.shape_cast %184 : vector<8xf32> to vector<8x1xf32>
    %186 = vector.broadcast %185 : vector<8x1xf32> to vector<8x8xf32>
    %187 = arith.divf %183, %186 : vector<8x8xf32>
    %cst_143 = arith.constant dense<0.000000e+00> : vector<8x32xf32>
    %188 = tpu.matmul %187, %175, %cst_143 {dimension_numbers = #tpu.dot_dimension_numbers<[1], [0], [0], [1], [0, 0, 1, 1], [], []>} : vector<8x8xf32>, vector<8x32xf32>, vector<8x32xf32> -> vector<8x32xf32>
    %c4_144 = arith.constant 4 : index
    %c0_145 = arith.constant 0 : index
    %c0_146 = arith.constant 0 : index
    %189 = vector.load %arg8[%c4_144, %c0_145, %c0_146] : memref<8x32x256xf32, #tpu.memory_space<vmem>>, vector<1x32x256xf32>
    %190 = vector.shape_cast %189 : vector<1x32x256xf32> to vector<32x256xf32>
    %cst_147 = arith.constant dense<0.000000e+00> : vector<8x256xf32>
    %191 = tpu.matmul %188, %190, %cst_147 {dimension_numbers = #tpu.dot_dimension_numbers<[1], [0], [0], [1], [0, 0, 1, 1], [], []>} : vector<8x32xf32>, vector<32x256xf32>, vector<8x256xf32> -> vector<8x256xf32>
    %192 = arith.addf %154, %191 : vector<8x256xf32>
    %c5 = arith.constant 5 : index
    %c0_148 = arith.constant 0 : index
    %c0_149 = arith.constant 0 : index
    %193 = vector.load %arg2[%c5, %c0_148, %c0_149] : memref<8x256x32xf32, #tpu.memory_space<vmem>>, vector<1x256x32xf32>
    %194 = vector.shape_cast %193 : vector<1x256x32xf32> to vector<256x32xf32>
    %cst_150 = arith.constant dense<0.000000e+00> : vector<8x32xf32>
    %195 = tpu.matmul %1, %194, %cst_150 {dimension_numbers = #tpu.dot_dimension_numbers<[1], [0], [0], [1], [0, 0, 1, 1], [], []>} : vector<8x256xf32>, vector<256x32xf32>, vector<8x32xf32> -> vector<8x32xf32>
    %c5_151 = arith.constant 5 : index
    %c0_152 = arith.constant 0 : index
    %c0_153 = arith.constant 0 : index
    %196 = vector.load %arg5[%c5_151, %c0_152, %c0_153] : memref<8x1x32xf32, #tpu.memory_space<vmem>>, vector<1x1x32xf32>
    %197 = vector.shape_cast %196 : vector<1x1x32xf32> to vector<1x32xf32>
    %198 = vector.broadcast %197 : vector<1x32xf32> to vector<8x32xf32>
    %199 = arith.addf %195, %198 : vector<8x32xf32>
    %c5_154 = arith.constant 5 : index
    %c0_155 = arith.constant 0 : index
    %c0_156 = arith.constant 0 : index
    %200 = vector.load %arg3[%c5_154, %c0_155, %c0_156] : memref<8x256x32xf32, #tpu.memory_space<vmem>>, vector<1x256x32xf32>
    %201 = vector.shape_cast %200 : vector<1x256x32xf32> to vector<256x32xf32>
    %cst_157 = arith.constant dense<0.000000e+00> : vector<8x32xf32>
    %202 = tpu.matmul %1, %201, %cst_157 {dimension_numbers = #tpu.dot_dimension_numbers<[1], [0], [0], [1], [0, 0, 1, 1], [], []>} : vector<8x256xf32>, vector<256x32xf32>, vector<8x32xf32> -> vector<8x32xf32>
    %c5_158 = arith.constant 5 : index
    %c0_159 = arith.constant 0 : index
    %c0_160 = arith.constant 0 : index
    %203 = vector.load %arg6[%c5_158, %c0_159, %c0_160] : memref<8x1x32xf32, #tpu.memory_space<vmem>>, vector<1x1x32xf32>
    %204 = vector.shape_cast %203 : vector<1x1x32xf32> to vector<1x32xf32>
    %205 = vector.broadcast %204 : vector<1x32xf32> to vector<8x32xf32>
    %206 = arith.addf %202, %205 : vector<8x32xf32>
    %c5_161 = arith.constant 5 : index
    %c0_162 = arith.constant 0 : index
    %c0_163 = arith.constant 0 : index
    %207 = vector.load %arg4[%c5_161, %c0_162, %c0_163] : memref<8x256x32xf32, #tpu.memory_space<vmem>>, vector<1x256x32xf32>
    %208 = vector.shape_cast %207 : vector<1x256x32xf32> to vector<256x32xf32>
    %cst_164 = arith.constant dense<0.000000e+00> : vector<8x32xf32>
    %209 = tpu.matmul %1, %208, %cst_164 {dimension_numbers = #tpu.dot_dimension_numbers<[1], [0], [0], [1], [0, 0, 1, 1], [], []>} : vector<8x256xf32>, vector<256x32xf32>, vector<8x32xf32> -> vector<8x32xf32>
    %c5_165 = arith.constant 5 : index
    %c0_166 = arith.constant 0 : index
    %c0_167 = arith.constant 0 : index
    %210 = vector.load %arg7[%c5_165, %c0_166, %c0_167] : memref<8x1x32xf32, #tpu.memory_space<vmem>>, vector<1x1x32xf32>
    %211 = vector.shape_cast %210 : vector<1x1x32xf32> to vector<1x32xf32>
    %212 = vector.broadcast %211 : vector<1x32xf32> to vector<8x32xf32>
    %213 = arith.addf %209, %212 : vector<8x32xf32>
    %cst_168 = arith.constant 0.176776692 : f32
    %214 = vector.broadcast %cst_168 : f32 to vector<8x32xf32>
    %215 = arith.mulf %199, %214 : vector<8x32xf32>
    "tpu.trace_start"() <{level = 10 : i32, message = "sd,td->st"}> : () -> ()
    %cst_169 = arith.constant dense<0.000000e+00> : vector<8x8xf32>
    %216 = tpu.matmul %215, %206, %cst_169 {dimension_numbers = #tpu.dot_dimension_numbers<[1], [1], [0], [0], [0, 0, 1, 0], [], []>} : vector<8x32xf32>, vector<8x32xf32>, vector<8x8xf32> -> vector<8x8xf32>
    "tpu.trace_stop"() : () -> ()
    %cst_170 = arith.constant dense<0xFF800000> : vector<8xf32>
    %217 = vector.multi_reduction <maximumf>, %216, %cst_170 [1] : vector<8x8xf32> to vector<8xf32>
    %218 = vector.shape_cast %217 : vector<8xf32> to vector<8x1xf32>
    %219 = vector.broadcast %218 : vector<8x1xf32> to vector<8x8xf32>
    %220 = arith.subf %216, %219 : vector<8x8xf32>
    %221 = math.exp %220 : vector<8x8xf32>
    %cst_171 = arith.constant dense<0.000000e+00> : vector<8xf32>
    %222 = vector.multi_reduction <add>, %221, %cst_171 [1] : vector<8x8xf32> to vector<8xf32>
    %223 = vector.shape_cast %222 : vector<8xf32> to vector<8x1xf32>
    %224 = vector.broadcast %223 : vector<8x1xf32> to vector<8x8xf32>
    %225 = arith.divf %221, %224 : vector<8x8xf32>
    %cst_172 = arith.constant dense<0.000000e+00> : vector<8x32xf32>
    %226 = tpu.matmul %225, %213, %cst_172 {dimension_numbers = #tpu.dot_dimension_numbers<[1], [0], [0], [1], [0, 0, 1, 1], [], []>} : vector<8x8xf32>, vector<8x32xf32>, vector<8x32xf32> -> vector<8x32xf32>
    %c5_173 = arith.constant 5 : index
    %c0_174 = arith.constant 0 : index
    %c0_175 = arith.constant 0 : index
    %227 = vector.load %arg8[%c5_173, %c0_174, %c0_175] : memref<8x32x256xf32, #tpu.memory_space<vmem>>, vector<1x32x256xf32>
    %228 = vector.shape_cast %227 : vector<1x32x256xf32> to vector<32x256xf32>
    %cst_176 = arith.constant dense<0.000000e+00> : vector<8x256xf32>
    %229 = tpu.matmul %226, %228, %cst_176 {dimension_numbers = #tpu.dot_dimension_numbers<[1], [0], [0], [1], [0, 0, 1, 1], [], []>} : vector<8x32xf32>, vector<32x256xf32>, vector<8x256xf32> -> vector<8x256xf32>
    %230 = arith.addf %192, %229 : vector<8x256xf32>
    %c6 = arith.constant 6 : index
    %c0_177 = arith.constant 0 : index
    %c0_178 = arith.constant 0 : index
    %231 = vector.load %arg2[%c6, %c0_177, %c0_178] : memref<8x256x32xf32, #tpu.memory_space<vmem>>, vector<1x256x32xf32>
    %232 = vector.shape_cast %231 : vector<1x256x32xf32> to vector<256x32xf32>
    %cst_179 = arith.constant dense<0.000000e+00> : vector<8x32xf32>
    %233 = tpu.matmul %1, %232, %cst_179 {dimension_numbers = #tpu.dot_dimension_numbers<[1], [0], [0], [1], [0, 0, 1, 1], [], []>} : vector<8x256xf32>, vector<256x32xf32>, vector<8x32xf32> -> vector<8x32xf32>
    %c6_180 = arith.constant 6 : index
    %c0_181 = arith.constant 0 : index
    %c0_182 = arith.constant 0 : index
    %234 = vector.load %arg5[%c6_180, %c0_181, %c0_182] : memref<8x1x32xf32, #tpu.memory_space<vmem>>, vector<1x1x32xf32>
    %235 = vector.shape_cast %234 : vector<1x1x32xf32> to vector<1x32xf32>
    %236 = vector.broadcast %235 : vector<1x32xf32> to vector<8x32xf32>
    %237 = arith.addf %233, %236 : vector<8x32xf32>
    %c6_183 = arith.constant 6 : index
    %c0_184 = arith.constant 0 : index
    %c0_185 = arith.constant 0 : index
    %238 = vector.load %arg3[%c6_183, %c0_184, %c0_185] : memref<8x256x32xf32, #tpu.memory_space<vmem>>, vector<1x256x32xf32>
    %239 = vector.shape_cast %238 : vector<1x256x32xf32> to vector<256x32xf32>
    %cst_186 = arith.constant dense<0.000000e+00> : vector<8x32xf32>
    %240 = tpu.matmul %1, %239, %cst_186 {dimension_numbers = #tpu.dot_dimension_numbers<[1], [0], [0], [1], [0, 0, 1, 1], [], []>} : vector<8x256xf32>, vector<256x32xf32>, vector<8x32xf32> -> vector<8x32xf32>
    %c6_187 = arith.constant 6 : index
    %c0_188 = arith.constant 0 : index
    %c0_189 = arith.constant 0 : index
    %241 = vector.load %arg6[%c6_187, %c0_188, %c0_189] : memref<8x1x32xf32, #tpu.memory_space<vmem>>, vector<1x1x32xf32>
    %242 = vector.shape_cast %241 : vector<1x1x32xf32> to vector<1x32xf32>
    %243 = vector.broadcast %242 : vector<1x32xf32> to vector<8x32xf32>
    %244 = arith.addf %240, %243 : vector<8x32xf32>
    %c6_190 = arith.constant 6 : index
    %c0_191 = arith.constant 0 : index
    %c0_192 = arith.constant 0 : index
    %245 = vector.load %arg4[%c6_190, %c0_191, %c0_192] : memref<8x256x32xf32, #tpu.memory_space<vmem>>, vector<1x256x32xf32>
    %246 = vector.shape_cast %245 : vector<1x256x32xf32> to vector<256x32xf32>
    %cst_193 = arith.constant dense<0.000000e+00> : vector<8x32xf32>
    %247 = tpu.matmul %1, %246, %cst_193 {dimension_numbers = #tpu.dot_dimension_numbers<[1], [0], [0], [1], [0, 0, 1, 1], [], []>} : vector<8x256xf32>, vector<256x32xf32>, vector<8x32xf32> -> vector<8x32xf32>
    %c6_194 = arith.constant 6 : index
    %c0_195 = arith.constant 0 : index
    %c0_196 = arith.constant 0 : index
    %248 = vector.load %arg7[%c6_194, %c0_195, %c0_196] : memref<8x1x32xf32, #tpu.memory_space<vmem>>, vector<1x1x32xf32>
    %249 = vector.shape_cast %248 : vector<1x1x32xf32> to vector<1x32xf32>
    %250 = vector.broadcast %249 : vector<1x32xf32> to vector<8x32xf32>
    %251 = arith.addf %247, %250 : vector<8x32xf32>
    %cst_197 = arith.constant 0.176776692 : f32
    %252 = vector.broadcast %cst_197 : f32 to vector<8x32xf32>
    %253 = arith.mulf %237, %252 : vector<8x32xf32>
    "tpu.trace_start"() <{level = 10 : i32, message = "sd,td->st"}> : () -> ()
    %cst_198 = arith.constant dense<0.000000e+00> : vector<8x8xf32>
    %254 = tpu.matmul %253, %244, %cst_198 {dimension_numbers = #tpu.dot_dimension_numbers<[1], [1], [0], [0], [0, 0, 1, 0], [], []>} : vector<8x32xf32>, vector<8x32xf32>, vector<8x8xf32> -> vector<8x8xf32>
    "tpu.trace_stop"() : () -> ()
    %cst_199 = arith.constant dense<0xFF800000> : vector<8xf32>
    %255 = vector.multi_reduction <maximumf>, %254, %cst_199 [1] : vector<8x8xf32> to vector<8xf32>
    %256 = vector.shape_cast %255 : vector<8xf32> to vector<8x1xf32>
    %257 = vector.broadcast %256 : vector<8x1xf32> to vector<8x8xf32>
    %258 = arith.subf %254, %257 : vector<8x8xf32>
    %259 = math.exp %258 : vector<8x8xf32>
    %cst_200 = arith.constant dense<0.000000e+00> : vector<8xf32>
    %260 = vector.multi_reduction <add>, %259, %cst_200 [1] : vector<8x8xf32> to vector<8xf32>
    %261 = vector.shape_cast %260 : vector<8xf32> to vector<8x1xf32>
    %262 = vector.broadcast %261 : vector<8x1xf32> to vector<8x8xf32>
    %263 = arith.divf %259, %262 : vector<8x8xf32>
    %cst_201 = arith.constant dense<0.000000e+00> : vector<8x32xf32>
    %264 = tpu.matmul %263, %251, %cst_201 {dimension_numbers = #tpu.dot_dimension_numbers<[1], [0], [0], [1], [0, 0, 1, 1], [], []>} : vector<8x8xf32>, vector<8x32xf32>, vector<8x32xf32> -> vector<8x32xf32>
    %c6_202 = arith.constant 6 : index
    %c0_203 = arith.constant 0 : index
    %c0_204 = arith.constant 0 : index
    %265 = vector.load %arg8[%c6_202, %c0_203, %c0_204] : memref<8x32x256xf32, #tpu.memory_space<vmem>>, vector<1x32x256xf32>
    %266 = vector.shape_cast %265 : vector<1x32x256xf32> to vector<32x256xf32>
    %cst_205 = arith.constant dense<0.000000e+00> : vector<8x256xf32>
    %267 = tpu.matmul %264, %266, %cst_205 {dimension_numbers = #tpu.dot_dimension_numbers<[1], [0], [0], [1], [0, 0, 1, 1], [], []>} : vector<8x32xf32>, vector<32x256xf32>, vector<8x256xf32> -> vector<8x256xf32>
    %268 = arith.addf %230, %267 : vector<8x256xf32>
    %c7 = arith.constant 7 : index
    %c0_206 = arith.constant 0 : index
    %c0_207 = arith.constant 0 : index
    %269 = vector.load %arg2[%c7, %c0_206, %c0_207] : memref<8x256x32xf32, #tpu.memory_space<vmem>>, vector<1x256x32xf32>
    %270 = vector.shape_cast %269 : vector<1x256x32xf32> to vector<256x32xf32>
    %cst_208 = arith.constant dense<0.000000e+00> : vector<8x32xf32>
    %271 = tpu.matmul %1, %270, %cst_208 {dimension_numbers = #tpu.dot_dimension_numbers<[1], [0], [0], [1], [0, 0, 1, 1], [], []>} : vector<8x256xf32>, vector<256x32xf32>, vector<8x32xf32> -> vector<8x32xf32>
    %c7_209 = arith.constant 7 : index
    %c0_210 = arith.constant 0 : index
    %c0_211 = arith.constant 0 : index
    %272 = vector.load %arg5[%c7_209, %c0_210, %c0_211] : memref<8x1x32xf32, #tpu.memory_space<vmem>>, vector<1x1x32xf32>
    %273 = vector.shape_cast %272 : vector<1x1x32xf32> to vector<1x32xf32>
    %274 = vector.broadcast %273 : vector<1x32xf32> to vector<8x32xf32>
    %275 = arith.addf %271, %274 : vector<8x32xf32>
    %c7_212 = arith.constant 7 : index
    %c0_213 = arith.constant 0 : index
    %c0_214 = arith.constant 0 : index
    %276 = vector.load %arg3[%c7_212, %c0_213, %c0_214] : memref<8x256x32xf32, #tpu.memory_space<vmem>>, vector<1x256x32xf32>
    %277 = vector.shape_cast %276 : vector<1x256x32xf32> to vector<256x32xf32>
    %cst_215 = arith.constant dense<0.000000e+00> : vector<8x32xf32>
    %278 = tpu.matmul %1, %277, %cst_215 {dimension_numbers = #tpu.dot_dimension_numbers<[1], [0], [0], [1], [0, 0, 1, 1], [], []>} : vector<8x256xf32>, vector<256x32xf32>, vector<8x32xf32> -> vector<8x32xf32>
    %c7_216 = arith.constant 7 : index
    %c0_217 = arith.constant 0 : index
    %c0_218 = arith.constant 0 : index
    %279 = vector.load %arg6[%c7_216, %c0_217, %c0_218] : memref<8x1x32xf32, #tpu.memory_space<vmem>>, vector<1x1x32xf32>
    %280 = vector.shape_cast %279 : vector<1x1x32xf32> to vector<1x32xf32>
    %281 = vector.broadcast %280 : vector<1x32xf32> to vector<8x32xf32>
    %282 = arith.addf %278, %281 : vector<8x32xf32>
    %c7_219 = arith.constant 7 : index
    %c0_220 = arith.constant 0 : index
    %c0_221 = arith.constant 0 : index
    %283 = vector.load %arg4[%c7_219, %c0_220, %c0_221] : memref<8x256x32xf32, #tpu.memory_space<vmem>>, vector<1x256x32xf32>
    %284 = vector.shape_cast %283 : vector<1x256x32xf32> to vector<256x32xf32>
    %cst_222 = arith.constant dense<0.000000e+00> : vector<8x32xf32>
    %285 = tpu.matmul %1, %284, %cst_222 {dimension_numbers = #tpu.dot_dimension_numbers<[1], [0], [0], [1], [0, 0, 1, 1], [], []>} : vector<8x256xf32>, vector<256x32xf32>, vector<8x32xf32> -> vector<8x32xf32>
    %c7_223 = arith.constant 7 : index
    %c0_224 = arith.constant 0 : index
    %c0_225 = arith.constant 0 : index
    %286 = vector.load %arg7[%c7_223, %c0_224, %c0_225] : memref<8x1x32xf32, #tpu.memory_space<vmem>>, vector<1x1x32xf32>
    %287 = vector.shape_cast %286 : vector<1x1x32xf32> to vector<1x32xf32>
    %288 = vector.broadcast %287 : vector<1x32xf32> to vector<8x32xf32>
    %289 = arith.addf %285, %288 : vector<8x32xf32>
    %cst_226 = arith.constant 0.176776692 : f32
    %290 = vector.broadcast %cst_226 : f32 to vector<8x32xf32>
    %291 = arith.mulf %275, %290 : vector<8x32xf32>
    "tpu.trace_start"() <{level = 10 : i32, message = "sd,td->st"}> : () -> ()
    %cst_227 = arith.constant dense<0.000000e+00> : vector<8x8xf32>
    %292 = tpu.matmul %291, %282, %cst_227 {dimension_numbers = #tpu.dot_dimension_numbers<[1], [1], [0], [0], [0, 0, 1, 0], [], []>} : vector<8x32xf32>, vector<8x32xf32>, vector<8x8xf32> -> vector<8x8xf32>
    "tpu.trace_stop"() : () -> ()
    %cst_228 = arith.constant dense<0xFF800000> : vector<8xf32>
    %293 = vector.multi_reduction <maximumf>, %292, %cst_228 [1] : vector<8x8xf32> to vector<8xf32>
    %294 = vector.shape_cast %293 : vector<8xf32> to vector<8x1xf32>
    %295 = vector.broadcast %294 : vector<8x1xf32> to vector<8x8xf32>
    %296 = arith.subf %292, %295 : vector<8x8xf32>
    %297 = math.exp %296 : vector<8x8xf32>
    %cst_229 = arith.constant dense<0.000000e+00> : vector<8xf32>
    %298 = vector.multi_reduction <add>, %297, %cst_229 [1] : vector<8x8xf32> to vector<8xf32>
    %299 = vector.shape_cast %298 : vector<8xf32> to vector<8x1xf32>
    %300 = vector.broadcast %299 : vector<8x1xf32> to vector<8x8xf32>
    %301 = arith.divf %297, %300 : vector<8x8xf32>
    %cst_230 = arith.constant dense<0.000000e+00> : vector<8x32xf32>
    %302 = tpu.matmul %301, %289, %cst_230 {dimension_numbers = #tpu.dot_dimension_numbers<[1], [0], [0], [1], [0, 0, 1, 1], [], []>} : vector<8x8xf32>, vector<8x32xf32>, vector<8x32xf32> -> vector<8x32xf32>
    %c7_231 = arith.constant 7 : index
    %c0_232 = arith.constant 0 : index
    %c0_233 = arith.constant 0 : index
    %303 = vector.load %arg8[%c7_231, %c0_232, %c0_233] : memref<8x32x256xf32, #tpu.memory_space<vmem>>, vector<1x32x256xf32>
    %304 = vector.shape_cast %303 : vector<1x32x256xf32> to vector<32x256xf32>
    %cst_234 = arith.constant dense<0.000000e+00> : vector<8x256xf32>
    %305 = tpu.matmul %302, %304, %cst_234 {dimension_numbers = #tpu.dot_dimension_numbers<[1], [0], [0], [1], [0, 0, 1, 1], [], []>} : vector<8x32xf32>, vector<32x256xf32>, vector<8x256xf32> -> vector<8x256xf32>
    %306 = arith.addf %268, %305 : vector<8x256xf32>
    %c0_235 = arith.constant 0 : index
    %c0_236 = arith.constant 0 : index
    %307 = vector.load %arg9[%c0_235, %c0_236] : memref<1x256xf32, #tpu.memory_space<vmem>>, vector<1x256xf32>
    %308 = vector.broadcast %307 : vector<1x256xf32> to vector<8x256xf32>
    %309 = arith.addf %306, %308 : vector<8x256xf32>
    %c0_237 = arith.constant 0 : index
    %c0_238 = arith.constant 0 : index
    %310 = vector.load %arg10[%c0_237, %c0_238] : memref<256x256xf32, #tpu.memory_space<vmem>>, vector<256x256xf32>
    %cst_239 = arith.constant dense<0.000000e+00> : vector<8x256xf32>
    %311 = tpu.matmul %309, %310, %cst_239 {dimension_numbers = #tpu.dot_dimension_numbers<[1], [0], [0], [1], [0, 0, 1, 1], [], []>} : vector<8x256xf32>, vector<256x256xf32>, vector<8x256xf32> -> vector<8x256xf32>
    %c0_240 = arith.constant 0 : index
    %c0_241 = arith.constant 0 : index
    %312 = vector.load %arg11[%c0_240, %c0_241] : memref<1x256xf32, #tpu.memory_space<vmem>>, vector<1x256xf32>
    %313 = vector.broadcast %312 : vector<1x256xf32> to vector<8x256xf32>
    %314 = arith.addf %311, %313 : vector<8x256xf32>
    %c0_242 = arith.constant 0 : index
    %c0_243 = arith.constant 0 : index
    %315 = vector.load %arg12[%c0_242, %c0_243] : memref<1x256xf32, #tpu.memory_space<vmem>>, vector<1x256xf32>
    %c0_244 = arith.constant 0 : index
    %c0_245 = arith.constant 0 : index
    %316 = vector.load %arg13[%c0_244, %c0_245] : memref<1x256xf32, #tpu.memory_space<vmem>>, vector<1x256xf32>
    %cst_246 = arith.constant dense<0.000000e+00> : vector<8xf32>
    %317 = vector.multi_reduction <add>, %314, %cst_246 [1] : vector<8x256xf32> to vector<8xf32>
    %318 = vector.shape_cast %317 : vector<8xf32> to vector<8x1xf32>
    %cst_247 = arith.constant 2.560000e+02 : f32
    %319 = vector.broadcast %cst_247 : f32 to vector<8x1xf32>
    %320 = arith.divf %318, %319 : vector<8x1xf32>
    %321 = vector.broadcast %320 : vector<8x1xf32> to vector<8x256xf32>
    %322 = arith.subf %314, %321 : vector<8x256xf32>
    %323 = arith.mulf %322, %322 : vector<8x256xf32>
    %cst_248 = arith.constant dense<0.000000e+00> : vector<8xf32>
    %324 = vector.multi_reduction <add>, %323, %cst_248 [1] : vector<8x256xf32> to vector<8xf32>
    %325 = vector.shape_cast %324 : vector<8xf32> to vector<8x1xf32>
    %cst_249 = arith.constant 2.560000e+02 : f32
    %326 = vector.broadcast %cst_249 : f32 to vector<8x1xf32>
    %327 = arith.divf %325, %326 : vector<8x1xf32>
    %cst_250 = arith.constant 9.99999974E-6 : f32
    %328 = vector.broadcast %cst_250 : f32 to vector<8x1xf32>
    %329 = arith.addf %327, %328 : vector<8x1xf32>
    %330 = math.rsqrt %329 : vector<8x1xf32>
    %331 = vector.broadcast %330 : vector<8x1xf32> to vector<8x256xf32>
    %332 = arith.mulf %322, %331 : vector<8x256xf32>
    %333 = vector.broadcast %315 : vector<1x256xf32> to vector<8x256xf32>
    %334 = arith.mulf %332, %333 : vector<8x256xf32>
    %335 = vector.broadcast %316 : vector<1x256xf32> to vector<8x256xf32>
    %336 = arith.addf %334, %335 : vector<8x256xf32>
    %cst_251 = arith.constant 0.000000e+00 : f32
    %337 = vector.broadcast %cst_251 : f32 to vector<8x256xf32>
    %338 = arith.maximumf %336, %337 : vector<8x256xf32>
    %c0_252 = arith.constant 0 : index
    %c0_253 = arith.constant 0 : index
    %339 = vector.load %arg14[%c0_252, %c0_253] : memref<256x128xf32, #tpu.memory_space<vmem>>, vector<256x128xf32>
    %cst_254 = arith.constant dense<0.000000e+00> : vector<8x128xf32>
    %340 = tpu.matmul %338, %339, %cst_254 {dimension_numbers = #tpu.dot_dimension_numbers<[1], [0], [0], [1], [0, 0, 1, 1], [], []>} : vector<8x256xf32>, vector<256x128xf32>, vector<8x128xf32> -> vector<8x128xf32>
    %c0_255 = arith.constant 0 : index
    %c0_256 = arith.constant 0 : index
    %341 = vector.load %arg15[%c0_255, %c0_256] : memref<1x128xf32, #tpu.memory_space<vmem>>, vector<1x128xf32>
    %342 = vector.broadcast %341 : vector<1x128xf32> to vector<8x128xf32>
    %343 = arith.addf %340, %342 : vector<8x128xf32>
    %c0_257 = arith.constant 0 : index
    %c0_258 = arith.constant 0 : index
    %344 = vector.load %arg16[%c0_257, %c0_258] : memref<1x128xf32, #tpu.memory_space<vmem>>, vector<1x128xf32>
    %c0_259 = arith.constant 0 : index
    %c0_260 = arith.constant 0 : index
    %345 = vector.load %arg17[%c0_259, %c0_260] : memref<1x128xf32, #tpu.memory_space<vmem>>, vector<1x128xf32>
    %cst_261 = arith.constant dense<0.000000e+00> : vector<8xf32>
    %346 = vector.multi_reduction <add>, %343, %cst_261 [1] : vector<8x128xf32> to vector<8xf32>
    %347 = vector.shape_cast %346 : vector<8xf32> to vector<8x1xf32>
    %cst_262 = arith.constant 1.280000e+02 : f32
    %348 = vector.broadcast %cst_262 : f32 to vector<8x1xf32>
    %349 = arith.divf %347, %348 : vector<8x1xf32>
    %350 = vector.broadcast %349 : vector<8x1xf32> to vector<8x128xf32>
    %351 = arith.subf %343, %350 : vector<8x128xf32>
    %352 = arith.mulf %351, %351 : vector<8x128xf32>
    %cst_263 = arith.constant dense<0.000000e+00> : vector<8xf32>
    %353 = vector.multi_reduction <add>, %352, %cst_263 [1] : vector<8x128xf32> to vector<8xf32>
    %354 = vector.shape_cast %353 : vector<8xf32> to vector<8x1xf32>
    %cst_264 = arith.constant 1.280000e+02 : f32
    %355 = vector.broadcast %cst_264 : f32 to vector<8x1xf32>
    %356 = arith.divf %354, %355 : vector<8x1xf32>
    %cst_265 = arith.constant 9.99999974E-6 : f32
    %357 = vector.broadcast %cst_265 : f32 to vector<8x1xf32>
    %358 = arith.addf %356, %357 : vector<8x1xf32>
    %359 = math.rsqrt %358 : vector<8x1xf32>
    %360 = vector.broadcast %359 : vector<8x1xf32> to vector<8x128xf32>
    %361 = arith.mulf %351, %360 : vector<8x128xf32>
    %362 = vector.broadcast %344 : vector<1x128xf32> to vector<8x128xf32>
    %363 = arith.mulf %361, %362 : vector<8x128xf32>
    %364 = vector.broadcast %345 : vector<1x128xf32> to vector<8x128xf32>
    %365 = arith.addf %363, %364 : vector<8x128xf32>
    %cst_266 = arith.constant 0.000000e+00 : f32
    %366 = vector.broadcast %cst_266 : f32 to vector<8x128xf32>
    %367 = arith.maximumf %365, %366 : vector<8x128xf32>
    %368 = vector.shape_cast %367 : vector<8x128xf32> to vector<1x8x128xf32>
    %c0_267 = arith.constant 0 : index
    %c0_268 = arith.constant 0 : index
    %c0_269 = arith.constant 0 : index
    %369 = vector.load %arg18[%c0_267, %c0_268, %c0_269] : memref<1x8x128xf32, #tpu.memory_space<vmem>>, vector<1x8x128xf32>
    tpu.vector_store %arg18[%c0_267, %c0_268, %c0_269], %368 {strides = array<i32>} : memref<1x8x128xf32, #tpu.memory_space<vmem>>, vector<1x8x128xf32>,
    return
  }
  func.func @transform_0(%arg0: i32) -> (i32, i32, i32) {
    %c0_i32 = arith.constant 0 : i32
    %c0_i32_0 = arith.constant 0 : i32
    %c0_i32_1 = arith.constant 0 : i32
    return %arg0, %c0_i32, %c0_i32_0 : i32, i32, i32
  }
  func.func @transform_1(%arg0: i32) -> (i32, i32, i32) {
    %c0_i32 = arith.constant 0 : i32
    %c0_i32_0 = arith.constant 0 : i32
    %c0_i32_1 = arith.constant 0 : i32
    %c0_i32_2 = arith.constant 0 : i32
    return %c0_i32, %c0_i32_0, %c0_i32_1 : i32, i32, i32
  }
  func.func @transform_2(%arg0: i32) -> (i32, i32, i32) {
    %c0_i32 = arith.constant 0 : i32
    %c0_i32_0 = arith.constant 0 : i32
    %c0_i32_1 = arith.constant 0 : i32
    %c0_i32_2 = arith.constant 0 : i32
    return %c0_i32, %c0_i32_0, %c0_i32_1 : i32, i32, i32
  }
  func.func @transform_3(%arg0: i32) -> (i32, i32, i32) {
    %c0_i32 = arith.constant 0 : i32
    %c0_i32_0 = arith.constant 0 : i32
    %c0_i32_1 = arith.constant 0 : i32
    %c0_i32_2 = arith.constant 0 : i32
    return %c0_i32, %c0_i32_0, %c0_i32_1 : i32, i32, i32
  }
  func.func @transform_4(%arg0: i32) -> (i32, i32, i32) {
    %c0_i32 = arith.constant 0 : i32
    %c0_i32_0 = arith.constant 0 : i32
    %c0_i32_1 = arith.constant 0 : i32
    %c0_i32_2 = arith.constant 0 : i32
    return %c0_i32, %c0_i32_0, %c0_i32_1 : i32, i32, i32
  }
  func.func @transform_5(%arg0: i32) -> (i32, i32, i32) {
    %c0_i32 = arith.constant 0 : i32
    %c0_i32_0 = arith.constant 0 : i32
    %c0_i32_1 = arith.constant 0 : i32
    %c0_i32_2 = arith.constant 0 : i32
    return %c0_i32, %c0_i32_0, %c0_i32_1 : i32, i32, i32
  }
  func.func @transform_6(%arg0: i32) -> (i32, i32, i32) {
    %c0_i32 = arith.constant 0 : i32
    %c0_i32_0 = arith.constant 0 : i32
    %c0_i32_1 = arith.constant 0 : i32
    %c0_i32_2 = arith.constant 0 : i32
    return %c0_i32, %c0_i32_0, %c0_i32_1 : i32, i32, i32
  }
  func.func @transform_7(%arg0: i32) -> (i32, i32, i32) {
    %c0_i32 = arith.constant 0 : i32
    %c0_i32_0 = arith.constant 0 : i32
    %c0_i32_1 = arith.constant 0 : i32
    %c0_i32_2 = arith.constant 0 : i32
    return %c0_i32, %c0_i32_0, %c0_i32_1 : i32, i32, i32
  }
  func.func @transform_8(%arg0: i32) -> (i32, i32) {
    %c0_i32 = arith.constant 0 : i32
    %c0_i32_0 = arith.constant 0 : i32
    %c0_i32_1 = arith.constant 0 : i32
    return %c0_i32, %c0_i32_0 : i32, i32
  }
  func.func @transform_9(%arg0: i32) -> (i32, i32) {
    %c0_i32 = arith.constant 0 : i32
    %c0_i32_0 = arith.constant 0 : i32
    %c0_i32_1 = arith.constant 0 : i32
    return %c0_i32, %c0_i32_0 : i32, i32
  }
  func.func @transform_10(%arg0: i32) -> (i32, i32) {
    %c0_i32 = arith.constant 0 : i32
    %c0_i32_0 = arith.constant 0 : i32
    %c0_i32_1 = arith.constant 0 : i32
    return %c0_i32, %c0_i32_0 : i32, i32
  }
  func.func @transform_11(%arg0: i32) -> (i32, i32) {
    %c0_i32 = arith.constant 0 : i32
    %c0_i32_0 = arith.constant 0 : i32
    %c0_i32_1 = arith.constant 0 : i32
    return %c0_i32, %c0_i32_0 : i32, i32
  }
  func.func @transform_12(%arg0: i32) -> (i32, i32) {
    %c0_i32 = arith.constant 0 : i32
    %c0_i32_0 = arith.constant 0 : i32
    %c0_i32_1 = arith.constant 0 : i32
    return %c0_i32, %c0_i32_0 : i32, i32
  }
  func.func @transform_13(%arg0: i32) -> (i32, i32) {
    %c0_i32 = arith.constant 0 : i32
    %c0_i32_0 = arith.constant 0 : i32
    %c0_i32_1 = arith.constant 0 : i32
    return %c0_i32, %c0_i32_0 : i32, i32
  }
  func.func @transform_14(%arg0: i32) -> (i32, i32) {
    %c0_i32 = arith.constant 0 : i32
    %c0_i32_0 = arith.constant 0 : i32
    %c0_i32_1 = arith.constant 0 : i32
    return %c0_i32, %c0_i32_0 : i32, i32
  }
  func.func @transform_15(%arg0: i32) -> (i32, i32) {
    %c0_i32 = arith.constant 0 : i32
    %c0_i32_0 = arith.constant 0 : i32
    %c0_i32_1 = arith.constant 0 : i32
    return %c0_i32, %c0_i32_0 : i32, i32
  }
  func.func @transform_16(%arg0: i32) -> (i32, i32) {
    %c0_i32 = arith.constant 0 : i32
    %c0_i32_0 = arith.constant 0 : i32
    %c0_i32_1 = arith.constant 0 : i32
    return %c0_i32, %c0_i32_0 : i32, i32
  }
  func.func @transform_17(%arg0: i32) -> (i32, i32, i32) {
    %c0_i32 = arith.constant 0 : i32
    %c0_i32_0 = arith.constant 0 : i32
    %c0_i32_1 = arith.constant 0 : i32
    return %arg0, %c0_i32, %c0_i32_0 : i32, i32, i32
  }
}

</mosaic_0001>

<bundles_post_ra>
// kernel: tpu_custom_call.1
= control target key start
LH: loop header
LB: loop body
LE: loop exit
PB: predicated region body
PF: predicated region fallthrough
CT: control target
= control target key end

     0   :  { %s11765_s0 = inlined_call_operand.vmem [shape: f32[2,8,256], index: 0, kind: input, shape index: {}]   ;;  %s11766_s1 = inlined_call_operand.vmem [shape: f32[8,256,32], index: 1, kind: input, shape index: {}]   ;;  %s11767_s2 = inlined_call_operand.vmem [shape: f32[8,256,32], index: 2, kind: input, shape index: {}]   ;;  %s11768_s3 = inlined_call_operand.vmem [shape: f32[8,256,32], index: 3, kind: input, shape index: {}]   ;;  %s11769_s4 = inlined_call_operand.vmem [shape: f32[8,1,32], index: 4, kind: input, shape index: {}]   ;;  %s11770_s5 = inlined_call_operand.vmem [shape: f32[8,1,32], index: 5, kind: input, shape index: {}]   ;;  %s11771_s6 = inlined_call_operand.vmem [shape: f32[8,1,32], index: 6, kind: input, shape index: {}]   ;;  %s11772_s7 = inlined_call_operand.vmem [shape: f32[8,32,256], index: 7, kind: input, shape index: {}]   ;;  %s11773_s8 = inlined_call_operand.vmem [shape: f32[1,256], index: 8, kind: input, shape index: {}]   ;;  %s11774_s9 = inlined_call_operand.vmem [shape: f32[256,256], index: 9, kind: input, shape index: {}]   ;;  %s11775_s10 = inlined_call_operand.vmem [shape: f32[1,256], index: 10, kind: input, shape index: {}]   ;;  %s11776_s11 = inlined_call_operand.vmem [shape: f32[1,256], index: 11, kind: input, shape index: {}]   ;;  %s11777_s12 = inlined_call_operand.vmem [shape: f32[1,256], index: 12, kind: input, shape index: {}]   ;;  %s11778_s13 = inlined_call_operand.vmem [shape: f32[256,128], index: 13, kind: input, shape index: {}]   ;;  %s11779_s14 = inlined_call_operand.vmem [shape: f32[1,128], index: 14, kind: input, shape index: {}]   ;;  %s11780_s15 = inlined_call_operand.vmem [shape: f32[1,128], index: 15, kind: input, shape index: {}]   ;;  %s11781_s16 = inlined_call_operand.vmem [shape: f32[1,128], index: 16, kind: input, shape index: {}]   ;;  %s11782_s17 = inlined_call_operand.hbm [shape: f32[2,8,128], index: 17, kind: output, shape index: {}]  }
   0x1   :  { %11791 = sst [smem:[#allocation11_spill]] %s11765_s0 }
   0x2   :  { %11792 = sst [smem:[#allocation12_spill]] %s11766_s1 }
   0x3   :  { %11793 = sst [smem:[#allocation13_spill]] %s11767_s2 }
   0x4   :  { %11794 = sst [smem:[#allocation14_spill]] %s11768_s3 }
   0x5   :  { %11795 = sst [smem:[#allocation15_spill]] %s11781_s16 }
   0x6   :  { %11796 = sst [smem:[#allocation16_spill]] %s11782_s17 }
   0x7   :  { %22 = vsyncpa [#allocation3], 0 }
   0x8   :  { %24 = vsyncpa [#allocation3 + $0x1], 0  ;;  %s8581_s24 = smov 0   ;;  %s8583_s25 = smov 0  }
   0x9   :  { %s8585_s26 = smov 0   ;;  %s8587_s27 = smov 0  }
   0xa LB: > { %11797 = sst [smem:[#allocation5_spill]] %s8474_s24  ;;  %s8602_s28 = sadd.s32 4294967295, %s8486_s27   ;;  %s8486_s27 = sphi %s8587_s27, %s11815_s27   ;;  %s8482_s26 = sphi %s8585_s26, %s11817_s26   ;;  %s8478_s25 = sphi %s8583_s25, %s11819_s25   ;;  %s8474_s24 = sphi %s8581_s24, %s11818_s24  }
   0xb   : > { %11798 = sst [smem:[#allocation6_spill]] %s8482_s26  ;;  %s5592_s29 = sadd.s32 4294967294, %s8486_s27  }
   0xc   : > { %11799 = sst [smem:[#allocation7_spill]] %s8486_s27  ;;  %s8606_s0 = sadd.s32 1, %s8486_s27  }
   0xd   : > { %11800 = sst [smem:[#allocation8_spill]] %s8606_s0  ;;  %s399_s30 = sadd.s32 1, %s8482_s26 }
   0xe   : > { %s396_s18 = ssub.s32 %s8486_s27, %s8606_s0  ;;  %p409_p0 = scmp.ne.s32.totalorder %s8482_s26, %s8478_s25 }
   0xf   : > { %p397_p1 = scmp.eq.s32.totalorder %s396_s18, 0  ;;  %p410_p2 = scmp.eq.s32.totalorder %s8602_s28, 1 }
  0x10   : > { %p415_p3 = scmp.ne.s32.totalorder %s8478_s25, %s8474_s24  ;;  %p416_p4 = scmp.eq.s32.totalorder %s5592_s29, 1 }
  0x11   : > { %s8617_s19 = scalar_select %p397_p1, %s8482_s26, %s399_s30  }
  0x12   : > { %p8619_p5 = por %p410_p2, %p409_p0  ;;  %p8623_p6 = por %p416_p4, %p415_p3 }
  0x13   : > { %11801 = sst [smem:[#allocation9_spill]] %s8617_s19  ;;  %p5595_p7 = scmp.ge.s32.totalorder %s8486_s27, 1 }
  0x14   : > { %s11803_s20 = scalar_select %p8623_p6, 1, 0 }
  0x15   : > { %p490_p8 = scmp.lt.s32.totalorder %s8486_s27, 3 }
  0x16   : > { %11804 = sst [smem:[#allocation10_spill]] %s11803_s20 }
  0x17   : > { %p491_p9 = pnand %p5595_p7, %p490_p8 }
  0x18   : > { %s11805_s23 = sld [smem:[#allocation12_spill]] (!%p491_p9)  ;;  %s11806_s2 = sld [smem:[#allocation13_spill]] (!%p491_p9)  ;;  %vm8489_vm0 = vmmov (!%p491_p9), 0   ;;  %vm877_vm1 = vcmask (!%p491_p9), 261120   ;;  %vm954_vm2 = vcmask (!%p491_p9), 64512  }
  0x19   : > { %494 = sbr.rel (%p491_p9) target bundleno = 9042 (0x2352), region = 88  ;;  %p542_p10 = scmp.lt.s32.totalorder (!%p491_p9), %s8602_s28, 1 }
  0x1a   : > { %s11807_s19 = sld [smem:[#allocation11_spill]] (!%p491_p9)  ;;  %s11808_s3 = sld [smem:[#allocation14_spill]] (!%p491_p9) }
  0x1b   : > { %s11809_s29 = sld [smem:[#allocation15_spill]] (!%p491_p9)  ;;  %s6408_s0 = sshll.u32 (!%p491_p9), %s8602_s28, 7 }
  0x1c   : > { %s11810_s27 = sld [smem:[#allocation16_spill]] (!%p491_p9) }
  0x1e   : > { %v565_v0 = vld [vmem:[%s11805_s23 + $0x80] sm:$0xff] (!%p491_p9)  ;;  %v566_v1 = vld [vmem:[%s11805_s23 + $0x88] sm:$0xff] (!%p491_p9)  ;;  %v567_v11 = vld [vmem:[%s11805_s23 + $0x90] sm:$0xff] (!%p491_p9) }
  0x1f   : > { %v674_v2 = vld [vmem:[%s11806_s2 + $0x80] sm:$0xff] (!%p491_p9)  ;;  %v7399_v3 = vpack.c.bf16 (!%p491_p9), %v566_v1, %v565_v0  ;;  %v675_v4 = vld [vmem:[%s11806_s2 + $0x88] sm:$0xff] (!%p491_p9)  ;;  %v568_v13 = vld [vmem:[%s11805_s23 + $0x98] sm:$0xff] (!%p491_p9) }
  0x20   : > { %v549_v5 = vld [vmem:[%s11805_s23] sm:$0xff]  ;;  %v550_v6 = vld [vmem:[%s11805_s23 + $0x8] sm:$0xff]  ;;  %v7431_v7 = vpack.c.bf16 %v675_v4, %v674_v2  ;;  %v676_v14 = vld [vmem:[%s11806_s2 + $0x90] sm:$0xff]  ;;  %v7403_v16 = vpack.c.bf16 %v568_v13, %v567_v11  ;;  %s8741_s26 = scalar_select %p542_p10, %s8602_s28, 1 }
  0x21   : > { %v7401_v8 = vpack.c.bf16 %v550_v6, %v549_v5  ;;  %v658_v9 = vld [vmem:[%s11806_s2] sm:$0xff]  ;;  %v659_v10 = vld [vmem:[%s11806_s2 + $0x8] sm:$0xff]  ;;  %7400 = vmatprep.subr.bf16.mxu0 %v7399_v3  ;;  %v677_v15 = vld [vmem:[%s11806_s2 + $0x98] sm:$0xff]  ;;  %s8490_s28 = smov [#allocation2]  }
  0x22   : > { %v7433_v12 = vpack.c.bf16 %v659_v10, %v658_v9  ;;  %7432 = vmatprep.subr.bf16.mxu1 %v7431_v7  ;;  %v7435_v17 = vpack.c.bf16 %v677_v15, %v676_v14  ;;  %v551_v18 = vld [vmem:[%s11805_s23 + $0x10] sm:$0xff]  ;;  %v552_v19 = vld [vmem:[%s11805_s23 + $0x18] sm:$0xff]  ;;  %v569_v23 = vld [vmem:[%s11805_s23 + $0xa0] sm:$0xff]  ;;  %s6411_s30 = sshll.u32 %s8741_s26, 4 }
  0x23   : > { %7402 = vmatpush3.bf16.msra.mxu0 %v7401_v8  ;;  %v660_v20 = vld [vmem:[%s11806_s2 + $0x10] sm:$0xff]  ;;  %v7405_v21 = vpack.c.bf16 %v552_v19, %v551_v18  ;;  %v661_v22 = vld [vmem:[%s11806_s2 + $0x18] sm:$0xff]  ;;  %v570_v24 = vld [vmem:[%s11805_s23 + $0xa8] sm:$0xff]  ;;  %s8789_s16 = scalar_lea.vmem %s11807_s19, %s6411_s30  ;;  %s539_s30 = sand.u32 1, %s8478_s25  }
  0x24   : > { %7434 = vmatpush3.bf16.msra.mxu1 %v7433_v12  ;;  %7404 = vmatprep.subr.bf16.mxu0 %v7403_v16  ;;  %v7437_v25 = vpack.c.bf16 %v661_v22, %v660_v20  ;;  %v7407_v26 = vpack.c.bf16 %v570_v24, %v569_v23  ;;  %v678_v27 = vld [vmem:[%s11806_s2 + $0xa0] sm:$0xff]  ;;  %v679_v28 = vld [vmem:[%s11806_s2 + $0xa8] sm:$0xff]  ;;  %v571_v35 = vld [vmem:[%s11805_s23 + $0xb0] sm:$0xff]  ;;  %s5596_s17 = sshll.u32 %s539_s30, 3  ;;  %s5520_s21 = scalar_lea.sflag [#allocation3], %s539_s30 }
  0x25   : > { %7436 = vmatprep.subr.bf16.mxu1 %v7435_v17  ;;  %v553_v29 = vld [vmem:[%s11805_s23 + $0x20] sm:$0xff]  ;;  %v7439_v30 = vpack.c.bf16 %v679_v28, %v678_v27  ;;  %v554_v31 = vld [vmem:[%s11805_s23 + $0x28] sm:$0xff]  ;;  %v572_v36 = vld [vmem:[%s11805_s23 + $0xb8] sm:$0xff] }
  0x26   : > { %v662_v32 = vld [vmem:[%s11806_s2 + $0x20] sm:$0xff]  ;;  %v663_v33 = vld [vmem:[%s11806_s2 + $0x28] sm:$0xff]  ;;  %v7409_v34 = vpack.c.bf16 %v554_v31, %v553_v29  ;;  %v680_v37 = vld [vmem:[%s11806_s2 + $0xb0] sm:$0xff]  ;;  %v7411_v39 = vpack.c.bf16 %v572_v36, %v571_v35 }
  0x27   : > { %7406 = vmatpush3.bf16.msra.mxu0 %v7405_v21  ;;  %v7441_v38 = vpack.c.bf16 %v663_v33, %v662_v32  ;;  %v681_v40 = vld [vmem:[%s11806_s2 + $0xb8] sm:$0xff]  ;;  %v555_v41 = vld [vmem:[%s11805_s23 + $0x30] sm:$0xff]  ;;  %v573_v46 = vld [vmem:[%s11805_s23 + $0xc0] sm:$0xff] }
  0x28   : > { %7438 = vmatpush3.bf16.msra.mxu1 %v7437_v25  ;;  %7408 = vmatprep.subr.bf16.mxu0 %v7407_v26  ;;  %v556_v42 = vld [vmem:[%s11805_s23 + $0x38] sm:$0xff]  ;;  %v7443_v43 = vpack.c.bf16 %v681_v40, %v680_v37  ;;  %v664_v44 = vld [vmem:[%s11806_s2 + $0x30] sm:$0xff]  ;;  %v574_v47 = vld [vmem:[%s11805_s23 + $0xc8] sm:$0xff] }
  0x29   : > { %7440 = vmatprep.subr.bf16.mxu1 %v7439_v30  ;;  %v665_v45 = vld [vmem:[%s11806_s2 + $0x38] sm:$0xff]  ;;  %v682_v48 = vld [vmem:[%s11806_s2 + $0xc0] sm:$0xff]  ;;  %v683_v49 = vld [vmem:[%s11806_s2 + $0xc8] sm:$0xff]  ;;  %v7413_v50 = vpack.c.bf16 %v556_v42, %v555_v41  ;;  %v7415_v52 = vpack.c.bf16 %v574_v47, %v573_v46 }
  0x2a   : > { %v7445_v51 = vpack.c.bf16 %v665_v45, %v664_v44  ;;  %v557_v53 = vld [vmem:[%s11805_s23 + $0x40] sm:$0xff]  ;;  %v558_v54 = vld [vmem:[%s11805_s23 + $0x48] sm:$0xff]  ;;  %v7447_v56 = vpack.c.bf16 %v683_v49, %v682_v48  ;;  %v575_v58 = vld [vmem:[%s11805_s23 + $0xd0] sm:$0xff] }
  0x2b   : > { %7410 = vmatpush3.bf16.msra.mxu0 %v7409_v34  ;;  %v666_v55 = vld [vmem:[%s11806_s2 + $0x40] sm:$0xff]  ;;  %v667_v57 = vld [vmem:[%s11806_s2 + $0x48] sm:$0xff]  ;;  %v576_v59 = vld [vmem:[%s11805_s23 + $0xd8] sm:$0xff]  ;;  %v7417_v62 = vpack.c.bf16 %v558_v54, %v557_v53 }
  0x2c   : > { %7442 = vmatpush3.bf16.msra.mxu1 %v7441_v38  ;;  %7412 = vmatprep.subr.bf16.mxu0 %v7411_v39  ;;  %v684_v60 = vld [vmem:[%s11806_s2 + $0xd0] sm:$0xff]  ;;  %v685_v61 = vld [vmem:[%s11806_s2 + $0xd8] sm:$0xff]  ;;  %v7449_v63 = vpack.c.bf16 %v667_v57, %v666_v55  ;;  %v7419_v0 = vpack.c.bf16 %v576_v59, %v575_v58  ;;  %v577_v6 = vld [vmem:[%s11805_s23 + $0xe0] sm:$0xff] }
  0x2d   : > { %7444 = vmatprep.subr.bf16.mxu1 %v7443_v43  ;;  %v559_v1 = vld [vmem:[%s11805_s23 + $0x50] sm:$0xff]  ;;  %v560_v2 = vld [vmem:[%s11805_s23 + $0x58] sm:$0xff]  ;;  %v7451_v4 = vpack.c.bf16 %v685_v61, %v684_v60  ;;  %v578_v7 = vld [vmem:[%s11805_s23 + $0xe8] sm:$0xff] }
  0x2e   : > { %v668_v3 = vld [vmem:[%s11806_s2 + $0x50] sm:$0xff]  ;;  %v669_v5 = vld [vmem:[%s11806_s2 + $0x58] sm:$0xff]  ;;  %v686_v8 = vld [vmem:[%s11806_s2 + $0xe0] sm:$0xff]  ;;  %v7421_v10 = vpack.c.bf16 %v560_v2, %v559_v1  ;;  %v7423_v13 = vpack.c.bf16 %v578_v7, %v577_v6 }
  0x2f   : > { %7414 = vmatpush3.bf16.msra.mxu0 %v7413_v50  ;;  %v687_v9 = vld [vmem:[%s11806_s2 + $0xe8] sm:$0xff]  ;;  %v561_v11 = vld [vmem:[%s11805_s23 + $0x60] sm:$0xff]  ;;  %v7453_v12 = vpack.c.bf16 %v669_v5, %v668_v3  ;;  %v579_v19 = vld [vmem:[%s11805_s23 + $0xf0] sm:$0xff] }
  0x30   : > { %7446 = vmatpush3.bf16.msra.mxu1 %v7445_v51  ;;  %7416 = vmatprep.subr.bf16.mxu0 %v7415_v52  ;;  %v562_v14 = vld [vmem:[%s11805_s23 + $0x68] sm:$0xff]  ;;  %v670_v15 = vld [vmem:[%s11806_s2 + $0x60] sm:$0xff]  ;;  %v7455_v17 = vpack.c.bf16 %v687_v9, %v686_v8  ;;  %v580_v20 = vld [vmem:[%s11805_s23 + $0xf8] sm:$0xff] }
  0x31   : > { %7448 = vmatprep.subr.bf16.mxu1 %v7447_v56  ;;  %v8807_v16 = vld [vmem:[%s8789_s16 + $0x8] sm:$0xff]  ;;  %v688_v21 = vld [vmem:[%s11806_s2 + $0xf0] sm:$0xff]  ;;  %v689_v22 = vld [vmem:[%s11806_s2 + $0xf8] sm:$0xff]  ;;  %v7425_v23 = vpack.c.bf16 %v562_v14, %v561_v11  ;;  %v7427_v25 = vpack.c.bf16 %v580_v20, %v579_v19  ;;  %v8488_v19 = vmov 0.0  }
  0x32   : > { %v671_v18 = vld [vmem:[%s11806_s2 + $0x68] sm:$0xff]  ;;  %652 = vmatprep.mubr.f32.mxu0 %v8807_v16  ;;  %761 = vmatprep.mubr.f32.mxu1 %v8807_v16  ;;  %v563_v26 = vld [vmem:[%s11805_s23 + $0x70] sm:$0xff]  ;;  %v564_v27 = vld [vmem:[%s11805_s23 + $0x78] sm:$0xff]  ;;  %v7459_v29 = vpack.c.bf16 %v689_v22, %v688_v21 }
  0x33   : > { %7418 = vmatpush3.bf16.msra.mxu0 %v7417_v62  ;;  %v7457_v24 = vpack.c.bf16 %v671_v18, %v670_v15  ;;  %v672_v28 = vld [vmem:[%s11806_s2 + $0x70] sm:$0xff]  ;;  %v673_v30 = vld [vmem:[%s11806_s2 + $0x78] sm:$0xff]  ;;  %v783_v31 = vld [vmem:[%s11808_s3 + $0x80] sm:$0xff]  ;;  %v7429_v33 = vpack.c.bf16 %v564_v27, %v563_v26 }
  0x34   : > { %7450 = vmatpush3.bf16.msra.mxu1 %v7449_v63  ;;  %7420 = vmatprep.subr.bf16.mxu0 %v7419_v0  ;;  %v784_v32 = vld [vmem:[%s11808_s3 + $0x88] sm:$0xff]  ;;  %v7461_v34 = vpack.c.bf16 %v673_v30, %v672_v28  ;;  %v767_v36 = vld [vmem:[%s11808_s3] sm:$0xff]  ;;  %v785_v38 = vld [vmem:[%s11808_s3 + $0x90] sm:$0xff] }
  0x35   : > { %7452 = vmatprep.subr.bf16.mxu1 %v7451_v4  ;;  %v7463_v35 = vpack.c.bf16 %v784_v32, %v783_v31  ;;  %v768_v37 = vld [vmem:[%s11808_s3 + $0x8] sm:$0xff]  ;;  %v786_v39 = vld [vmem:[%s11808_s3 + $0x98] sm:$0xff]  ;;  %v8857_v40 = vld [vmem:[%s8789_s16] sm:$0xff] }
  0x36   : > { %v7465_v41 = vpack.c.bf16 %v768_v37, %v767_v36  ;;  %v7467_v42 = vpack.c.bf16 %v786_v39, %v785_v38  ;;  %v769_v43 = vld [vmem:[%s11808_s3 + $0x10] sm:$0xff]  ;;  %v770_v44 = vld [vmem:[%s11808_s3 + $0x18] sm:$0xff]  ;;  %v787_v45 = vld [vmem:[%s11808_s3 + $0xa0] sm:$0xff] }
  0x37   : > { %7422 = vmatpush3.bf16.msra.mxu0 %v7421_v10  ;;  %v788_v46 = vld [vmem:[%s11808_s3 + $0xa8] sm:$0xff]  ;;  %v7469_v47 = vpack.c.bf16 %v770_v44, %v769_v43  ;;  %v771_v49 = vld [vmem:[%s11808_s3 + $0x20] sm:$0xff]  ;;  %v789_v51 = vld [vmem:[%s11808_s3 + $0xb0] sm:$0xff] }
  0x38   : > { %7454 = vmatpush3.bf16.msra.mxu1 %v7453_v12  ;;  %7424 = vmatprep.subr.bf16.mxu0 %v7423_v13  ;;  %v7471_v48 = vpack.c.bf16 %v788_v46, %v787_v45  ;;  %v772_v50 = vld [vmem:[%s11808_s3 + $0x28] sm:$0xff]  ;;  %v790_v52 = vld [vmem:[%s11808_s3 + $0xb8] sm:$0xff]  ;;  %v773_v55 = vld [vmem:[%s11808_s3 + $0x30] sm:$0xff] }
  0x39   : > { %7456 = vmatprep.subr.bf16.mxu1 %v7455_v17  ;;  %v7473_v53 = vpack.c.bf16 %v772_v50, %v771_v49  ;;  %v7475_v54 = vpack.c.bf16 %v790_v52, %v789_v51  ;;  %v774_v56 = vld [vmem:[%s11808_s3 + $0x38] sm:$0xff]  ;;  %v791_v57 = vld [vmem:[%s11808_s3 + $0xc0] sm:$0xff]  ;;  %v792_v58 = vld [vmem:[%s11808_s3 + $0xc8] sm:$0xff] }
  0x3a   : > { %v7477_v59 = vpack.c.bf16 %v774_v56, %v773_v55  ;;  %v7479_v60 = vpack.c.bf16 %v792_v58, %v791_v57  ;;  %v775_v61 = vld [vmem:[%s11808_s3 + $0x40] sm:$0xff]  ;;  %v776_v62 = vld [vmem:[%s11808_s3 + $0x48] sm:$0xff]  ;;  %v793_v63 = vld [vmem:[%s11808_s3 + $0xd0] sm:$0xff] }
  0x3b   : > { %7426 = vmatpush3.bf16.msra.mxu0 %v7425_v23  ;;  %v794_v0 = vld [vmem:[%s11808_s3 + $0xd8] sm:$0xff]  ;;  %v7481_v1 = vpack.c.bf16 %v776_v62, %v775_v61  ;;  %v777_v3 = vld [vmem:[%s11808_s3 + $0x50] sm:$0xff]  ;;  %v795_v5 = vld [vmem:[%s11808_s3 + $0xe0] sm:$0xff] }
  0x3c   : > { %7458 = vmatpush3.bf16.msra.mxu1 %v7457_v24  ;;  %7428 = vmatprep.subr.bf16.mxu0 %v7427_v25  ;;  %v7483_v2 = vpack.c.bf16 %v794_v0, %v793_v63  ;;  %v778_v4 = vld [vmem:[%s11808_s3 + $0x58] sm:$0xff]  ;;  %v796_v6 = vld [vmem:[%s11808_s3 + $0xe8] sm:$0xff]  ;;  %v779_v9 = vld [vmem:[%s11808_s3 + $0x60] sm:$0xff] }
  0x3d   : > { %7460 = vmatprep.subr.bf16.mxu1 %v7459_v29  ;;  %v7485_v7 = vpack.c.bf16 %v778_v4, %v777_v3  ;;  %v7487_v8 = vpack.c.bf16 %v796_v6, %v795_v5  ;;  %v780_v10 = vld [vmem:[%s11808_s3 + $0x68] sm:$0xff]  ;;  %v797_v11 = vld [vmem:[%s11808_s3 + $0xf0] sm:$0xff]  ;;  %v798_v12 = vld [vmem:[%s11808_s3 + $0xf8] sm:$0xff] }
  0x3e   : > { %v7489_v13 = vpack.c.bf16 %v780_v10, %v779_v9  ;;  %v7491_v14 = vpack.c.bf16 %v798_v12, %v797_v11  ;;  %v781_v15 = vld [vmem:[%s11808_s3 + $0x70] sm:$0xff]  ;;  %v782_v17 = vld [vmem:[%s11808_s3 + $0x78] sm:$0xff]  ;;  %v5599_v22 = vld [vmem:[%s11769_s4] ss:$0 sm:$0xff] }
  0x3f   : > { %7430 = vmatpush3.bf16.msra.mxu0 %v7429_v33  ;;  %v7493_v18 = vpack.c.bf16 %v782_v17, %v781_v15  ;;  %v5600_v25 = vld [vmem:[%s11770_s5] ss:$0 sm:$0xff]  ;;  %v5622_v46 = vld [vmem:[%s11805_s23 + $0x188] sm:$0xff]  ;;  %v5624_v55 = vld [vmem:[%s11805_s23 + $0x198] sm:$0xff] }
  0x40   : > { %7462 = vmatpush3.bf16.msra.mxu1 %v7461_v34  ;;  %7464 = vmatprep.subr.bf16.mxu0 %v7463_v35  ;;  %v5601_v32 = vld [vmem:[%s11771_s6] ss:$0 sm:$0xff]  ;;  %v5656_v49 = vld [vmem:[%s11806_s2 + $0x188] sm:$0xff]  ;;  %v5607_v57 = vld [vmem:[%s11805_s23 + $0x110] sm:$0xff] }
  0x41   : > { %v5621_v45 = vld [vmem:[%s11805_s23 + $0x180] sm:$0xff]  ;;  %v5606_v51 = vld [vmem:[%s11805_s23 + $0x108] sm:$0xff]  ;;  %v5608_v58 = vld [vmem:[%s11805_s23 + $0x118] sm:$0xff] }
  0x42   : > { %653 = vmatmul.mubr.f32.vlgmr.msra.gmra.mrb[0].mxu0 %v8857_v40  ;;  %v5605_v50 = vld [vmem:[%s11805_s23 + $0x100] sm:$0xff]  ;;  %v5626_v61 = vld [vmem:[%s11805_s23 + $0x1a8] sm:$0xff]  ;;  %v5628_v3 = vld [vmem:[%s11805_s23 + $0x1b8] sm:$0xff] }
  0x43   : > { %762 = vmatmul.mubr.f32.vlgmr.msra.gmra.mrb[0].mxu1 %v8857_v40  ;;  %7466 = vmatpush3.bf16.msra.mxu0 %v7465_v41  ;;  %v5609_v63 = vld [vmem:[%s11805_s23 + $0x120] sm:$0xff]  ;;  %v5610_v0 = vld [vmem:[%s11805_s23 + $0x128] sm:$0xff]  ;;  %v5611_v5 = vld [vmem:[%s11805_s23 + $0x130] sm:$0xff] }
  0x44   : > { %7468 = vmatprep.subr.bf16.mxu0 %v7467_v42  ;;  %870 = vmatprep.mubr.f32.mxu0 %v8807_v16  ;;  %v5612_v6 = vld [vmem:[%s11805_s23 + $0x138] sm:$0xff]  ;;  %v5630_v9 = vld [vmem:[%s11805_s23 + $0x1c8] sm:$0xff]  ;;  %v5613_v11 = vld [vmem:[%s11805_s23 + $0x140] sm:$0xff] }
  0x45   : > { %1152 = vmatprep.mubr.f32.mxu1 %v8807_v16  ;;  %v5614_v12 = vld [vmem:[%s11805_s23 + $0x148] sm:$0xff]  ;;  %v5632_v15 = vld [vmem:[%s11805_s23 + $0x1d8] sm:$0xff] }
  0x47   : > { %7470 = vmatpush3.bf16.msra.mxu0 %v7469_v47  ;;  %v5655_v47 = vld [vmem:[%s11806_s2 + $0x180] sm:$0xff] }
  0x48   : > { %7472 = vmatprep.subr.bf16.mxu0 %v7471_v48  ;;  %v7495_v48 = vpack.c.bf16 %v5622_v46, %v5621_v45  ;;  %v7527_v52 = vpack.c.bf16 %v5656_v49, %v5655_v47  ;;  %v5641_v45 = vld [vmem:[%s11806_s2 + $0x110] sm:$0xff]  ;;  %v5642_v46 = vld [vmem:[%s11806_s2 + $0x118] sm:$0xff]  ;;  %v5659_v47 = vld [vmem:[%s11806_s2 + $0x1a0] sm:$0xff] }
  0x4a   : > { %7496 = vmatprep.subr.bf16.mxu1 %v7495_v48  ;;  %v5660_v48 = vld [vmem:[%s11806_s2 + $0x1a8] sm:$0xff] }
  0x4b   : > { %7474 = vmatpush3.bf16.msra.mxu0 %v7473_v53  ;;  %v7497_v53 = vpack.c.bf16 %v5606_v51, %v5605_v50  ;;  %v7535_v49 = vpack.c.bf16 %v5660_v48, %v5659_v47  ;;  %v5643_v50 = vld [vmem:[%s11806_s2 + $0x120] sm:$0xff]  ;;  %v5644_v51 = vld [vmem:[%s11806_s2 + $0x128] sm:$0xff] }
  0x4c   : > { %7476 = vmatprep.subr.bf16.mxu0 %v7475_v54  ;;  %v5623_v54 = vld [vmem:[%s11805_s23 + $0x190] sm:$0xff]  ;;  %v5693_v47 = vld [vmem:[%s11808_s3 + $0x1a0] sm:$0xff]  ;;  %v5694_v48 = vld [vmem:[%s11808_s3 + $0x1a8] sm:$0xff] }
  0x4d   : > { %7498 = vmatpush3.bf16.msra.mxu1 %v7497_v53  ;;  %v7499_v56 = vpack.c.bf16 %v5624_v55, %v5623_v54  ;;  %v5662_v53 = vld [vmem:[%s11806_s2 + $0x1b8] sm:$0xff]  ;;  %v7537_v54 = vpack.c.bf16 %v5644_v51, %v5643_v50  ;;  %v5677_v50 = vld [vmem:[%s11808_s3 + $0x120] sm:$0xff]  ;;  %v5678_v51 = vld [vmem:[%s11808_s3 + $0x128] sm:$0xff] }
  0x4f   : > { %7478 = vmatpush3.bf16.msra.mxu0 %v7477_v59  ;;  %v7501_v59 = vpack.c.bf16 %v5608_v58, %v5607_v57  ;;  %7500 = vmatprep.subr.bf16.mxu1 %v7499_v56  ;;  %v5645_v56 = vld [vmem:[%s11806_s2 + $0x130] sm:$0xff]  ;;  %v5646_v57 = vld [vmem:[%s11806_s2 + $0x138] sm:$0xff]  ;;  %v5663_v58 = vld [vmem:[%s11806_s2 + $0x1c0] sm:$0xff] }
  0x50   : > { %7480 = vmatprep.subr.bf16.mxu0 %v7479_v60  ;;  %v5625_v60 = vld [vmem:[%s11805_s23 + $0x1a0] sm:$0xff] }
  0x51   : > { %7502 = vmatpush3.bf16.msra.mxu1 %v7501_v59  ;;  %v7503_v62 = vpack.c.bf16 %v5626_v61, %v5625_v60  ;;  %v5664_v59 = vld [vmem:[%s11806_s2 + $0x1c8] sm:$0xff]  ;;  %v7541_v60 = vpack.c.bf16 %v5646_v57, %v5645_v56  ;;  %v5679_v56 = vld [vmem:[%s11808_s3 + $0x130] sm:$0xff]  ;;  %v5680_v57 = vld [vmem:[%s11808_s3 + $0x138] sm:$0xff] }
  0x52   : > { %v7543_v61 = vpack.c.bf16 %v5664_v59, %v5663_v58  ;;  %v5697_v58 = vld [vmem:[%s11808_s3 + $0x1c0] sm:$0xff]  ;;  %v5698_v59 = vld [vmem:[%s11808_s3 + $0x1c8] sm:$0xff] }
  0x53   : > { %7482 = vmatpush3.bf16.msra.mxu0 %v7481_v1  ;;  %v7505_v1 = vpack.c.bf16 %v5610_v0, %v5609_v63  ;;  %7504 = vmatprep.subr.bf16.mxu1 %v7503_v62  ;;  %v5647_v62 = vld [vmem:[%s11806_s2 + $0x140] sm:$0xff]  ;;  %v5648_v63 = vld [vmem:[%s11806_s2 + $0x148] sm:$0xff]  ;;  %v5665_v0 = vld [vmem:[%s11806_s2 + $0x1d0] sm:$0xff] }
  0x54   : > { %7484 = vmatprep.subr.bf16.mxu0 %v7483_v2  ;;  %v5627_v2 = vld [vmem:[%s11805_s23 + $0x1b0] sm:$0xff] }
  0x55   : > { %7506 = vmatpush3.bf16.msra.mxu1 %v7505_v1  ;;  %v7507_v4 = vpack.c.bf16 %v5628_v3, %v5627_v2  ;;  %v5666_v1 = vld [vmem:[%s11806_s2 + $0x1d8] sm:$0xff]  ;;  %v7545_v2 = vpack.c.bf16 %v5648_v63, %v5647_v62  ;;  %v5681_v62 = vld [vmem:[%s11808_s3 + $0x140] sm:$0xff]  ;;  %v5682_v63 = vld [vmem:[%s11808_s3 + $0x148] sm:$0xff] }
  0x56   : > { %v7547_v3 = vpack.c.bf16 %v5666_v1, %v5665_v0  ;;  %v5699_v0 = vld [vmem:[%s11808_s3 + $0x1d0] sm:$0xff]  ;;  %v5700_v1 = vld [vmem:[%s11808_s3 + $0x1d8] sm:$0xff] }
  0x57   : > { %7486 = vmatpush3.bf16.msra.mxu0 %v7485_v7  ;;  %v7509_v7 = vpack.c.bf16 %v5612_v6, %v5611_v5  ;;  %7508 = vmatprep.subr.bf16.mxu1 %v7507_v4  ;;  %v5649_v4 = vld [vmem:[%s11806_s2 + $0x150] sm:$0xff]  ;;  %v5650_v5 = vld [vmem:[%s11806_s2 + $0x158] sm:$0xff]  ;;  %v5667_v6 = vld [vmem:[%s11806_s2 + $0x1e0] sm:$0xff] }
  0x58   : > { %7488 = vmatprep.subr.bf16.mxu0 %v7487_v8  ;;  %v5629_v8 = vld [vmem:[%s11805_s23 + $0x1c0] sm:$0xff] }
  0x59   : > { %7510 = vmatpush3.bf16.msra.mxu1 %v7509_v7  ;;  %v7511_v10 = vpack.c.bf16 %v5630_v9, %v5629_v8  ;;  %v5668_v7 = vld [vmem:[%s11806_s2 + $0x1e8] sm:$0xff]  ;;  %v7549_v8 = vpack.c.bf16 %v5650_v5, %v5649_v4  ;;  %v5683_v4 = vld [vmem:[%s11808_s3 + $0x150] sm:$0xff]  ;;  %v5684_v5 = vld [vmem:[%s11808_s3 + $0x158] sm:$0xff] }
  0x5a   : > { %v7551_v9 = vpack.c.bf16 %v5668_v7, %v5667_v6  ;;  %v5701_v6 = vld [vmem:[%s11808_s3 + $0x1e0] sm:$0xff]  ;;  %v5702_v7 = vld [vmem:[%s11808_s3 + $0x1e8] sm:$0xff] }
  0x5b   : > { %7490 = vmatpush3.bf16.msra.mxu0 %v7489_v13  ;;  %v7513_v13 = vpack.c.bf16 %v5614_v12, %v5613_v11  ;;  %7512 = vmatprep.subr.bf16.mxu1 %v7511_v10  ;;  %v5651_v10 = vld [vmem:[%s11806_s2 + $0x160] sm:$0xff]  ;;  %v5652_v11 = vld [vmem:[%s11806_s2 + $0x168] sm:$0xff]  ;;  %v5669_v12 = vld [vmem:[%s11806_s2 + $0x1f0] sm:$0xff] }
  0x5c   : > { %7492 = vmatprep.subr.bf16.mxu0 %v7491_v14  ;;  %v5631_v14 = vld [vmem:[%s11805_s23 + $0x1d0] sm:$0xff] }
  0x5d   : > { %7514 = vmatpush3.bf16.msra.mxu1 %v7513_v13  ;;  %v7515_v17 = vpack.c.bf16 %v5632_v15, %v5631_v14  ;;  %v5670_v13 = vld [vmem:[%s11806_s2 + $0x1f8] sm:$0xff]  ;;  %v7553_v14 = vpack.c.bf16 %v5652_v11, %v5651_v10  ;;  %v5685_v10 = vld [vmem:[%s11808_s3 + $0x160] sm:$0xff]  ;;  %v5686_v11 = vld [vmem:[%s11808_s3 + $0x168] sm:$0xff] }
  0x5e   : > { %v7555_v15 = vpack.c.bf16 %v5670_v13, %v5669_v12  ;;  %v5703_v12 = vld [vmem:[%s11808_s3 + $0x1f0] sm:$0xff]  ;;  %v5704_v13 = vld [vmem:[%s11808_s3 + $0x1f8] sm:$0xff] }
  0x5f   : > { %7494 = vmatpush3.bf16.msra.mxu0 %v7493_v18  ;;  %v5615_v18 = vld [vmem:[%s11805_s23 + $0x150] sm:$0xff]  ;;  %7516 = vmatprep.subr.bf16.mxu1 %v7515_v17 }
  0x60   : > { %7319 = vmatprep.subr.mxu0 %v8488_v19  ;;  %v5653_v17 = vld [vmem:[%s11806_s2 + $0x170] sm:$0xff] }
  0x62   : > { %871 = vmatmul.mubr.f32.vlgmr.msra.gmra.mrb[2].mxu0 %v8857_v40 }
  0x63   : > { %7321 = vmatprep.mubr.msk.f32.mxu0 %vm8489_vm0, %v8488_v19 }
 0x115   : > { %v6444_v20 = vpop.f32.mrb[0].mxu0 }
 0x116   : > { %v6479_v21 = vpop.f32.mrb[0].mxu1  ;;  %v6445_v23 = vpop.f32.mrb[1].mxu0 }
 0x117   : > { %v6446_v24 = vadd.f32 %v6445_v23, %v6444_v20  ;;  %v6480_v26 = vpop.f32.mrb[1].mxu1  ;;  %v5616_v20 = vld [vmem:[%s11805_s23 + $0x158] sm:$0xff]  ;;  %v5634_v23 = vld [vmem:[%s11805_s23 + $0x1e8] sm:$0xff] }
 0x118   : > { %v6481_v27 = vadd.f32 %v6480_v26, %v6479_v21  ;;  %v7517_v21 = vpack.c.bf16 %v5616_v20, %v5615_v18  ;;  %v5618_v26 = vld [vmem:[%s11805_s23 + $0x168] sm:$0xff]  ;;  %v5654_v18 = vld [vmem:[%s11806_s2 + $0x178] sm:$0xff] }
 0x119   : > { %v655_v28 = vadd.f32 %v6446_v24, %v5599_v22  ;;  %v5633_v22 = vld [vmem:[%s11805_s23 + $0x1e0] sm:$0xff]  ;;  %v7557_v20 = vpack.c.bf16 %v5654_v18, %v5653_v17  ;;  %v5687_v17 = vld [vmem:[%s11808_s3 + $0x170] sm:$0xff]  ;;  %v5688_v18 = vld [vmem:[%s11808_s3 + $0x178] sm:$0xff] }
 0x11a   : > { %v764_v29 = vadd.f32 %v6481_v27, %v5600_v25  ;;  %7518 = vmatpush3.bf16.msra.mxu1 %v7517_v21  ;;  %v7519_v24 = vpack.c.bf16 %v5634_v23, %v5633_v22  ;;  %v5617_v25 = vld [vmem:[%s11805_s23 + $0x160] sm:$0xff] }
 0x11b   : > { %v876_v30 = vmul.f32 0.17677669, %v655_v28  ;;  %v7521_v27 = vpack.c.bf16 %v5618_v26, %v5617_v25  ;;  %v5635_v28 = vld [vmem:[%s11805_s23 + $0x1f0] sm:$0xff]  ;;  %v5638_v26 = vld [vmem:[%s11769_s4 + $0x1] ss:$0 sm:$0xff] }
 0x11c   : > { %7320 = vmatpush3.xpose.msk.msra.mxu0 %vm877_vm1, %v764_v29  ;;  %7520 = vmatprep.subr.bf16.mxu1 %v7519_v24  ;;  %v5636_v29 = vld [vmem:[%s11805_s23 + $0x1f8] sm:$0xff] }
 0x11d   : > { %7324 = vmatprep.subr.mxu0 %v8488_v19 }
 0x11e   : > { %7522 = vmatpush3.bf16.msra.mxu1 %v7521_v27 }
 0x11f   : > { %7322 = vmatmul.mubr.msk.f32.vlgmr.msra.gmra.mrb[4].mxu0 %vm877_vm1, %v876_v30  ;;  %v7523_v30 = vpack.c.bf16 %v5636_v29, %v5635_v28  ;;  %v5672_v29 = vld [vmem:[%s11770_s5 + $0x1] ss:$0 sm:$0xff] }
 0x120   : > { %7326 = vmatprep.mubr.msk.f32.mxu0 %vm8489_vm0, %v8488_v19 }
 0x121   : > { %7524 = vmatprep.subr.bf16.mxu1 %v7523_v30 }
 0x135   : > { %v6514_v31 = vpop.f32.mrb[2].mxu0 }
 0x136   : > { %v6515_v33 = vpop.f32.mrb[3].mxu0 }
 0x137   : > { %v6516_v34 = vadd.f32 %v6515_v33, %v6514_v31  ;;  %v5619_v31 = vld [vmem:[%s11805_s23 + $0x170] sm:$0xff] }
 0x139   : > { %v873_v35 = vadd.f32 %v6516_v34, %v5601_v32  ;;  %v5620_v32 = vld [vmem:[%s11805_s23 + $0x178] sm:$0xff] }
 0x13a   : > { %v7525_v33 = vpack.c.bf16 %v5620_v32, %v5619_v31 }
 0x13b   : > { %7325 = vmatpush3.msra.mxu0 %v873_v35  ;;  %v5639_v35 = vld [vmem:[%s11806_s2 + $0x100] sm:$0xff] }
 0x13c   : > { %7528 = vmatprep.subr.bf16.mxu0 %v7527_v52  ;;  %7526 = vmatpush3.bf16.msra.mxu1 %v7525_v33  ;;  %v5661_v52 = vld [vmem:[%s11806_s2 + $0x1b0] sm:$0xff] }
 0x13d   : > { %v7539_v55 = vpack.c.bf16 %v5662_v53, %v5661_v52  ;;  %v5695_v52 = vld [vmem:[%s11808_s3 + $0x1b0] sm:$0xff]  ;;  %v5696_v53 = vld [vmem:[%s11808_s3 + $0x1b8] sm:$0xff] }
 0x13f   : > { %1153 = vmatmul.mubr.f32.vlgmr.msra.gmra.mrb[2].mxu1 %v8857_v40 }
 0x140   : > { %1374 = vmatprep.mubr.f32.mxu1 %v8807_v16 }
 0x1f2   : > { %v950_v36 = vpop.f32.mrb[4].mxu0 }
 0x1f3   : > { %v7323_v37 = vpop.f32.mrb[5].mxu0  ;;  %v955_v38 = vsel %vm954_vm2, %v950_v36, -inf }
 0x1f4   : > { %956 = vmax.xlane.f32.xlu0 %v955_v38  ;;  %v5657_v37 = vld [vmem:[%s11806_s2 + $0x190] sm:$0xff]  ;;  %v5658_v38 = vld [vmem:[%s11806_s2 + $0x198] sm:$0xff] }
 0x212   : > { %v6553_v21 = vpop.f32.mrb[2].mxu1 }
 0x213   : > { %v6554_v22 = vpop.f32.mrb[3].mxu1 }
 0x214   : > { %v6555_v23 = vadd.f32 %v6554_v22, %v6553_v21 }
 0x216   : > { %v1155_v28 = vadd.f32 %v6555_v23, %v5638_v26 }
 0x218   : > { %v1380_v33 = vmul.f32 0.17677669, %v1155_v28 }
 0x281   : > { %v957_v39 = vpop.xlane.xlu0 %956 }
 0x282   : > { %v958_v41 = vsub.f32 %v950_v36, %v957_v39  ;;  %v5640_v36 = vld [vmem:[%s11806_s2 + $0x108] sm:$0xff] }
 0x284   : > { %v959_v42 = vmul.f32 1.442695, %v958_v41  ;;  %v7529_v41 = vpack.c.bf16 %v5640_v36, %v5639_v35  ;;  %v5690_v35 = vld [vmem:[%s11808_s3 + $0x188] sm:$0xff]  ;;  %v5673_v36 = vld [vmem:[%s11808_s3 + $0x100] sm:$0xff] }
 0x286   : > { %8382 = vpow2.f32 %v959_v42 }
 0x290   : > { %v8960_v43 = vpop.eup %8382 }
 0x291   : > { %v961_v44 = vsel %vm954_vm2, %v8960_v43, 0.0 }
 0x292   : > { %962 = vadd.xlane.f32.xlu0 %v961_v44  ;;  %v7531_v44 = vpack.c.bf16 %v5658_v38, %v5657_v37  ;;  %v5674_v38 = vld [vmem:[%s11808_s3 + $0x108] sm:$0xff] }
 0x31f   : > { %v963_v34 = vpop.xlane.xlu0 %962 }
 0x320   : > { %8384 = vrcp.f32 %v963_v34  ;;  %v5689_v34 = vld [vmem:[%s11808_s3 + $0x180] sm:$0xff] }
 0x321   : > { %v7559_v37 = vpack.c.bf16 %v5690_v35, %v5689_v34  ;;  %v5711_v35 = vld [vmem:[%s11772_s7 + $0x48] sm:$0xff] }
 0x323   : > { %7560 = vmatprep.subr.bf16.mxu1 %v7559_v37 }
 0x32a   : > { %v8385_v39 = vpop.eup %8384 }
 0x32b   : > { %v965_v42 = vmul.f32 %v8385_v39, %v8960_v43  ;;  %v7533_v43 = vpack.c.bf16 %v5642_v46, %v5641_v45  ;;  %v5691_v39 = vld [vmem:[%s11808_s3 + $0x190] sm:$0xff]  ;;  %v5676_v46 = vld [vmem:[%s11808_s3 + $0x118] sm:$0xff] }
 0x32c   : > { %v5675_v45 = vld [vmem:[%s11808_s3 + $0x110] sm:$0xff] }
 0x32d   : > { %7327 = vmatmul.mubr.msk.f32.vlgmr.msra.gmra.mrb[6].mxu0 %vm954_vm2, %v965_v42  ;;  %v7561_v42 = vpack.c.bf16 %v5674_v38, %v5673_v36  ;;  %v5713_v36 = vld [vmem:[%s11772_s7 + $0x58] sm:$0xff] }
 0x32e   : > { %7530 = vmatpush3.bf16.msra.mxu0 %v7529_v41  ;;  %1263 = vmatprep.mubr.f32.mxu0 %v8807_v16  ;;  %v5692_v41 = vld [vmem:[%s11808_s3 + $0x198] sm:$0xff]  ;;  %v7591_v37 = vpack.c.bf16 %v5713_v36, %v5711_v35  ;;  %v5750_v35 = vld [vmem:[%s11805_s23 + $0x2f0] sm:$0xff] }
 0x32f   : > { %7532 = vmatprep.subr.bf16.mxu0 %v7531_v44  ;;  %v7563_v44 = vpack.c.bf16 %v5692_v41, %v5691_v39  ;;  %7562 = vmatpush3.bf16.msra.mxu1 %v7561_v42  ;;  %v5710_v39 = vld [vmem:[%s11772_s7 + $0x40] sm:$0xff]  ;;  %v5712_v41 = vld [vmem:[%s11772_s7 + $0x50] sm:$0xff]  ;;  %v5715_v42 = vld [vmem:[%s11772_s7 + $0x68] sm:$0xff] }
 0x330   : > { %v5751_v36 = vld [vmem:[%s11805_s23 + $0x2f8] sm:$0xff] }
 0x331   : > { %7564 = vmatprep.subr.bf16.mxu1 %v7563_v44  ;;  %v5717_v44 = vld [vmem:[%s11772_s7 + $0x78] sm:$0xff] }
 0x332   : > { %7534 = vmatpush3.bf16.msra.mxu0 %v7533_v43  ;;  %v7565_v43 = vpack.c.bf16 %v5676_v46, %v5675_v45  ;;  %v7593_v46 = vpack.c.bf16 %v5712_v41, %v5710_v39  ;;  %v5735_v39 = vld [vmem:[%s11805_s23 + $0x278] sm:$0xff] }
 0x333   : > { %7536 = vmatprep.subr.bf16.mxu0 %v7535_v49  ;;  %v7567_v49 = vpack.c.bf16 %v5694_v48, %v5693_v47  ;;  %v7595_v48 = vpack.c.bf16 %v5717_v44, %v5715_v42  ;;  %v1039_v42 = vld [vmem:[%s11772_s7] sm:$0xff]  ;;  %v1041_v44 = vld [vmem:[%s11772_s7 + $0x10] sm:$0xff] }
 0x334   : > { %7566 = vmatpush3.bf16.msra.mxu1 %v7565_v43  ;;  %v5714_v43 = vld [vmem:[%s11772_s7 + $0x60] sm:$0xff] }
 0x335   : > { %7568 = vmatprep.subr.bf16.mxu1 %v7567_v49  ;;  %v5716_v49 = vld [vmem:[%s11772_s7 + $0x70] sm:$0xff] }
 0x336   : > { %7538 = vmatpush3.bf16.msra.mxu0 %v7537_v54  ;;  %v7569_v54 = vpack.c.bf16 %v5678_v51, %v5677_v50  ;;  %v7597_v50 = vpack.c.bf16 %v5716_v49, %v5714_v43  ;;  %v1040_v51 = vld [vmem:[%s11772_s7 + $0x8] sm:$0xff]  ;;  %v1045_v43 = vld [vmem:[%s11772_s7 + $0x30] sm:$0xff] }
 0x337   : > { %7540 = vmatprep.subr.bf16.mxu0 %v7539_v55  ;;  %v7571_v55 = vpack.c.bf16 %v5696_v53, %v5695_v52  ;;  %v1042_v52 = vld [vmem:[%s11772_s7 + $0x18] sm:$0xff] }
 0x338   : > { %7570 = vmatpush3.bf16.msra.mxu1 %v7569_v54  ;;  %v7599_v53 = vpack.c.bf16 %v1042_v52, %v1040_v51  ;;  %v5736_v54 = vld [vmem:[%s11805_s23 + $0x280] sm:$0xff]  ;;  %v5771_v51 = vld [vmem:[%s11806_s2 + $0x288] sm:$0xff] }
 0x339   : > { %7572 = vmatprep.subr.bf16.mxu1 %v7571_v55  ;;  %v5737_v55 = vld [vmem:[%s11805_s23 + $0x288] sm:$0xff] }
 0x33a   : > { %7542 = vmatpush3.bf16.msra.mxu0 %v7541_v60  ;;  %v7573_v60 = vpack.c.bf16 %v5680_v57, %v5679_v56  ;;  %v7607_v56 = vpack.c.bf16 %v5737_v55, %v5736_v54  ;;  %v5720_v57 = vld [vmem:[%s11805_s23 + $0x200] sm:$0xff] }
 0x33b   : > { %7544 = vmatprep.subr.bf16.mxu0 %v7543_v61  ;;  %v7575_v61 = vpack.c.bf16 %v5698_v59, %v5697_v58  ;;  %v5721_v58 = vld [vmem:[%s11805_s23 + $0x208] sm:$0xff]  ;;  %v5754_v55 = vld [vmem:[%s11806_s2 + $0x200] sm:$0xff] }
 0x33c   : > { %7574 = vmatpush3.bf16.msra.mxu1 %v7573_v60  ;;  %v7609_v59 = vpack.c.bf16 %v5721_v58, %v5720_v57  ;;  %v5738_v60 = vld [vmem:[%s11805_s23 + $0x290] sm:$0xff]  ;;  %v5773_v58 = vld [vmem:[%s11806_s2 + $0x298] sm:$0xff] }
 0x33d   : > { %7576 = vmatprep.subr.bf16.mxu1 %v7575_v61  ;;  %v5739_v61 = vld [vmem:[%s11805_s23 + $0x298] sm:$0xff]  ;;  %v5772_v57 = vld [vmem:[%s11806_s2 + $0x290] sm:$0xff] }
 0x33e   : > { %7546 = vmatpush3.bf16.msra.mxu0 %v7545_v2  ;;  %v7577_v2 = vpack.c.bf16 %v5682_v63, %v5681_v62  ;;  %v7611_v62 = vpack.c.bf16 %v5739_v61, %v5738_v60  ;;  %v5722_v63 = vld [vmem:[%s11805_s23 + $0x210] sm:$0xff]  ;;  %v7643_v60 = vpack.c.bf16 %v5773_v58, %v5772_v57 }
 0x33f   : > { %7548 = vmatprep.subr.bf16.mxu0 %v7547_v3  ;;  %v7579_v3 = vpack.c.bf16 %v5700_v1, %v5699_v0  ;;  %v5723_v0 = vld [vmem:[%s11805_s23 + $0x218] sm:$0xff]  ;;  %v5756_v61 = vld [vmem:[%s11806_s2 + $0x210] sm:$0xff] }
 0x340   : > { %7578 = vmatpush3.bf16.msra.mxu1 %v7577_v2  ;;  %v7613_v1 = vpack.c.bf16 %v5723_v0, %v5722_v63  ;;  %v5740_v2 = vld [vmem:[%s11805_s23 + $0x2a0] sm:$0xff]  ;;  %v5775_v0 = vld [vmem:[%s11806_s2 + $0x2a8] sm:$0xff]  ;;  %v5790_v58 = vld [vmem:[%s11808_s3 + $0x210] sm:$0xff] }
 0x341   : > { %7580 = vmatprep.subr.bf16.mxu1 %v7579_v3  ;;  %v5741_v3 = vld [vmem:[%s11805_s23 + $0x2a8] sm:$0xff]  ;;  %v5774_v63 = vld [vmem:[%s11806_s2 + $0x2a0] sm:$0xff] }
 0x342   : > { %7550 = vmatpush3.bf16.msra.mxu0 %v7549_v8  ;;  %v7581_v8 = vpack.c.bf16 %v5684_v5, %v5683_v4  ;;  %v7615_v4 = vpack.c.bf16 %v5741_v3, %v5740_v2  ;;  %v5724_v5 = vld [vmem:[%s11805_s23 + $0x220] sm:$0xff]  ;;  %v7647_v2 = vpack.c.bf16 %v5775_v0, %v5774_v63 }
 0x343   : > { %7552 = vmatprep.subr.bf16.mxu0 %v7551_v9  ;;  %v7583_v9 = vpack.c.bf16 %v5702_v7, %v5701_v6  ;;  %v5725_v6 = vld [vmem:[%s11805_s23 + $0x228] sm:$0xff]  ;;  %v5758_v3 = vld [vmem:[%s11806_s2 + $0x220] sm:$0xff] }
 0x344   : > { %7582 = vmatpush3.bf16.msra.mxu1 %v7581_v8  ;;  %v7617_v7 = vpack.c.bf16 %v5725_v6, %v5724_v5  ;;  %v5742_v8 = vld [vmem:[%s11805_s23 + $0x2b0] sm:$0xff]  ;;  %v5792_v0 = vld [vmem:[%s11808_s3 + $0x220] sm:$0xff] }
 0x345   : > { %7584 = vmatprep.subr.bf16.mxu1 %v7583_v9  ;;  %v5743_v9 = vld [vmem:[%s11805_s23 + $0x2b8] sm:$0xff]  ;;  %v5776_v5 = vld [vmem:[%s11806_s2 + $0x2b0] sm:$0xff] }
 0x346   : > { %7554 = vmatpush3.bf16.msra.mxu0 %v7553_v14  ;;  %v7585_v14 = vpack.c.bf16 %v5686_v11, %v5685_v10  ;;  %v7619_v10 = vpack.c.bf16 %v5743_v9, %v5742_v8  ;;  %v5726_v11 = vld [vmem:[%s11805_s23 + $0x230] sm:$0xff]  ;;  %v5761_v8 = vld [vmem:[%s11806_s2 + $0x238] sm:$0xff]  ;;  %v5778_v9 = vld [vmem:[%s11806_s2 + $0x2c0] sm:$0xff] }
 0x347   : > { %7556 = vmatprep.subr.bf16.mxu0 %v7555_v15  ;;  %v7587_v15 = vpack.c.bf16 %v5704_v13, %v5703_v12  ;;  %v5727_v12 = vld [vmem:[%s11805_s23 + $0x238] sm:$0xff] }
 0x348   : > { %7586 = vmatpush3.bf16.msra.mxu1 %v7585_v14  ;;  %v7621_v13 = vpack.c.bf16 %v5727_v12, %v5726_v11  ;;  %v5744_v14 = vld [vmem:[%s11805_s23 + $0x2c0] sm:$0xff] }
 0x349   : > { %7588 = vmatprep.subr.bf16.mxu1 %v7587_v15  ;;  %v5745_v15 = vld [vmem:[%s11805_s23 + $0x2c8] sm:$0xff] }
 0x34a   : > { %7558 = vmatpush3.bf16.msra.mxu0 %v7557_v20  ;;  %v7589_v20 = vpack.c.bf16 %v5688_v18, %v5687_v17  ;;  %v7623_v17 = vpack.c.bf16 %v5745_v15, %v5744_v14  ;;  %v5728_v18 = vld [vmem:[%s11805_s23 + $0x240] sm:$0xff]  ;;  %v5763_v14 = vld [vmem:[%s11806_s2 + $0x248] sm:$0xff]  ;;  %v5780_v15 = vld [vmem:[%s11806_s2 + $0x2d0] sm:$0xff] }
 0x34b   : > { %7329 = vmatprep.subr.mxu0 %v8488_v19 }
 0x34c   : > { %7590 = vmatpush3.bf16.msra.mxu1 %v7589_v20  ;;  %v5729_v20 = vld [vmem:[%s11805_s23 + $0x248] sm:$0xff] }
 0x34d   : > { %1264 = vmatmul.mubr.f32.vlgmr.msra.gmra.mrb[8].mxu0 %v8857_v40  ;;  %7608 = vmatprep.subr.bf16.mxu1 %v7607_v56  ;;  %v5755_v56 = vld [vmem:[%s11806_s2 + $0x208] sm:$0xff] }
 0x34e   : > { %7331 = vmatprep.mubr.msk.f32.mxu0 %vm8489_vm0, %v8488_v19 }
 0x34f   : > { %1375 = vmatmul.mubr.f32.vlgmr.msra.gmra.mrb[4].mxu1 %v8857_v40 }
 0x350   : > { %1803 = vmatprep.mubr.f32.mxu1 %v8807_v16  ;;  %7610 = vmatpush3.bf16.msra.mxu1 %v7609_v59  ;;  %v7641_v59 = vpack.c.bf16 %v5755_v56, %v5754_v55  ;;  %v5807_v55 = vld [vmem:[%s11808_s3 + $0x298] sm:$0xff] }
 0x351   : > { %7612 = vmatprep.subr.bf16.mxu1 %v7611_v62  ;;  %v5757_v62 = vld [vmem:[%s11806_s2 + $0x218] sm:$0xff] }
 0x354   : > { %7614 = vmatpush3.bf16.msra.mxu1 %v7613_v1  ;;  %v7645_v1 = vpack.c.bf16 %v5757_v62, %v5756_v61  ;;  %v5809_v61 = vld [vmem:[%s11808_s3 + $0x2a8] sm:$0xff] }
 0x355   : > { %7616 = vmatprep.subr.bf16.mxu1 %v7615_v4  ;;  %v5759_v4 = vld [vmem:[%s11806_s2 + $0x228] sm:$0xff] }
 0x358   : > { %7618 = vmatpush3.bf16.msra.mxu1 %v7617_v7  ;;  %v5760_v7 = vld [vmem:[%s11806_s2 + $0x230] sm:$0xff] }
 0x359   : > { %7620 = vmatprep.subr.bf16.mxu1 %v7619_v10  ;;  %v5779_v10 = vld [vmem:[%s11806_s2 + $0x2c8] sm:$0xff]  ;;  %v7653_v11 = vpack.c.bf16 %v5761_v8, %v5760_v7 }
 0x35a   : > { %v7655_v12 = vpack.c.bf16 %v5779_v10, %v5778_v9  ;;  %v5813_v7 = vld [vmem:[%s11808_s3 + $0x2c8] sm:$0xff]  ;;  %v5796_v10 = vld [vmem:[%s11808_s3 + $0x240] sm:$0xff] }
 0x35c   : > { %7622 = vmatpush3.bf16.msra.mxu1 %v7621_v13  ;;  %v5762_v13 = vld [vmem:[%s11806_s2 + $0x240] sm:$0xff] }
 0x35d   : > { %7624 = vmatprep.subr.bf16.mxu1 %v7623_v17  ;;  %v5781_v17 = vld [vmem:[%s11806_s2 + $0x2d8] sm:$0xff] }
 0x400   : > { %v9165_v24 = vpop.f32.mrb[6].mxu0 }
 0x401   : > { %v7328_v25 = vpop.f32.mrb[7].mxu0 }
 0x420   : > { %v6588_v27 = vpop.f32.mrb[8].mxu0 }
 0x421   : > { %v6589_v30 = vpop.f32.mrb[9].mxu0 }
 0x422   : > { %v6590_v31 = vadd.f32 %v6589_v30, %v6588_v27  ;;  %v6623_v30 = vpop.f32.mrb[4].mxu1 }
 0x424   : > { %v1266_v32 = vadd.f32 %v6590_v31, %v5672_v29  ;;  %v6624_v31 = vpop.f32.mrb[5].mxu1 }
 0x426   : > { %7330 = vmatpush3.xpose.msk.msra.mxu0 %vm877_vm1, %v1266_v32  ;;  %v6625_v32 = vadd.f32 %v6624_v31, %v6623_v30  ;;  %v5749_v30 = vld [vmem:[%s11805_s23 + $0x2e8] sm:$0xff] }
 0x427   : > { %7334 = vmatprep.subr.mxu0 %v8488_v19 }
 0x429   : > { %7332 = vmatmul.mubr.msk.f32.vlgmr.msra.gmra.mrb[10].mxu0 %vm877_vm1, %v1380_v33  ;;  %v5706_v33 = vld [vmem:[%s11771_s6 + $0x1] ss:$0 sm:$0xff] }
 0x42a   : > { %7336 = vmatprep.mubr.msk.f32.mxu0 %vm8489_vm0, %v8488_v19  ;;  %v1377_v34 = vadd.f32 %v6625_v32, %v5706_v33  ;;  %v5732_v32 = vld [vmem:[%s11805_s23 + $0x260] sm:$0xff]  ;;  %v5733_v33 = vld [vmem:[%s11805_s23 + $0x268] sm:$0xff] }
 0x42c   : > { %7335 = vmatpush3.msra.mxu0 %v1377_v34  ;;  %v7633_v34 = vpack.c.bf16 %v5733_v33, %v5732_v32 }
 0x42d   : > { %7592 = vmatprep.subr.bf16.mxu0 %v7591_v37  ;;  %v7635_v37 = vpack.c.bf16 %v5751_v36, %v5750_v35  ;;  %v5769_v35 = vld [vmem:[%s11806_s2 + $0x278] sm:$0xff] }
 0x4fc   : > { %v1453_v21 = vpop.f32.mrb[10].mxu0 }
 0x4fd   : > { %v7333_v22 = vpop.f32.mrb[11].mxu0  ;;  %v1457_v23 = vsel %vm954_vm2, %v1453_v21, -inf }
 0x4fe   : > { %1458 = vmax.xlane.f32.xlu1 %v1457_v23  ;;  %v5746_v22 = vld [vmem:[%s11805_s23 + $0x2d0] sm:$0xff]  ;;  %v5747_v23 = vld [vmem:[%s11805_s23 + $0x2d8] sm:$0xff] }
 0x58b   : > { %v1459_v25 = vpop.xlane.xlu1 %1458 }
 0x58c   : > { %v1460_v26 = vsub.f32 %v1453_v21, %v1459_v25  ;;  %v7625_v21 = vpack.c.bf16 %v5729_v20, %v5728_v18  ;;  %v7627_v25 = vpack.c.bf16 %v5747_v23, %v5746_v22  ;;  %v7657_v18 = vpack.c.bf16 %v5763_v14, %v5762_v13  ;;  %v5765_v22 = vld [vmem:[%s11806_s2 + $0x258] sm:$0xff]  ;;  %v5782_v23 = vld [vmem:[%s11806_s2 + $0x2e0] sm:$0xff] }
 0x58d   : > { %v7659_v20 = vpack.c.bf16 %v5781_v17, %v5780_v15  ;;  %v5815_v13 = vld [vmem:[%s11808_s3 + $0x2d8] sm:$0xff]  ;;  %v5798_v17 = vld [vmem:[%s11808_s3 + $0x250] sm:$0xff] }
 0x58e   : > { %v1461_v27 = vmul.f32 1.442695, %v1460_v26  ;;  %7626 = vmatpush3.bf16.msra.mxu1 %v7625_v21  ;;  %v5730_v26 = vld [vmem:[%s11805_s23 + $0x250] sm:$0xff] }
 0x58f   : > { %7628 = vmatprep.subr.bf16.mxu1 %v7627_v25  ;;  %v5764_v21 = vld [vmem:[%s11806_s2 + $0x250] sm:$0xff]  ;;  %v5783_v25 = vld [vmem:[%s11806_s2 + $0x2e8] sm:$0xff] }
 0x590   : > { %8386 = vpow2.f32 %v1461_v27  ;;  %v5731_v27 = vld [vmem:[%s11805_s23 + $0x258] sm:$0xff] }
 0x59a   : > { %v8387_v28 = vpop.eup %8386 }
 0x59b   : > { %v1463_v29 = vsel %vm954_vm2, %v8387_v28, 0.0 }
 0x59c   : > { %1464 = vadd.xlane.f32.xlu1 %v1463_v29  ;;  %v5748_v29 = vld [vmem:[%s11805_s23 + $0x2e0] sm:$0xff] }
 0x59d   : > { %v7631_v31 = vpack.c.bf16 %v5749_v30, %v5748_v29  ;;  %v5767_v29 = vld [vmem:[%s11806_s2 + $0x268] sm:$0xff]  ;;  %v5784_v30 = vld [vmem:[%s11806_s2 + $0x2f0] sm:$0xff] }
 0x629   : > { %v1465_v38 = vpop.xlane.xlu1 %1464 }
 0x62a   : > { %8388 = vrcp.f32 %v1465_v38  ;;  %v5734_v38 = vld [vmem:[%s11805_s23 + $0x270] sm:$0xff] }
 0x62b   : > { %v7637_v41 = vpack.c.bf16 %v5735_v39, %v5734_v38 }
 0x634   : > { %v8389_v45 = vpop.eup %8388 }
 0x635   : > { %v1467_v47 = vmul.f32 %v8389_v45, %v8387_v28  ;;  %v7629_v28 = vpack.c.bf16 %v5731_v27, %v5730_v26  ;;  %v1044_v45 = vld [vmem:[%s11772_s7 + $0x28] sm:$0xff]  ;;  %v7661_v26 = vpack.c.bf16 %v5765_v22, %v5764_v21  ;;  %v7663_v27 = vpack.c.bf16 %v5783_v25, %v5782_v23  ;;  %v5800_v25 = vld [vmem:[%s11808_s3 + $0x260] sm:$0xff] }
 0x636   : > { %v5817_v21 = vld [vmem:[%s11808_s3 + $0x2e8] sm:$0xff] }
 0x637   : > { %7337 = vmatmul.mubr.msk.f32.vlgmr.msra.gmra.mrb[12].mxu0 %vm954_vm2, %v1467_v47  ;;  %7630 = vmatpush3.bf16.msra.mxu1 %v7629_v28  ;;  %v7601_v47 = vpack.c.bf16 %v1041_v44, %v1039_v42  ;;  %v5766_v28 = vld [vmem:[%s11806_s2 + $0x260] sm:$0xff] }
 0x638   : > { %7594 = vmatpush1.bf16.msra.mxu0 %v7593_v46  ;;  %1617 = vmatprep.mubr.f32.mxu0 %v8488_v19  ;;  %v1046_v46 = vld [vmem:[%s11772_s7 + $0x38] sm:$0xff]  ;;  %v7665_v32 = vpack.c.bf16 %v5767_v29, %v5766_v28  ;;  %v5753_v42 = vld [vmem:[%s11769_s4 + $0x2] ss:$0 sm:$0xff] }
 0x639   : > { %7596 = vmatprep.subr.bf16.mxu0 %v7595_v48  ;;  %7632 = vmatprep.subr.bf16.mxu1 %v7631_v31  ;;  %v1043_v48 = vld [vmem:[%s11772_s7 + $0x20] sm:$0xff]  ;;  %v5785_v31 = vld [vmem:[%s11806_s2 + $0x2f8] sm:$0xff] }
 0x63a   : > { %v7667_v33 = vpack.c.bf16 %v5785_v31, %v5784_v30  ;;  %v5819_v28 = vld [vmem:[%s11808_s3 + $0x2f8] sm:$0xff]  ;;  %v5802_v31 = vld [vmem:[%s11808_s3 + $0x270] sm:$0xff] }
 0x63b   : > { %7634 = vmatpush3.bf16.msra.mxu1 %v7633_v34  ;;  %v5768_v34 = vld [vmem:[%s11806_s2 + $0x270] sm:$0xff] }
 0x63c   : > { %7598 = vmatpush1.bf16.msra.mxu0 %v7597_v50  ;;  %7636 = vmatprep.subr.bf16.mxu1 %v7635_v37  ;;  %v5770_v50 = vld [vmem:[%s11806_s2 + $0x280] sm:$0xff]  ;;  %v7669_v36 = vpack.c.bf16 %v5769_v35, %v5768_v34  ;;  %v9646_v34 = vld [vmem:[%s8789_s16 + $0x8] sm:$0xff] }
 0x63d   : > { %7600 = vmatprep.subr.bf16.mxu0 %v7599_v53  ;;  %v7605_v53 = vpack.c.bf16 %v1045_v43, %v1043_v48  ;;  %v7639_v54 = vpack.c.bf16 %v5771_v51, %v5770_v50  ;;  %v9532_v37 = vld [vmem:[%s8789_s16] sm:$0xff]  ;;  %v5805_v50 = vld [vmem:[%s11808_s3 + $0x288] sm:$0xff] }
 0x63e   : > { %v5788_v51 = vld [vmem:[%s11808_s3 + $0x200] sm:$0xff] }
 0x63f   : > { %7638 = vmatpush3.bf16.msra.mxu1 %v7637_v41 }
 0x642   : > { %1804 = vmatmul.mubr.f32.vlgmr.msra.gmra.mrb[6].mxu1 %v8857_v40  ;;  %v7603_v40 = vpack.c.bf16 %v1046_v46, %v1044_v45  ;;  %v5787_v46 = vld [vmem:[%s11770_s5 + $0x2] ss:$0 sm:$0xff] }
 0x643   : > { %2025 = vmatprep.mubr.f32.mxu1 %v8807_v16 }
 0x70a   : > { %v1537_v49 = vpop.f32.mrb[12].mxu0 }
 0x70b   : > { %v7338_v52 = vpop.f32.mrb[13].mxu0  ;;  %5718 = vmatmul.mubr.msk.f32.vlgmr.msra.gmra.mrb[14].mxu0 %vm877_vm1, %v1537_v49  ;;  %v5804_v49 = vld [vmem:[%s11808_s3 + $0x280] sm:$0xff] }
 0x70c   : > { %7602 = vmatpush1.bf16.msra.mxu0 %v7601_v47  ;;  %1691 = vmatprep.mubr.f32.mxu0 %v8488_v19  ;;  %v7671_v52 = vpack.c.bf16 %v5805_v50, %v5804_v49  ;;  %v5826_v49 = vld [vmem:[%s11772_s7 + $0x88] sm:$0xff]  ;;  %v5828_v50 = vld [vmem:[%s11772_s7 + $0x98] sm:$0xff] }
 0x70d   : > { %7604 = vmatprep.subr.bf16.mxu0 %v7603_v40 }
 0x70e   : > { %7672 = vmatprep.subr.bf16.mxu1 %v7671_v52  ;;  %v5884_v52 = vld [vmem:[%s11806_s2 + $0x380] sm:$0xff] }
 0x710   : > { %7606 = vmatpush1.bf16.msra.mxu0 %v7605_v53  ;;  %v5789_v53 = vld [vmem:[%s11808_s3 + $0x208] sm:$0xff] }
 0x711   : > { %7640 = vmatprep.subr.bf16.mxu0 %v7639_v54  ;;  %v5806_v54 = vld [vmem:[%s11808_s3 + $0x290] sm:$0xff]  ;;  %v7673_v56 = vpack.c.bf16 %v5789_v53, %v5788_v51  ;;  %v7703_v51 = vpack.c.bf16 %v5828_v50, %v5826_v49  ;;  %v5885_v53 = vld [vmem:[%s11806_s2 + $0x388] sm:$0xff]  ;;  %v5899_v49 = vld [vmem:[%s11806_s2 + $0x3f8] sm:$0xff] }
 0x712   : > { %v7675_v57 = vpack.c.bf16 %v5807_v55, %v5806_v54  ;;  %v5868_v54 = vld [vmem:[%s11806_s2 + $0x300] sm:$0xff]  ;;  %v7743_v55 = vpack.c.bf16 %v5885_v53, %v5884_v52  ;;  %v5883_v52 = vld [vmem:[%s11806_s2 + $0x378] sm:$0xff] }
 0x713   : > { %5719 = vmatmul.mubr.msk.f32.vlgmr.msra.gmra.mrb[14].mxu0 %vm877_vm1, %v9165_v24  ;;  %v5777_v24 = vld [vmem:[%s11806_s2 + $0x2b8] sm:$0xff]  ;;  %7674 = vmatpush3.bf16.msra.mxu1 %v7673_v56  ;;  %v5869_v56 = vld [vmem:[%s11806_s2 + $0x308] sm:$0xff] }
 0x714   : > { %7642 = vmatpush3.bf16.msra.mxu0 %v7641_v59  ;;  %1914 = vmatprep.mubr.f32.mxu0 %v8807_v16  ;;  %v7649_v16 = vpack.c.bf16 %v5759_v4, %v5758_v3  ;;  %v7651_v6 = vpack.c.bf16 %v5777_v24, %v5776_v5  ;;  %v5791_v59 = vld [vmem:[%s11808_s3 + $0x218] sm:$0xff]  ;;  %v5794_v24 = vld [vmem:[%s11808_s3 + $0x230] sm:$0xff] }
 0x715   : > { %7644 = vmatprep.subr.bf16.mxu0 %v7643_v60  ;;  %v6662_v38 = vpop.f32.mrb[6].mxu1  ;;  %v5808_v60 = vld [vmem:[%s11808_s3 + $0x2a0] sm:$0xff]  ;;  %v7677_v62 = vpack.c.bf16 %v5791_v59, %v5790_v58  ;;  %7676 = vmatprep.subr.bf16.mxu1 %v7675_v57  ;;  %v5811_v3 = vld [vmem:[%s11808_s3 + $0x2b8] sm:$0xff]  ;;  %v7745_v57 = vpack.c.bf16 %v5869_v56, %v5868_v54  ;;  %v5852_v56 = vld [vmem:[%s11805_s23 + $0x390] sm:$0xff] }
 0x716   : > { %v6663_v39 = vpop.f32.mrb[7].mxu1  ;;  %v7679_v63 = vpack.c.bf16 %v5809_v61, %v5808_v60  ;;  %v5825_v59 = vld [vmem:[%s11772_s7 + $0x80] sm:$0xff]  ;;  %v5827_v60 = vld [vmem:[%s11772_s7 + $0x90] sm:$0xff]  ;;  %v5830_v61 = vld [vmem:[%s11772_s7 + $0xa8] sm:$0xff] }
 0x717   : > { %v6664_v41 = vadd.f32 %v6663_v39, %v6662_v38  ;;  %7678 = vmatpush3.bf16.msra.mxu1 %v7677_v62  ;;  %v5832_v62 = vld [vmem:[%s11772_s7 + $0xb8] sm:$0xff]  ;;  %v5834_v54 = vld [vmem:[%s11805_s23 + $0x300] sm:$0xff] }
 0x718   : > { %7646 = vmatpush3.bf16.msra.mxu0 %v7645_v1  ;;  %v5793_v1 = vld [vmem:[%s11808_s3 + $0x228] sm:$0xff]  ;;  %7680 = vmatprep.subr.bf16.mxu1 %v7679_v63 }
 0x719   : > { %7648 = vmatprep.subr.bf16.mxu0 %v7647_v2  ;;  %v1806_v45 = vadd.f32 %v6664_v41, %v5753_v42  ;;  %v5810_v2 = vld [vmem:[%s11808_s3 + $0x2b0] sm:$0xff]  ;;  %v7681_v4 = vpack.c.bf16 %v5793_v1, %v5792_v0  ;;  %v7705_v0 = vpack.c.bf16 %v5827_v60, %v5825_v59 }
 0x71a   : > { %v7683_v5 = vpack.c.bf16 %v5811_v3, %v5810_v2  ;;  %v7707_v2 = vpack.c.bf16 %v5832_v62, %v5830_v61  ;;  %v5829_v3 = vld [vmem:[%s11772_s7 + $0xa0] sm:$0xff]  ;;  %v5836_v60 = vld [vmem:[%s11805_s23 + $0x310] sm:$0xff]  ;;  %v5837_v61 = vld [vmem:[%s11805_s23 + $0x318] sm:$0xff] }
 0x71b   : > { %v2031_v43 = vmul.f32 0.17677669, %v1806_v45  ;;  %7682 = vmatpush3.bf16.msra.mxu1 %v7681_v4  ;;  %v5831_v4 = vld [vmem:[%s11772_s7 + $0xb0] sm:$0xff] }
 0x71c   : > { %7650 = vmatpush3.bf16.msra.mxu0 %v7649_v16  ;;  %v5795_v16 = vld [vmem:[%s11808_s3 + $0x238] sm:$0xff]  ;;  %7684 = vmatprep.subr.bf16.mxu1 %v7683_v5  ;;  %v7709_v5 = vpack.c.bf16 %v5831_v4, %v5829_v3  ;;  %v5838_v4 = vld [vmem:[%s11805_s23 + $0x320] sm:$0xff] }
 0x71d   : > { %7652 = vmatprep.subr.bf16.mxu0 %v7651_v6  ;;  %v5812_v6 = vld [vmem:[%s11808_s3 + $0x2c0] sm:$0xff]  ;;  %v7685_v8 = vpack.c.bf16 %v5795_v16, %v5794_v24  ;;  %v5851_v16 = vld [vmem:[%s11805_s23 + $0x388] sm:$0xff] }
 0x71e   : > { %v7687_v9 = vpack.c.bf16 %v5813_v7, %v5812_v6  ;;  %v5850_v24 = vld [vmem:[%s11805_s23 + $0x380] sm:$0xff]  ;;  %v5886_v7 = vld [vmem:[%s11806_s2 + $0x390] sm:$0xff] }
 0x71f   : > { %7686 = vmatpush3.bf16.msra.mxu1 %v7685_v8  ;;  %v7711_v6 = vpack.c.bf16 %v5851_v16, %v5850_v24  ;;  %v5887_v8 = vld [vmem:[%s11806_s2 + $0x398] sm:$0xff]  ;;  %v5856_v24 = vld [vmem:[%s11805_s23 + $0x3b0] sm:$0xff] }
 0x720   : > { %7654 = vmatpush3.bf16.msra.mxu0 %v7653_v11  ;;  %v5797_v11 = vld [vmem:[%s11808_s3 + $0x248] sm:$0xff]  ;;  %7688 = vmatprep.subr.bf16.mxu1 %v7687_v9  ;;  %v7747_v9 = vpack.c.bf16 %v5887_v8, %v5886_v7  ;;  %v5857_v16 = vld [vmem:[%s11805_s23 + $0x3b8] sm:$0xff]  ;;  %v5840_v8 = vld [vmem:[%s11805_s23 + $0x330] sm:$0xff] }
 0x721   : > { %7656 = vmatprep.subr.bf16.mxu0 %v7655_v12  ;;  %v5814_v12 = vld [vmem:[%s11808_s3 + $0x2d0] sm:$0xff]  ;;  %v7689_v14 = vpack.c.bf16 %v5797_v11, %v5796_v10  ;;  %v5871_v11 = vld [vmem:[%s11806_s2 + $0x318] sm:$0xff]  ;;  %v7723_v7 = vpack.c.bf16 %v5857_v16, %v5856_v24 }
 0x722   : > { %v7691_v15 = vpack.c.bf16 %v5815_v13, %v5814_v12  ;;  %v5870_v10 = vld [vmem:[%s11806_s2 + $0x310] sm:$0xff]  ;;  %v5888_v13 = vld [vmem:[%s11806_s2 + $0x3a0] sm:$0xff]  ;;  %v5929_v24 = vld [vmem:[%s11808_s3 + $0x3d8] sm:$0xff] }
 0x723   : > { %7690 = vmatpush3.bf16.msra.mxu1 %v7689_v14  ;;  %v7749_v12 = vpack.c.bf16 %v5871_v11, %v5870_v10  ;;  %v5889_v14 = vld [vmem:[%s11806_s2 + $0x3a8] sm:$0xff]  ;;  %v5858_v10 = vld [vmem:[%s11805_s23 + $0x3c0] sm:$0xff] }
 0x724   : > { %7658 = vmatpush3.bf16.msra.mxu0 %v7657_v18  ;;  %v5799_v18 = vld [vmem:[%s11808_s3 + $0x258] sm:$0xff]  ;;  %7692 = vmatprep.subr.bf16.mxu1 %v7691_v15  ;;  %v7751_v15 = vpack.c.bf16 %v5889_v14, %v5888_v13  ;;  %v5859_v11 = vld [vmem:[%s11805_s23 + $0x3c8] sm:$0xff]  ;;  %v5842_v14 = vld [vmem:[%s11805_s23 + $0x340] sm:$0xff] }
 0x725   : > { %7660 = vmatprep.subr.bf16.mxu0 %v7659_v20  ;;  %v5816_v20 = vld [vmem:[%s11808_s3 + $0x2e0] sm:$0xff]  ;;  %v7693_v22 = vpack.c.bf16 %v5799_v18, %v5798_v17  ;;  %v5873_v18 = vld [vmem:[%s11806_s2 + $0x328] sm:$0xff]  ;;  %v7727_v13 = vpack.c.bf16 %v5859_v11, %v5858_v10 }
 0x726   : > { %v7695_v23 = vpack.c.bf16 %v5817_v21, %v5816_v20  ;;  %v5872_v17 = vld [vmem:[%s11806_s2 + $0x320] sm:$0xff]  ;;  %v5890_v21 = vld [vmem:[%s11806_s2 + $0x3b0] sm:$0xff]  ;;  %v5931_v10 = vld [vmem:[%s11808_s3 + $0x3e8] sm:$0xff] }
 0x727   : > { %7694 = vmatpush3.bf16.msra.mxu1 %v7693_v22  ;;  %v7753_v20 = vpack.c.bf16 %v5873_v18, %v5872_v17  ;;  %v5891_v22 = vld [vmem:[%s11806_s2 + $0x3b8] sm:$0xff]  ;;  %v5860_v17 = vld [vmem:[%s11805_s23 + $0x3d0] sm:$0xff] }
 0x728   : > { %7662 = vmatpush3.bf16.msra.mxu0 %v7661_v26  ;;  %v5801_v26 = vld [vmem:[%s11808_s3 + $0x268] sm:$0xff]  ;;  %7696 = vmatprep.subr.bf16.mxu1 %v7695_v23  ;;  %v7755_v23 = vpack.c.bf16 %v5891_v22, %v5890_v21  ;;  %v5861_v18 = vld [vmem:[%s11805_s23 + $0x3d8] sm:$0xff]  ;;  %v5844_v22 = vld [vmem:[%s11805_s23 + $0x350] sm:$0xff] }
 0x729   : > { %7664 = vmatprep.subr.bf16.mxu0 %v7663_v27  ;;  %v5818_v27 = vld [vmem:[%s11808_s3 + $0x2f0] sm:$0xff]  ;;  %v7697_v29 = vpack.c.bf16 %v5801_v26, %v5800_v25  ;;  %v5875_v26 = vld [vmem:[%s11806_s2 + $0x338] sm:$0xff]  ;;  %v7731_v21 = vpack.c.bf16 %v5861_v18, %v5860_v17 }
 0x72a   : > { %v7699_v30 = vpack.c.bf16 %v5819_v28, %v5818_v27  ;;  %v5874_v25 = vld [vmem:[%s11806_s2 + $0x330] sm:$0xff]  ;;  %v5892_v28 = vld [vmem:[%s11806_s2 + $0x3c0] sm:$0xff]  ;;  %v5933_v17 = vld [vmem:[%s11808_s3 + $0x3f8] sm:$0xff] }
 0x72b   : > { %7698 = vmatpush3.bf16.msra.mxu1 %v7697_v29  ;;  %v7757_v27 = vpack.c.bf16 %v5875_v26, %v5874_v25  ;;  %v5893_v29 = vld [vmem:[%s11806_s2 + $0x3c8] sm:$0xff]  ;;  %v5862_v25 = vld [vmem:[%s11805_s23 + $0x3e0] sm:$0xff] }
 0x72c   : > { %7666 = vmatpush3.bf16.msra.mxu0 %v7665_v32  ;;  %v5803_v32 = vld [vmem:[%s11808_s3 + $0x278] sm:$0xff]  ;;  %7700 = vmatprep.subr.bf16.mxu1 %v7699_v30  ;;  %v7759_v30 = vpack.c.bf16 %v5893_v29, %v5892_v28  ;;  %v5863_v26 = vld [vmem:[%s11805_s23 + $0x3e8] sm:$0xff]  ;;  %v5846_v29 = vld [vmem:[%s11805_s23 + $0x360] sm:$0xff] }
 0x72d   : > { %7668 = vmatprep.subr.bf16.mxu0 %v7667_v33  ;;  %v7701_v33 = vpack.c.bf16 %v5803_v32, %v5802_v31  ;;  %v5876_v31 = vld [vmem:[%s11806_s2 + $0x340] sm:$0xff]  ;;  %v5877_v32 = vld [vmem:[%s11806_s2 + $0x348] sm:$0xff]  ;;  %v7735_v28 = vpack.c.bf16 %v5863_v26, %v5862_v25 }
 0x72e   : > { %v5901_v26 = vld [vmem:[%s11770_s5 + $0x3] ss:$0 sm:$0xff] }
 0x72f   : > { %7702 = vmatpush3.bf16.msra.mxu1 %v7701_v33  ;;  %v7761_v33 = vpack.c.bf16 %v5877_v32, %v5876_v31  ;;  %v5864_v31 = vld [vmem:[%s11805_s23 + $0x3f0] sm:$0xff]  ;;  %v5865_v32 = vld [vmem:[%s11805_s23 + $0x3f8] sm:$0xff] }
 0x730   : > { %7670 = vmatpush3.bf16.msra.mxu0 %v7669_v36  ;;  %7744 = vmatprep.subr.bf16.mxu1 %v7743_v55  ;;  %v5835_v55 = vld [vmem:[%s11805_s23 + $0x308] sm:$0xff] }
 0x731   : > { %7339 = vmatprep.subr.mxu0 %v8488_v19 }
 0x732   : > { %2026 = vmatmul.mubr.f32.vlgmr.msra.gmra.mrb[8].mxu1 %v9532_v37 }
 0x733   : > { %1915 = vmatmul.mubr.f32.vlgmr.msra.gmra.mrb[16].mxu0 %v9532_v37  ;;  %2493 = vmatprep.mubr.f32.mxu1 %v9646_v34 }
 0x734   : > { %7341 = vmatprep.mubr.msk.f32.mxu0 %vm8489_vm0, %v8488_v19  ;;  %7746 = vmatpush3.bf16.msra.mxu1 %v7745_v57  ;;  %v5853_v57 = vld [vmem:[%s11805_s23 + $0x398] sm:$0xff] }
 0x735   : > { %7748 = vmatprep.subr.bf16.mxu1 %v7747_v9  ;;  %v7715_v59 = vpack.c.bf16 %v5853_v57, %v5852_v56  ;;  %v5841_v9 = vld [vmem:[%s11805_s23 + $0x338] sm:$0xff]  ;;  %v5907_v56 = vld [vmem:[%s11808_s3 + $0x328] sm:$0xff]  ;;  %v5924_v57 = vld [vmem:[%s11808_s3 + $0x3b0] sm:$0xff] }
 0x738   : > { %7750 = vmatpush3.bf16.msra.mxu1 %v7749_v12  ;;  %v7725_v12 = vpack.c.bf16 %v5841_v9, %v5840_v8  ;;  %v5913_v8 = vld [vmem:[%s11808_s3 + $0x358] sm:$0xff]  ;;  %v5930_v9 = vld [vmem:[%s11808_s3 + $0x3e0] sm:$0xff] }
 0x739   : > { %7752 = vmatprep.subr.bf16.mxu1 %v7751_v15  ;;  %v5843_v15 = vld [vmem:[%s11805_s23 + $0x348] sm:$0xff] }
 0x73c   : > { %7754 = vmatpush3.bf16.msra.mxu1 %v7753_v20  ;;  %v7729_v20 = vpack.c.bf16 %v5843_v15, %v5842_v14  ;;  %v5915_v14 = vld [vmem:[%s11808_s3 + $0x368] sm:$0xff]  ;;  %v5932_v15 = vld [vmem:[%s11808_s3 + $0x3f0] sm:$0xff] }
 0x73d   : > { %7756 = vmatprep.subr.bf16.mxu1 %v7755_v23  ;;  %v5845_v23 = vld [vmem:[%s11805_s23 + $0x358] sm:$0xff] }
 0x740   : > { %7758 = vmatpush3.bf16.msra.mxu1 %v7757_v27  ;;  %v7733_v27 = vpack.c.bf16 %v5845_v23, %v5844_v22  ;;  %v5917_v22 = vld [vmem:[%s11808_s3 + $0x378] sm:$0xff] }
 0x741   : > { %7760 = vmatprep.subr.bf16.mxu1 %v7759_v30  ;;  %v5847_v30 = vld [vmem:[%s11805_s23 + $0x368] sm:$0xff] }
 0x744   : > { %7762 = vmatpush3.bf16.msra.mxu1 %v7761_v33  ;;  %v7737_v33 = vpack.c.bf16 %v5847_v30, %v5846_v29 }
 0x806   : > { %v6697_v44 = vpop.f32.mrb[16].mxu0 }
 0x807   : > { %v6698_v47 = vpop.f32.mrb[17].mxu0 }
 0x808   : > { %v6699_v40 = vadd.f32 %v6698_v47, %v6697_v44 }
 0x80a   : > { %v1917_v48 = vadd.f32 %v6699_v40, %v5787_v46  ;;  %v6732_v46 = vpop.f32.mrb[8].mxu1 }
 0x80b   : > { %v6733_v47 = vpop.f32.mrb[9].mxu1 }
 0x80c   : > { %7340 = vmatpush3.xpose.msk.msra.mxu0 %vm877_vm1, %v1917_v48  ;;  %v6734_v40 = vadd.f32 %v6733_v47, %v6732_v46  ;;  %v5821_v48 = vld [vmem:[%s11771_s6 + $0x2] ss:$0 sm:$0xff] }
 0x80d   : > { %7344 = vmatprep.subr.mxu0 %v8488_v19  ;;  %v5880_v47 = vld [vmem:[%s11806_s2 + $0x360] sm:$0xff] }
 0x80f   : > { %7342 = vmatmul.mubr.msk.f32.vlgmr.msra.gmra.mrb[18].mxu0 %vm877_vm1, %v2031_v43  ;;  %v2028_v43 = vadd.f32 %v6734_v40, %v5821_v48  ;;  %v5881_v40 = vld [vmem:[%s11806_s2 + $0x368] sm:$0xff] }
 0x810   : > { %7346 = vmatprep.mubr.msk.f32.mxu0 %vm8489_vm0, %v8488_v19  ;;  %v7769_v48 = vpack.c.bf16 %v5881_v40, %v5880_v47  ;;  %v5920_v47 = vld [vmem:[%s11808_s3 + $0x390] sm:$0xff]  ;;  %v5921_v40 = vld [vmem:[%s11808_s3 + $0x398] sm:$0xff] }
 0x811   : > { %7345 = vmatpush3.msra.mxu0 %v2028_v43  ;;  %v5898_v43 = vld [vmem:[%s11806_s2 + $0x3f0] sm:$0xff] }
 0x812   : > { %7704 = vmatprep.subr.bf16.mxu0 %v7703_v51  ;;  %v7771_v50 = vpack.c.bf16 %v5899_v49, %v5898_v43  ;;  %v5882_v51 = vld [vmem:[%s11806_s2 + $0x370] sm:$0xff]  ;;  %v7779_v43 = vpack.c.bf16 %v5921_v40, %v5920_v47 }
 0x813   : > { %v7773_v53 = vpack.c.bf16 %v5883_v52, %v5882_v51  ;;  %v5904_v49 = vld [vmem:[%s11808_s3 + $0x310] sm:$0xff]  ;;  %v5922_v51 = vld [vmem:[%s11808_s3 + $0x3a0] sm:$0xff]  ;;  %v5923_v52 = vld [vmem:[%s11808_s3 + $0x3a8] sm:$0xff] }
 0x8e2   : > { %v2104_v35 = vpop.f32.mrb[18].mxu0 }
 0x8e3   : > { %v7343_v36 = vpop.f32.mrb[19].mxu0  ;;  %v2108_v38 = vsel %vm954_vm2, %v2104_v35, -inf }
 0x8e4   : > { %2109 = vmax.xlane.f32.xlu0 %v2108_v38  ;;  %v5895_v36 = vld [vmem:[%s11806_s2 + $0x3d8] sm:$0xff] }
 0x971   : > { %v2110_v39 = vpop.xlane.xlu0 %2109 }
 0x972   : > { %v2111_v41 = vsub.f32 %v2104_v35, %v2110_v39  ;;  %v5894_v35 = vld [vmem:[%s11806_s2 + $0x3d0] sm:$0xff] }
 0x973   : > { %v7763_v38 = vpack.c.bf16 %v5895_v36, %v5894_v35  ;;  %v5878_v39 = vld [vmem:[%s11806_s2 + $0x350] sm:$0xff]  ;;  %v7739_v35 = vpack.c.bf16 %v5865_v32, %v5864_v31  ;;  %v5867_v31 = vld [vmem:[%s11769_s4 + $0x3] ss:$0 sm:$0xff] }
 0x974   : > { %v2112_v42 = vmul.f32 1.442695, %v2111_v41  ;;  %v5879_v41 = vld [vmem:[%s11806_s2 + $0x358] sm:$0xff]  ;;  %v5848_v36 = vld [vmem:[%s11805_s23 + $0x370] sm:$0xff] }
 0x975   : > { %7764 = vmatprep.subr.bf16.mxu1 %v7763_v38  ;;  %v5849_v38 = vld [vmem:[%s11805_s23 + $0x378] sm:$0xff] }
 0x976   : > { %8390 = vpow2.f32 %v2112_v42  ;;  %v7765_v42 = vpack.c.bf16 %v5879_v41, %v5878_v39  ;;  %v5918_v39 = vld [vmem:[%s11808_s3 + $0x380] sm:$0xff]  ;;  %v5919_v41 = vld [vmem:[%s11808_s3 + $0x388] sm:$0xff] }
 0x978   : > { %7766 = vmatpush3.bf16.msra.mxu1 %v7765_v42  ;;  %v7741_v42 = vpack.c.bf16 %v5849_v38, %v5848_v36 }
 0x980   : > { %v8391_v44 = vpop.eup %8390 }
 0x981   : > { %v2114_v45 = vsel %vm954_vm2, %v8391_v44, 0.0 }
 0x982   : > { %2115 = vadd.xlane.f32.xlu1 %v2114_v45  ;;  %v5897_v45 = vld [vmem:[%s11806_s2 + $0x3e8] sm:$0xff] }
 0xa0f   : > { %v2116_v58 = vpop.xlane.xlu1 %2115 }
 0xa10   : > { %8392 = vrcp.f32 %v2116_v58  ;;  %v7713_v58 = vpack.c.bf16 %v5835_v55, %v5834_v54  ;;  %v7783_v54 = vpack.c.bf16 %v5923_v52, %v5922_v51  ;;  %v5906_v55 = vld [vmem:[%s11808_s3 + $0x320] sm:$0xff]  ;;  %v5940_v51 = vld [vmem:[%s11772_s7 + $0xc8] sm:$0xff]  ;;  %v5942_v52 = vld [vmem:[%s11772_s7 + $0xd8] sm:$0xff] }
 0xa1a   : > { %v8393_v63 = vpop.eup %8392 }
 0xa1b   : > { %v2118_v1 = vmul.f32 %v8393_v63, %v8391_v44  ;;  %v5896_v44 = vld [vmem:[%s11806_s2 + $0x3e0] sm:$0xff] }
 0xa1c   : > { %v7767_v46 = vpack.c.bf16 %v5897_v45, %v5896_v44  ;;  %v5854_v63 = vld [vmem:[%s11805_s23 + $0x3a0] sm:$0xff]  ;;  %v7775_v44 = vpack.c.bf16 %v5919_v41, %v5918_v39 }
 0xa1d   : > { %7347 = vmatmul.mubr.msk.f32.vlgmr.msra.gmra.mrb[20].mxu0 %vm954_vm2, %v2118_v1  ;;  %v5902_v45 = vld [vmem:[%s11808_s3 + $0x300] sm:$0xff] }
 0xa1e   : > { %7706 = vmatpush1.bf16.msra.mxu0 %v7705_v0  ;;  %2268 = vmatprep.mubr.f32.mxu0 %v8488_v19  ;;  %v5855_v0 = vld [vmem:[%s11805_s23 + $0x3a8] sm:$0xff]  ;;  %v5935_v39 = vld [vmem:[%s11771_s6 + $0x3] ss:$0 sm:$0xff] }
 0xa1f   : > { %7708 = vmatprep.subr.bf16.mxu0 %v7707_v2  ;;  %7768 = vmatprep.subr.bf16.mxu1 %v7767_v46  ;;  %v7717_v2 = vpack.c.bf16 %v5837_v61, %v5836_v60  ;;  %v7719_v3 = vpack.c.bf16 %v5855_v0, %v5854_v63  ;;  %v5903_v46 = vld [vmem:[%s11808_s3 + $0x308] sm:$0xff]  ;;  %v5908_v61 = vld [vmem:[%s11808_s3 + $0x330] sm:$0xff]  ;;  %v5926_v63 = vld [vmem:[%s11808_s3 + $0x3c0] sm:$0xff] }
 0xa20   : > { %7770 = vmatpush3.bf16.msra.mxu1 %v7769_v48  ;;  %v7777_v48 = vpack.c.bf16 %v5903_v46, %v5902_v45  ;;  %v5927_v0 = vld [vmem:[%s11808_s3 + $0x3c8] sm:$0xff] }
 0xa21   : > { %7772 = vmatprep.subr.bf16.mxu1 %v7771_v50  ;;  %v5905_v50 = vld [vmem:[%s11808_s3 + $0x318] sm:$0xff] }
 0xa22   : > { %7710 = vmatpush1.bf16.msra.mxu0 %v7709_v5  ;;  %v5839_v5 = vld [vmem:[%s11805_s23 + $0x328] sm:$0xff] }
 0xa23   : > { %7712 = vmatprep.subr.bf16.mxu0 %v7711_v6  ;;  %v7721_v6 = vpack.c.bf16 %v5839_v5, %v5838_v4  ;;  %v5911_v4 = vld [vmem:[%s11808_s3 + $0x348] sm:$0xff]  ;;  %v5928_v5 = vld [vmem:[%s11808_s3 + $0x3d0] sm:$0xff] }
 0xa24   : > { %7774 = vmatpush3.bf16.msra.mxu1 %v7773_v53  ;;  %v7781_v53 = vpack.c.bf16 %v5905_v50, %v5904_v49 }
 0xa25   : > { %7354 = vmatprep.subr.mxu1 %v8488_v19 }
 0xa27   : > { %2494 = vmatmul.mubr.f32.vlgmr.msra.gmra.mrb[10].mxu1 %v9532_v37 }
 0xa28   : > { %7356 = vmatprep.mubr.msk.f32.mxu1 %vm8489_vm0, %v8488_v19 }
 0xaf0   : > { %v2188_v62 = vpop.f32.mrb[20].mxu0 }
 0xaf1   : > { %v7348_v1 = vpop.f32.mrb[21].mxu0  ;;  %5833 = vmatmul.mubr.msk.f32.vlgmr.msra.gmra.mrb[14].mxu0 %vm877_vm1, %v2188_v62  ;;  %v5909_v62 = vld [vmem:[%s11808_s3 + $0x338] sm:$0xff] }
 0xaf2   : > { %7714 = vmatpush3.bf16.msra.mxu0 %v7713_v58  ;;  %2382 = vmatprep.mubr.f32.mxu0 %v9646_v34  ;;  %v5925_v58 = vld [vmem:[%s11808_s3 + $0x3b8] sm:$0xff]  ;;  %v7789_v1 = vpack.c.bf16 %v5909_v62, %v5908_v61  ;;  %v5945_v61 = vld [vmem:[%s11772_s7 + $0xf0] sm:$0xff] }
 0xaf3   : > { %7716 = vmatprep.subr.bf16.mxu0 %v7715_v59  ;;  %v7785_v59 = vpack.c.bf16 %v5907_v56, %v5906_v55  ;;  %v7787_v60 = vpack.c.bf16 %v5925_v58, %v5924_v57  ;;  %v5941_v55 = vld [vmem:[%s11772_s7 + $0xd0] sm:$0xff]  ;;  %v5944_v56 = vld [vmem:[%s11772_s7 + $0xe8] sm:$0xff]  ;;  %v5946_v57 = vld [vmem:[%s11772_s7 + $0xf8] sm:$0xff] }
 0xaf6   : > { %7718 = vmatpush3.bf16.msra.mxu0 %v7717_v2  ;;  %v7791_v2 = vpack.c.bf16 %v5927_v0, %v5926_v63 }
 0xaf7   : > { %7720 = vmatprep.subr.bf16.mxu0 %v7719_v3  ;;  %v5910_v3 = vld [vmem:[%s11808_s3 + $0x340] sm:$0xff] }
 0xaf8   : > { %v7793_v16 = vpack.c.bf16 %v5911_v4, %v5910_v3  ;;  %v5965_v3 = vld [vmem:[%s11805_s23 + $0x488] sm:$0xff]  ;;  %v5998_v4 = vld [vmem:[%s11806_s2 + $0x480] sm:$0xff] }
 0xafa   : > { %7722 = vmatpush3.bf16.msra.mxu0 %v7721_v6  ;;  %v7795_v6 = vpack.c.bf16 %v5929_v24, %v5928_v5  ;;  %v6806_v25 = vpop.f32.mrb[10].mxu1  ;;  %v5999_v24 = vld [vmem:[%s11806_s2 + $0x488] sm:$0xff] }
 0xafb   : > { %7724 = vmatprep.subr.bf16.mxu0 %v7723_v7  ;;  %v5912_v7 = vld [vmem:[%s11808_s3 + $0x350] sm:$0xff] }
 0xafc   : > { %v7797_v11 = vpack.c.bf16 %v5913_v8, %v5912_v7  ;;  %v7847_v7 = vpack.c.bf16 %v5999_v24, %v5998_v4  ;;  %v5987_v24 = vld [vmem:[%s11806_s2 + $0x428] sm:$0xff] }
 0xafe   : > { %7726 = vmatpush3.bf16.msra.mxu0 %v7725_v12  ;;  %v7799_v12 = vpack.c.bf16 %v5931_v10, %v5930_v9  ;;  %v5966_v9 = vld [vmem:[%s11805_s23 + $0x490] sm:$0xff]  ;;  %v5967_v10 = vld [vmem:[%s11805_s23 + $0x498] sm:$0xff] }
 0xaff   : > { %7728 = vmatprep.subr.bf16.mxu0 %v7727_v13  ;;  %v5914_v13 = vld [vmem:[%s11808_s3 + $0x360] sm:$0xff] }
 0xb00   : > { %v7801_v18 = vpack.c.bf16 %v5915_v14, %v5914_v13  ;;  %v5951_v13 = vld [vmem:[%s11805_s23 + $0x418] sm:$0xff] }
 0xb02   : > { %7730 = vmatpush3.bf16.msra.mxu0 %v7729_v20  ;;  %v7803_v20 = vpack.c.bf16 %v5933_v17, %v5932_v15  ;;  %v5968_v15 = vld [vmem:[%s11805_s23 + $0x4a0] sm:$0xff]  ;;  %v5969_v17 = vld [vmem:[%s11805_s23 + $0x4a8] sm:$0xff] }
 0xb03   : > { %7732 = vmatprep.subr.bf16.mxu0 %v7731_v21  ;;  %v5916_v21 = vld [vmem:[%s11808_s3 + $0x370] sm:$0xff] }
 0xb04   : > { %v7805_v23 = vpack.c.bf16 %v5917_v22, %v5916_v21  ;;  %v5953_v21 = vld [vmem:[%s11805_s23 + $0x428] sm:$0xff] }
 0xb06   : > { %7734 = vmatpush3.bf16.msra.mxu0 %v7733_v27  ;;  %v6807_v27 = vpop.f32.mrb[11].mxu1 }
 0xb07   : > { %7736 = vmatprep.subr.bf16.mxu0 %v7735_v28  ;;  %v6808_v28 = vadd.f32 %v6807_v27, %v6806_v25  ;;  %v5971_v25 = vld [vmem:[%s11805_s23 + $0x4b8] sm:$0xff]  ;;  %v5954_v27 = vld [vmem:[%s11805_s23 + $0x430] sm:$0xff] }
 0xb09   : > { %v2496_v29 = vadd.f32 %v6808_v28, %v5901_v26  ;;  %v5955_v28 = vld [vmem:[%s11805_s23 + $0x438] sm:$0xff] }
 0xb0a   : > { %7738 = vmatpush3.bf16.msra.mxu0 %v7737_v33 }
 0xb0b   : > { %7740 = vmatprep.subr.bf16.mxu0 %v7739_v35 }
 0xb0e   : > { %7742 = vmatpush3.bf16.msra.mxu0 %v7741_v42 }
 0xb0f   : > { %7776 = vmatprep.subr.bf16.mxu0 %v7775_v44 }
 0xb11   : > { %2383 = vmatmul.mubr.f32.vlgmr.msra.gmra.mrb[22].mxu0 %v9532_v37 }
 0xb12   : > { %7778 = vmatpush3.bf16.msra.mxu0 %v7777_v48  ;;  %2604 = vmatprep.mubr.f32.mxu0 %v9646_v34 }
 0xb13   : > { %7780 = vmatprep.subr.bf16.mxu0 %v7779_v43 }
 0xb16   : > { %7782 = vmatpush3.bf16.msra.mxu0 %v7781_v53  ;;  %v5939_v53 = vld [vmem:[%s11772_s7 + $0xc0] sm:$0xff] }
 0xb17   : > { %7784 = vmatprep.subr.bf16.mxu0 %v7783_v54  ;;  %v7807_v54 = vpack.c.bf16 %v5942_v52, %v5940_v51  ;;  %v7809_v58 = vpack.c.bf16 %v5941_v55, %v5939_v53  ;;  %v5979_v51 = vld [vmem:[%s11805_s23 + $0x4f8] sm:$0xff]  ;;  %v5962_v53 = vld [vmem:[%s11805_s23 + $0x470] sm:$0xff] }
 0xb1a   : > { %7786 = vmatpush3.bf16.msra.mxu0 %v7785_v59  ;;  %v7811_v59 = vpack.c.bf16 %v5946_v57, %v5944_v56  ;;  %v5982_v56 = vld [vmem:[%s11806_s2 + $0x400] sm:$0xff]  ;;  %v5983_v57 = vld [vmem:[%s11806_s2 + $0x408] sm:$0xff] }
 0xb1b   : > { %7788 = vmatprep.subr.bf16.mxu0 %v7787_v60  ;;  %v5943_v60 = vld [vmem:[%s11772_s7 + $0xe0] sm:$0xff] }
 0xb1c   : > { %v7813_v62 = vpack.c.bf16 %v5945_v61, %v5943_v60  ;;  %v7849_v60 = vpack.c.bf16 %v5983_v57, %v5982_v56  ;;  %v5984_v61 = vld [vmem:[%s11806_s2 + $0x410] sm:$0xff]  ;;  %v6017_v56 = vld [vmem:[%s11808_s3 + $0x408] sm:$0xff] }
 0xb1d   : > { %v6034_v57 = vld [vmem:[%s11808_s3 + $0x490] sm:$0xff] }
 0xb1e   : > { %7790 = vmatpush3.bf16.msra.mxu0 %v7789_v1 }
 0xb1f   : > { %7792 = vmatprep.subr.bf16.mxu0 %v7791_v2  ;;  %v5964_v2 = vld [vmem:[%s11805_s23 + $0x480] sm:$0xff] }
 0xb20   : > { %v7815_v5 = vpack.c.bf16 %v5965_v3, %v5964_v2 }
 0xb22   : > { %7794 = vmatpush3.bf16.msra.mxu0 %v7793_v16  ;;  %v5948_v16 = vld [vmem:[%s11805_s23 + $0x400] sm:$0xff] }
 0xb23   : > { %7796 = vmatprep.subr.bf16.mxu0 %v7795_v6  ;;  %v5949_v6 = vld [vmem:[%s11805_s23 + $0x408] sm:$0xff] }
 0xb24   : > { %v7817_v8 = vpack.c.bf16 %v5949_v6, %v5948_v16  ;;  %v6004_v16 = vld [vmem:[%s11806_s2 + $0x4b0] sm:$0xff]  ;;  %v6005_v6 = vld [vmem:[%s11806_s2 + $0x4b8] sm:$0xff] }
 0xb26   : > { %7798 = vmatpush3.bf16.msra.mxu0 %v7797_v11  ;;  %v7819_v11 = vpack.c.bf16 %v5967_v10, %v5966_v9  ;;  %v5989_v9 = vld [vmem:[%s11806_s2 + $0x438] sm:$0xff]  ;;  %v6006_v10 = vld [vmem:[%s11806_s2 + $0x4c0] sm:$0xff] }
 0xb27   : > { %7800 = vmatprep.subr.bf16.mxu0 %v7799_v12  ;;  %v5950_v12 = vld [vmem:[%s11805_s23 + $0x410] sm:$0xff] }
 0xb28   : > { %v7821_v14 = vpack.c.bf16 %v5951_v13, %v5950_v12 }
 0xb2a   : > { %7802 = vmatpush3.bf16.msra.mxu0 %v7801_v18  ;;  %v7823_v18 = vpack.c.bf16 %v5969_v17, %v5968_v15  ;;  %v5991_v15 = vld [vmem:[%s11806_s2 + $0x448] sm:$0xff]  ;;  %v6008_v17 = vld [vmem:[%s11806_s2 + $0x4d0] sm:$0xff] }
 0xb2b   : > { %7804 = vmatprep.subr.bf16.mxu0 %v7803_v20  ;;  %v5952_v20 = vld [vmem:[%s11805_s23 + $0x420] sm:$0xff] }
 0xb2c   : > { %v7825_v22 = vpack.c.bf16 %v5953_v21, %v5952_v20 }
 0xb2e   : > { %7806 = vmatpush3.bf16.msra.mxu0 %v7805_v23  ;;  %v5970_v23 = vld [vmem:[%s11805_s23 + $0x4b0] sm:$0xff] }
 0xb2f   : > { %7349 = vmatprep.subr.mxu0 %v8488_v19  ;;  %v7827_v26 = vpack.c.bf16 %v5971_v25, %v5970_v23  ;;  %v5993_v23 = vld [vmem:[%s11806_s2 + $0x458] sm:$0xff]  ;;  %v6010_v25 = vld [vmem:[%s11806_s2 + $0x4e0] sm:$0xff] }
 0xb31   : > { %2605 = vmatmul.mubr.f32.vlgmr.msra.gmra.mrb[24].mxu0 %v9532_v37 }
 0xb32   : > { %7351 = vmatprep.mubr.msk.f32.mxu0 %vm8489_vm0, %v8488_v19 }
 0xb37   : > { %7350 = vmatpush3.xpose.msk.msra.mxu0 %vm877_vm1, %v2496_v29  ;;  %v7829_v29 = vpack.c.bf16 %v5955_v28, %v5954_v27 }
 0xb38   : > { %7808 = vmatprep.subr.bf16.mxu0 %v7807_v54  ;;  %v5963_v54 = vld [vmem:[%s11805_s23 + $0x478] sm:$0xff] }
 0xb39   : > { %v7845_v55 = vpack.c.bf16 %v5963_v54, %v5962_v53  ;;  %v6033_v53 = vld [vmem:[%s11808_s3 + $0x488] sm:$0xff]  ;;  %v6016_v54 = vld [vmem:[%s11808_s3 + $0x400] sm:$0xff] }
 0xbe4   : > { %v6771_v30 = vpop.f32.mrb[22].mxu0 }
 0xbe5   : > { %v6772_v32 = vpop.f32.mrb[23].mxu0 }
 0xbe6   : > { %v6773_v33 = vadd.f32 %v6772_v32, %v6771_v30  ;;  %v5972_v30 = vld [vmem:[%s11805_s23 + $0x4c0] sm:$0xff] }
 0xbe8   : > { %v2385_v35 = vadd.f32 %v6773_v33, %v5867_v31  ;;  %v5973_v31 = vld [vmem:[%s11805_s23 + $0x4c8] sm:$0xff]  ;;  %v5956_v33 = vld [vmem:[%s11805_s23 + $0x440] sm:$0xff] }
 0xbe9   : > { %v7831_v32 = vpack.c.bf16 %v5973_v31, %v5972_v30  ;;  %v5995_v30 = vld [vmem:[%s11806_s2 + $0x468] sm:$0xff]  ;;  %v6012_v31 = vld [vmem:[%s11806_s2 + $0x4f0] sm:$0xff] }
 0xbea   : > { %v2610_v36 = vmul.f32 0.17677669, %v2385_v35  ;;  %v5957_v35 = vld [vmem:[%s11805_s23 + $0x448] sm:$0xff] }
 0xbec   : > { %7352 = vmatmul.mubr.msk.f32.vlgmr.msra.gmra.mrb[26].mxu0 %vm877_vm1, %v2610_v36  ;;  %v7833_v36 = vpack.c.bf16 %v5957_v35, %v5956_v33 }
 0xbed   : > { %2847 = vmatprep.mubr.f32.mxu0 %v8488_v19  ;;  %7810 = vmatpush1.bf16.msra.mxu0 %v7809_v58  ;;  %v6000_v58 = vld [vmem:[%s11806_s2 + $0x490] sm:$0xff] }
 0xbee   : > { %7812 = vmatprep.subr.bf16.mxu0 %v7811_v59  ;;  %v6001_v59 = vld [vmem:[%s11806_s2 + $0x498] sm:$0xff] }
 0xbf1   : > { %7814 = vmatpush1.bf16.msra.mxu0 %v7813_v62  ;;  %v5985_v62 = vld [vmem:[%s11806_s2 + $0x418] sm:$0xff] }
 0xbf2   : > { %7848 = vmatprep.subr.bf16.mxu0 %v7847_v7  ;;  %v7853_v3 = vpack.c.bf16 %v5985_v62, %v5984_v61  ;;  %v7859_v7 = vpack.c.bf16 %v6005_v6, %v6004_v16  ;;  %v6019_v61 = vld [vmem:[%s11808_s3 + $0x418] sm:$0xff]  ;;  %v6036_v62 = vld [vmem:[%s11808_s3 + $0x4a0] sm:$0xff]  ;;  %v6022_v6 = vld [vmem:[%s11808_s3 + $0x430] sm:$0xff] }
 0xc04   : > { %v6841_v38 = vpop.f32.mrb[24].mxu0 }
 0xc05   : > { %v6842_v41 = vpop.f32.mrb[25].mxu0 }
 0xc06   : > { %v6843_v42 = vadd.f32 %v6842_v41, %v6841_v38  ;;  %v5974_v38 = vld [vmem:[%s11805_s23 + $0x4d0] sm:$0xff] }
 0xc08   : > { %v2607_v44 = vadd.f32 %v6843_v42, %v5935_v39  ;;  %v5975_v39 = vld [vmem:[%s11805_s23 + $0x4d8] sm:$0xff]  ;;  %v5958_v42 = vld [vmem:[%s11805_s23 + $0x450] sm:$0xff] }
 0xc09   : > { %v7835_v41 = vpack.c.bf16 %v5975_v39, %v5974_v38  ;;  %v5997_v38 = vld [vmem:[%s11806_s2 + $0x478] sm:$0xff] }
 0xc0a   : > { %7355 = vmatpush3.msra.mxu1 %v2607_v44  ;;  %v5959_v44 = vld [vmem:[%s11805_s23 + $0x458] sm:$0xff] }
 0xc0b   : > { %7816 = vmatprep.subr.bf16.mxu1 %v7815_v5  ;;  %v5986_v5 = vld [vmem:[%s11806_s2 + $0x420] sm:$0xff] }
 0xcbf   : > { %v2683_v45 = vpop.f32.mrb[26].mxu0 }
 0xcc0   : > { %v7353_v46 = vpop.f32.mrb[27].mxu0  ;;  %v2687_v47 = vsel %vm954_vm2, %v2683_v45, -inf }
 0xcc1   : > { %2688 = vmax.xlane.f32.xlu0 %v2687_v47  ;;  %v5976_v46 = vld [vmem:[%s11805_s23 + $0x4e0] sm:$0xff]  ;;  %v5977_v47 = vld [vmem:[%s11805_s23 + $0x4e8] sm:$0xff] }
 0xd4e   : > { %v2689_v40 = vpop.xlane.xlu0 %2688 }
 0xd4f   : > { %v2690_v48 = vsub.f32 %v2683_v45, %v2689_v40  ;;  %v7837_v45 = vpack.c.bf16 %v5959_v44, %v5958_v42  ;;  %v7839_v40 = vpack.c.bf16 %v5977_v47, %v5976_v46  ;;  %v5981_v46 = vld [vmem:[%s11769_s4 + $0x4] ss:$0 sm:$0xff] }
 0xd51   : > { %v2691_v43 = vmul.f32 1.442695, %v2690_v48  ;;  %v5960_v48 = vld [vmem:[%s11805_s23 + $0x460] sm:$0xff] }
 0xd53   : > { %8394 = vpow2.f32 %v2691_v43  ;;  %v5961_v43 = vld [vmem:[%s11805_s23 + $0x468] sm:$0xff] }
 0xd5d   : > { %v8395_v49 = vpop.eup %8394 }
 0xd5e   : > { %v2693_v50 = vsel %vm954_vm2, %v8395_v49, 0.0 }
 0xd5f   : > { %2694 = vadd.xlane.f32.xlu1 %v2693_v50  ;;  %v5978_v50 = vld [vmem:[%s11805_s23 + $0x4f0] sm:$0xff] }
 0xd60   : > { %v7843_v52 = vpack.c.bf16 %v5979_v51, %v5978_v50 }
 0xdec   : > { %v2695_v63 = vpop.xlane.xlu1 %2694 }
 0xded   : > { %8396 = vrcp.f32 %v2695_v63 }
 0xdf7   : > { %v8397_v0 = vpop.eup %8396 }
 0xdf8   : > { %v2697_v1 = vmul.f32 %v8397_v0, %v8395_v49  ;;  %v7841_v49 = vpack.c.bf16 %v5961_v43, %v5960_v48  ;;  %v6002_v0 = vld [vmem:[%s11806_s2 + $0x4a0] sm:$0xff] }
 0xdf9   : > { %v6015_v48 = vld [vmem:[%s11770_s5 + $0x4] ss:$0 sm:$0xff] }
 0xdfa   : > { %7357 = vmatmul.mubr.msk.f32.vlgmr.msra.gmra.mrb[12].mxu1 %vm954_vm2, %v2697_v1  ;;  %v6003_v1 = vld [vmem:[%s11806_s2 + $0x4a8] sm:$0xff] }
 0xdfb   : > { %2961 = vmatprep.mubr.f32.mxu1 %v9646_v34  ;;  %7818 = vmatpush3.bf16.msra.mxu1 %v7817_v8  ;;  %v7855_v4 = vpack.c.bf16 %v6003_v1, %v6002_v0  ;;  %v5988_v8 = vld [vmem:[%s11806_s2 + $0x430] sm:$0xff] }
 0xdfc   : > { %7820 = vmatprep.subr.bf16.mxu1 %v7819_v11  ;;  %v6007_v11 = vld [vmem:[%s11806_s2 + $0x4c8] sm:$0xff]  ;;  %v7861_v12 = vpack.c.bf16 %v5989_v9, %v5988_v8 }
 0xdfd   : > { %v7863_v13 = vpack.c.bf16 %v6007_v11, %v6006_v10  ;;  %v6041_v8 = vld [vmem:[%s11808_s3 + $0x4c8] sm:$0xff]  ;;  %v6024_v11 = vld [vmem:[%s11808_s3 + $0x440] sm:$0xff] }
 0xdff   : > { %7822 = vmatpush3.bf16.msra.mxu1 %v7821_v14  ;;  %v5990_v14 = vld [vmem:[%s11806_s2 + $0x440] sm:$0xff] }
 0xe00   : > { %7824 = vmatprep.subr.bf16.mxu1 %v7823_v18  ;;  %v6009_v18 = vld [vmem:[%s11806_s2 + $0x4d8] sm:$0xff]  ;;  %v7865_v20 = vpack.c.bf16 %v5991_v15, %v5990_v14 }
 0xe01   : > { %v7867_v21 = vpack.c.bf16 %v6009_v18, %v6008_v17  ;;  %v6043_v14 = vld [vmem:[%s11808_s3 + $0x4d8] sm:$0xff]  ;;  %v6026_v18 = vld [vmem:[%s11808_s3 + $0x450] sm:$0xff] }
 0xe03   : > { %7826 = vmatpush3.bf16.msra.mxu1 %v7825_v22  ;;  %v5992_v22 = vld [vmem:[%s11806_s2 + $0x450] sm:$0xff] }
 0xe04   : > { %7828 = vmatprep.subr.bf16.mxu1 %v7827_v26  ;;  %v6011_v26 = vld [vmem:[%s11806_s2 + $0x4e8] sm:$0xff]  ;;  %v7869_v27 = vpack.c.bf16 %v5993_v23, %v5992_v22 }
 0xe05   : > { %v7871_v28 = vpack.c.bf16 %v6011_v26, %v6010_v25  ;;  %v6045_v22 = vld [vmem:[%s11808_s3 + $0x4e8] sm:$0xff]  ;;  %v6028_v26 = vld [vmem:[%s11808_s3 + $0x460] sm:$0xff] }
 0xe07   : > { %7830 = vmatpush3.bf16.msra.mxu1 %v7829_v29  ;;  %v5994_v29 = vld [vmem:[%s11806_s2 + $0x460] sm:$0xff] }
 0xe08   : > { %7832 = vmatprep.subr.bf16.mxu1 %v7831_v32  ;;  %v6013_v32 = vld [vmem:[%s11806_s2 + $0x4f8] sm:$0xff]  ;;  %v7873_v33 = vpack.c.bf16 %v5995_v30, %v5994_v29 }
 0xe09   : > { %v7875_v35 = vpack.c.bf16 %v6013_v32, %v6012_v31  ;;  %v6047_v29 = vld [vmem:[%s11808_s3 + $0x4f8] sm:$0xff]  ;;  %v6030_v32 = vld [vmem:[%s11808_s3 + $0x470] sm:$0xff] }
 0xe0b   : > { %7834 = vmatpush3.bf16.msra.mxu1 %v7833_v36  ;;  %v5996_v36 = vld [vmem:[%s11806_s2 + $0x470] sm:$0xff] }
 0xe0c   : > { %7836 = vmatprep.subr.bf16.mxu1 %v7835_v41  ;;  %v7877_v39 = vpack.c.bf16 %v5997_v38, %v5996_v36  ;;  %v10218_v41 = vld [vmem:[%s8789_s16] sm:$0xff] }
 0xe0f   : > { %7838 = vmatpush3.bf16.msra.mxu1 %v7837_v45 }
 0xe10   : > { %7840 = vmatprep.subr.bf16.mxu1 %v7839_v40 }
 0xe13   : > { %7842 = vmatpush3.bf16.msra.mxu1 %v7841_v49 }
 0xe14   : > { %7844 = vmatprep.subr.bf16.mxu1 %v7843_v52  ;;  %v6032_v52 = vld [vmem:[%s11808_s3 + $0x480] sm:$0xff] }
 0xe17   : > { %7846 = vmatpush3.bf16.msra.mxu1 %v7845_v55  ;;  %v7879_v55 = vpack.c.bf16 %v6033_v53, %v6032_v52  ;;  %v6056_v52 = vld [vmem:[%s11772_s7 + $0x118] sm:$0xff]  ;;  %v6053_v53 = vld [vmem:[%s11772_s7 + $0x100] sm:$0xff] }
 0xe19   : > { %7880 = vmatprep.subr.bf16.mxu1 %v7879_v55  ;;  %v6055_v55 = vld [vmem:[%s11772_s7 + $0x110] sm:$0xff] }
 0xe1a   : > { %2962 = vmatmul.mubr.f32.vlgmr.msra.gmra.mrb[14].mxu1 %v9532_v37  ;;  %v7851_v37 = vpack.c.bf16 %v6001_v59, %v6000_v58  ;;  %v6035_v58 = vld [vmem:[%s11808_s3 + $0x498] sm:$0xff]  ;;  %v7881_v59 = vpack.c.bf16 %v6017_v56, %v6016_v54  ;;  %v6058_v56 = vld [vmem:[%s11772_s7 + $0x128] sm:$0xff] }
 0xe1b   : > { %3183 = vmatprep.mubr.f32.mxu1 %v9646_v34 }
 0xe1c   : > { %7882 = vmatpush3.bf16.msra.mxu1 %v7881_v59 }
 0xecd   : > { %v2767_v63 = vpop.f32.mrb[12].mxu1 }
 0xece   : > { %v7358_v2 = vpop.f32.mrb[13].mxu1  ;;  %5947 = vmatmul.mubr.msk.f32.vlgmr.msra.gmra.mrb[14].mxu0 %vm877_vm1, %v2767_v63  ;;  %v6037_v63 = vld [vmem:[%s11808_s3 + $0x4a8] sm:$0xff] }
 0xecf   : > { %7850 = vmatpush3.bf16.msra.mxu0 %v7849_v60  ;;  %3072 = vmatprep.mubr.f32.mxu0 %v9646_v34  ;;  %v7857_v34 = vpack.c.bf16 %v5987_v24, %v5986_v5  ;;  %v7883_v60 = vpack.c.bf16 %v6035_v58, %v6034_v57  ;;  %v7887_v1 = vpack.c.bf16 %v6037_v63, %v6036_v62  ;;  %v6020_v2 = vld [vmem:[%s11808_s3 + $0x420] sm:$0xff]  ;;  %v6039_v5 = vld [vmem:[%s11808_s3 + $0x4b8] sm:$0xff] }
 0xed0   : > { %7852 = vmatprep.subr.bf16.mxu0 %v7851_v37  ;;  %v6018_v37 = vld [vmem:[%s11808_s3 + $0x410] sm:$0xff]  ;;  %v6060_v57 = vld [vmem:[%s11772_s7 + $0x138] sm:$0xff]  ;;  %v7913_v58 = vpack.c.bf16 %v6055_v55, %v6053_v53 }
 0xed1   : > { %v7885_v0 = vpack.c.bf16 %v6019_v61, %v6018_v37  ;;  %7884 = vmatprep.subr.bf16.mxu1 %v7883_v60  ;;  %v7915_v59 = vpack.c.bf16 %v6060_v57, %v6058_v56  ;;  %v6057_v60 = vld [vmem:[%s11772_s7 + $0x120] sm:$0xff]  ;;  %v6059_v37 = vld [vmem:[%s11772_s7 + $0x130] sm:$0xff]  ;;  %v6097_v57 = vld [vmem:[%s11806_s2 + $0x508] sm:$0xff] }
 0xed2   : > { %v7917_v61 = vpack.c.bf16 %v6059_v37, %v6057_v60  ;;  %v6076_v53 = vld [vmem:[%s11805_s23 + $0x570] sm:$0xff]  ;;  %v6096_v56 = vld [vmem:[%s11806_s2 + $0x500] sm:$0xff] }
 0xed3   : > { %7854 = vmatpush3.bf16.msra.mxu0 %v7853_v3  ;;  %v6021_v3 = vld [vmem:[%s11808_s3 + $0x428] sm:$0xff]  ;;  %7886 = vmatpush3.bf16.msra.mxu1 %v7885_v0  ;;  %v7953_v60 = vpack.c.bf16 %v6097_v57, %v6096_v56 }
 0xed4   : > { %7856 = vmatprep.subr.bf16.mxu0 %v7855_v4  ;;  %v6038_v4 = vld [vmem:[%s11808_s3 + $0x4b0] sm:$0xff]  ;;  %v7889_v24 = vpack.c.bf16 %v6021_v3, %v6020_v2  ;;  %7888 = vmatprep.subr.bf16.mxu1 %v7887_v1  ;;  %v10363_v1 = vld [vmem:[%s8789_s16 + $0x8] sm:$0xff]  ;;  %v6078_v2 = vld [vmem:[%s11805_s23 + $0x580] sm:$0xff] }
 0xed5   : > { %v7891_v16 = vpack.c.bf16 %v6039_v5, %v6038_v4  ;;  %v6079_v3 = vld [vmem:[%s11805_s23 + $0x588] sm:$0xff]  ;;  %v6112_v4 = vld [vmem:[%s11806_s2 + $0x580] sm:$0xff] }
 0xed6   : > { %v7919_v5 = vpack.c.bf16 %v6079_v3, %v6078_v2  ;;  %v6117_v2 = vld [vmem:[%s11806_s2 + $0x5a8] sm:$0xff] }
 0xed7   : > { %7858 = vmatpush3.bf16.msra.mxu0 %v7857_v34  ;;  %v6023_v34 = vld [vmem:[%s11808_s3 + $0x438] sm:$0xff]  ;;  %7890 = vmatpush3.bf16.msra.mxu1 %v7889_v24  ;;  %v6113_v24 = vld [vmem:[%s11806_s2 + $0x588] sm:$0xff] }
 0xed8   : > { %7860 = vmatprep.subr.bf16.mxu0 %v7859_v7  ;;  %v6040_v7 = vld [vmem:[%s11808_s3 + $0x4c0] sm:$0xff]  ;;  %v7893_v9 = vpack.c.bf16 %v6023_v34, %v6022_v6  ;;  %7892 = vmatprep.subr.bf16.mxu1 %v7891_v16  ;;  %v6063_v6 = vld [vmem:[%s11805_s23 + $0x508] sm:$0xff]  ;;  %v7951_v34 = vpack.c.bf16 %v6113_v24, %v6112_v4 }
 0xed9   : > { %v7895_v10 = vpack.c.bf16 %v6041_v8, %v6040_v7  ;;  %v6062_v16 = vld [vmem:[%s11805_s23 + $0x500] sm:$0xff]  ;;  %v6080_v8 = vld [vmem:[%s11805_s23 + $0x590] sm:$0xff]  ;;  %v6131_v57 = vld [vmem:[%s11808_s3 + $0x508] sm:$0xff] }
 0xeda   : > { %v7921_v7 = vpack.c.bf16 %v6063_v6, %v6062_v16  ;;  %v6100_v24 = vld [vmem:[%s11806_s2 + $0x520] sm:$0xff]  ;;  %v6101_v16 = vld [vmem:[%s11806_s2 + $0x528] sm:$0xff]  ;;  %v6118_v6 = vld [vmem:[%s11806_s2 + $0x5b0] sm:$0xff] }
 0xedb   : > { %7862 = vmatpush3.bf16.msra.mxu0 %v7861_v12  ;;  %v6025_v12 = vld [vmem:[%s11808_s3 + $0x448] sm:$0xff]  ;;  %7894 = vmatpush3.bf16.msra.mxu1 %v7893_v9  ;;  %v6081_v9 = vld [vmem:[%s11805_s23 + $0x598] sm:$0xff] }
 0xedc   : > { %7864 = vmatprep.subr.bf16.mxu0 %v7863_v13  ;;  %v6042_v13 = vld [vmem:[%s11808_s3 + $0x4d0] sm:$0xff]  ;;  %v7897_v15 = vpack.c.bf16 %v6025_v12, %v6024_v11  ;;  %7896 = vmatprep.subr.bf16.mxu1 %v7895_v10  ;;  %v7923_v10 = vpack.c.bf16 %v6081_v9, %v6080_v8  ;;  %v6065_v12 = vld [vmem:[%s11805_s23 + $0x518] sm:$0xff] }
 0xedd   : > { %v7899_v17 = vpack.c.bf16 %v6043_v14, %v6042_v13  ;;  %v6064_v11 = vld [vmem:[%s11805_s23 + $0x510] sm:$0xff]  ;;  %v6082_v14 = vld [vmem:[%s11805_s23 + $0x5a0] sm:$0xff] }
 0xede   : > { %v7925_v13 = vpack.c.bf16 %v6065_v12, %v6064_v11  ;;  %v6102_v9 = vld [vmem:[%s11806_s2 + $0x530] sm:$0xff]  ;;  %v6120_v11 = vld [vmem:[%s11806_s2 + $0x5c0] sm:$0xff]  ;;  %v6121_v12 = vld [vmem:[%s11806_s2 + $0x5c8] sm:$0xff] }
 0xedf   : > { %7866 = vmatpush3.bf16.msra.mxu0 %v7865_v20  ;;  %v6027_v20 = vld [vmem:[%s11808_s3 + $0x458] sm:$0xff]  ;;  %7898 = vmatpush3.bf16.msra.mxu1 %v7897_v15  ;;  %v6083_v15 = vld [vmem:[%s11805_s23 + $0x5a8] sm:$0xff] }
 0xee0   : > { %7868 = vmatprep.subr.bf16.mxu0 %v7867_v21  ;;  %v6044_v21 = vld [vmem:[%s11808_s3 + $0x4e0] sm:$0xff]  ;;  %v7901_v23 = vpack.c.bf16 %v6027_v20, %v6026_v18  ;;  %7900 = vmatprep.subr.bf16.mxu1 %v7899_v17  ;;  %v7927_v17 = vpack.c.bf16 %v6083_v15, %v6082_v14  ;;  %v6067_v20 = vld [vmem:[%s11805_s23 + $0x528] sm:$0xff]  ;;  %v7967_v14 = vpack.c.bf16 %v6121_v12, %v6120_v11 }
 0xee1   : > { %v7903_v25 = vpack.c.bf16 %v6045_v22, %v6044_v21  ;;  %v6066_v18 = vld [vmem:[%s11805_s23 + $0x520] sm:$0xff]  ;;  %v6084_v22 = vld [vmem:[%s11805_s23 + $0x5b0] sm:$0xff] }
 0xee2   : > { %v7929_v21 = vpack.c.bf16 %v6067_v20, %v6066_v18  ;;  %v6104_v15 = vld [vmem:[%s11806_s2 + $0x540] sm:$0xff]  ;;  %v6122_v18 = vld [vmem:[%s11806_s2 + $0x5d0] sm:$0xff]  ;;  %v6123_v20 = vld [vmem:[%s11806_s2 + $0x5d8] sm:$0xff] }
 0xee3   : > { %7870 = vmatpush3.bf16.msra.mxu0 %v7869_v27  ;;  %v6029_v27 = vld [vmem:[%s11808_s3 + $0x468] sm:$0xff]  ;;  %7902 = vmatpush3.bf16.msra.mxu1 %v7901_v23  ;;  %v6085_v23 = vld [vmem:[%s11805_s23 + $0x5b8] sm:$0xff] }
 0xee4   : > { %7872 = vmatprep.subr.bf16.mxu0 %v7871_v28  ;;  %v6046_v28 = vld [vmem:[%s11808_s3 + $0x4f0] sm:$0xff]  ;;  %v7905_v30 = vpack.c.bf16 %v6029_v27, %v6028_v26  ;;  %7904 = vmatprep.subr.bf16.mxu1 %v7903_v25  ;;  %v7931_v25 = vpack.c.bf16 %v6085_v23, %v6084_v22  ;;  %v6069_v27 = vld [vmem:[%s11805_s23 + $0x538] sm:$0xff]  ;;  %v7971_v22 = vpack.c.bf16 %v6123_v20, %v6122_v18 }
 0xee5   : > { %v7907_v31 = vpack.c.bf16 %v6047_v29, %v6046_v28  ;;  %v6068_v26 = vld [vmem:[%s11805_s23 + $0x530] sm:$0xff]  ;;  %v6086_v29 = vld [vmem:[%s11805_s23 + $0x5c0] sm:$0xff] }
 0xee6   : > { %v7933_v28 = vpack.c.bf16 %v6069_v27, %v6068_v26  ;;  %v6106_v23 = vld [vmem:[%s11806_s2 + $0x550] sm:$0xff]  ;;  %v6124_v26 = vld [vmem:[%s11806_s2 + $0x5e0] sm:$0xff]  ;;  %v6125_v27 = vld [vmem:[%s11806_s2 + $0x5e8] sm:$0xff] }
 0xee7   : > { %7874 = vmatpush3.bf16.msra.mxu0 %v7873_v33  ;;  %v6031_v33 = vld [vmem:[%s11808_s3 + $0x478] sm:$0xff]  ;;  %7906 = vmatpush3.bf16.msra.mxu1 %v7905_v30  ;;  %v6087_v30 = vld [vmem:[%s11805_s23 + $0x5c8] sm:$0xff] }
 0xee8   : > { %7876 = vmatprep.subr.bf16.mxu0 %v7875_v35  ;;  %v7909_v35 = vpack.c.bf16 %v6031_v33, %v6030_v32  ;;  %7908 = vmatprep.subr.bf16.mxu1 %v7907_v31  ;;  %v7935_v31 = vpack.c.bf16 %v6087_v30, %v6086_v29  ;;  %v6070_v32 = vld [vmem:[%s11805_s23 + $0x540] sm:$0xff]  ;;  %v6071_v33 = vld [vmem:[%s11805_s23 + $0x548] sm:$0xff]  ;;  %v7975_v29 = vpack.c.bf16 %v6125_v27, %v6124_v26 }
 0xee9   : > { %v6108_v30 = vld [vmem:[%s11806_s2 + $0x560] sm:$0xff] }
 0xeeb   : > { %7878 = vmatpush3.bf16.msra.mxu0 %v7877_v39  ;;  %7910 = vmatpush3.bf16.msra.mxu1 %v7909_v35  ;;  %v7937_v35 = vpack.c.bf16 %v6071_v33, %v6070_v32  ;;  %v6126_v32 = vld [vmem:[%s11806_s2 + $0x5f0] sm:$0xff]  ;;  %v6127_v33 = vld [vmem:[%s11806_s2 + $0x5f8] sm:$0xff] }
 0xeec   : > { %7359 = vmatprep.subr.mxu0 %v8488_v19  ;;  %7364 = vmatprep.subr.mxu1 %v8488_v19 }
 0xeed   : > { %v6880_v42 = vpop.f32.mrb[14].mxu1 }
 0xeee   : > { %3073 = vmatmul.mubr.f32.vlgmr.msra.gmra.mrb[28].mxu0 %v10218_v41  ;;  %v6881_v44 = vpop.f32.mrb[15].mxu1  ;;  %3184 = vmatmul.mubr.f32.vlgmr.msra.gmra.mrb[16].mxu1 %v10218_v41 }
 0xeef   : > { %7361 = vmatprep.mubr.msk.f32.mxu0 %vm8489_vm0, %v8488_v19  ;;  %v6882_v45 = vadd.f32 %v6881_v44, %v6880_v42  ;;  %7366 = vmatprep.mubr.msk.f32.mxu1 %vm8489_vm0, %v8488_v19 }
 0xef1   : > { %v2964_v40 = vadd.f32 %v6882_v45, %v5981_v46 }
 0xef3   : > { %v3189_v51 = vmul.f32 0.17677669, %v2964_v40 }
 0xfc1   : > { %v6915_v47 = vpop.f32.mrb[28].mxu0  ;;  %v6950_v40 = vpop.f32.mrb[16].mxu1 }
 0xfc2   : > { %v6916_v43 = vpop.f32.mrb[29].mxu0 }
 0xfc3   : > { %v6917_v49 = vadd.f32 %v6916_v43, %v6915_v47 }
 0xfc5   : > { %v3075_v50 = vadd.f32 %v6917_v49, %v6015_v48  ;;  %v6951_v48 = vpop.f32.mrb[17].mxu1  ;;  %v6049_v49 = vld [vmem:[%s11771_s6 + $0x4] ss:$0 sm:$0xff] }
 0xfc6   : > { %v6952_v43 = vadd.f32 %v6951_v48, %v6950_v40  ;;  %v6074_v48 = vld [vmem:[%s11805_s23 + $0x560] sm:$0xff] }
 0xfc7   : > { %7360 = vmatpush3.xpose.msk.msra.mxu0 %vm877_vm1, %v3075_v50 }
 0xfc8   : > { %v3186_v50 = vadd.f32 %v6952_v43, %v6049_v49  ;;  %v6075_v43 = vld [vmem:[%s11805_s23 + $0x568] sm:$0xff] }
 0xfc9   : > { %v7945_v49 = vpack.c.bf16 %v6075_v43, %v6074_v48  ;;  %v6129_v43 = vld [vmem:[%s11770_s5 + $0x5] ss:$0 sm:$0xff] }
 0xfca   : > { %7362 = vmatmul.mubr.msk.f32.vlgmr.msra.gmra.mrb[30].mxu0 %vm877_vm1, %v3189_v51  ;;  %7365 = vmatpush3.msra.mxu1 %v3186_v50  ;;  %v6054_v51 = vld [vmem:[%s11772_s7 + $0x108] sm:$0xff]  ;;  %v6092_v50 = vld [vmem:[%s11805_s23 + $0x5f0] sm:$0xff] }
 0xfcb   : > { %3426 = vmatprep.mubr.f32.mxu0 %v8488_v19  ;;  %v7911_v54 = vpack.c.bf16 %v6056_v52, %v6054_v51  ;;  %7920 = vmatprep.subr.bf16.mxu1 %v7919_v5  ;;  %v6093_v51 = vld [vmem:[%s11805_s23 + $0x5f8] sm:$0xff] }
 0xfcc   : > { %v7947_v52 = vpack.c.bf16 %v6093_v51, %v6092_v50 }
 0xfcd   : > { %7912 = vmatprep.subr.bf16.mxu0 %v7911_v54  ;;  %v6077_v54 = vld [vmem:[%s11805_s23 + $0x578] sm:$0xff] }
 0xfce   : > { %7914 = vmatpush1.bf16.msra.mxu0 %v7913_v58  ;;  %v7949_v55 = vpack.c.bf16 %v6077_v54, %v6076_v53  ;;  %v6114_v58 = vld [vmem:[%s11806_s2 + $0x590] sm:$0xff]  ;;  %v6146_v53 = vld [vmem:[%s11808_s3 + $0x580] sm:$0xff]  ;;  %v6147_v54 = vld [vmem:[%s11808_s3 + $0x588] sm:$0xff] }
 0xfcf   : > { %7916 = vmatprep.subr.bf16.mxu0 %v7915_v59  ;;  %v6115_v59 = vld [vmem:[%s11806_s2 + $0x598] sm:$0xff]  ;;  %v7983_v56 = vpack.c.bf16 %v6147_v54, %v6146_v53  ;;  %v6168_v53 = vld [vmem:[%s11772_s7 + $0x148] sm:$0xff] }
 0xfd0   : > { %v7955_v37 = vpack.c.bf16 %v6115_v59, %v6114_v58  ;;  %v6148_v58 = vld [vmem:[%s11808_s3 + $0x590] sm:$0xff]  ;;  %v6149_v59 = vld [vmem:[%s11808_s3 + $0x598] sm:$0xff] }
 0xfd1   : > { %v6170_v54 = vld [vmem:[%s11772_s7 + $0x158] sm:$0xff] }
 0xfd2   : > { %7918 = vmatpush1.bf16.msra.mxu0 %v7917_v61  ;;  %v6098_v61 = vld [vmem:[%s11806_s2 + $0x510] sm:$0xff] }
 0xfd3   : > { %7952 = vmatprep.subr.bf16.mxu0 %v7951_v34  ;;  %v6119_v34 = vld [vmem:[%s11806_s2 + $0x5b8] sm:$0xff] }
 0xfd4   : > { %v7963_v8 = vpack.c.bf16 %v6119_v34, %v6118_v6 }
0x109d   : > { %v3262_v36 = vpop.f32.mrb[30].mxu0 }
0x109e   : > { %v7363_v38 = vpop.f32.mrb[31].mxu0  ;;  %v3266_v39 = vsel %vm954_vm2, %v3262_v36, -inf }
0x109f   : > { %3267 = vmax.xlane.f32.xlu0 %v3266_v39  ;;  %v6089_v38 = vld [vmem:[%s11805_s23 + $0x5d8] sm:$0xff] }
0x112c   : > { %v3268_v42 = vpop.xlane.xlu0 %3267 }
0x112d   : > { %v3269_v44 = vsub.f32 %v3262_v36, %v3268_v42  ;;  %v6088_v36 = vld [vmem:[%s11805_s23 + $0x5d0] sm:$0xff] }
0x112e   : > { %v7939_v39 = vpack.c.bf16 %v6089_v38, %v6088_v36  ;;  %v6072_v42 = vld [vmem:[%s11805_s23 + $0x550] sm:$0xff]  ;;  %v7979_v36 = vpack.c.bf16 %v6127_v33, %v6126_v32 }
0x112f   : > { %v3270_v45 = vmul.f32 1.442695, %v3269_v44  ;;  %v6073_v44 = vld [vmem:[%s11805_s23 + $0x558] sm:$0xff]  ;;  %v6110_v38 = vld [vmem:[%s11806_s2 + $0x570] sm:$0xff] }
0x1131   : > { %8398 = vpow2.f32 %v3270_v45  ;;  %v7941_v45 = vpack.c.bf16 %v6073_v44, %v6072_v42 }
0x113b   : > { %v8399_v46 = vpop.eup %8398 }
0x113c   : > { %v3272_v47 = vsel %vm954_vm2, %v8399_v46, 0.0 }
0x113d   : > { %3273 = vadd.xlane.f32.xlu1 %v3272_v47  ;;  %v6091_v47 = vld [vmem:[%s11805_s23 + $0x5e8] sm:$0xff] }
0x11ca   : > { %v3274_v62 = vpop.xlane.xlu1 %3273 }
0x11cb   : > { %8400 = vrcp.f32 %v3274_v62  ;;  %v6099_v62 = vld [vmem:[%s11806_s2 + $0x518] sm:$0xff] }
0x11cc   : > { %v7957_v4 = vpack.c.bf16 %v6099_v62, %v6098_v61  ;;  %v6132_v61 = vld [vmem:[%s11808_s3 + $0x510] sm:$0xff]  ;;  %v6133_v62 = vld [vmem:[%s11808_s3 + $0x518] sm:$0xff] }
0x11d5   : > { %v8401_v63 = vpop.eup %8400 }
0x11d6   : > { %v3276_v0 = vmul.f32 %v8401_v63, %v8399_v46  ;;  %v6090_v46 = vld [vmem:[%s11805_s23 + $0x5e0] sm:$0xff] }
0x11d7   : > { %v7943_v40 = vpack.c.bf16 %v6091_v47, %v6090_v46  ;;  %v6095_v47 = vld [vmem:[%s11769_s4 + $0x5] ss:$0 sm:$0xff] }
0x11d8   : > { %7367 = vmatmul.mubr.msk.f32.vlgmr.msra.gmra.mrb[18].mxu1 %vm954_vm2, %v3276_v0  ;;  %v6116_v0 = vld [vmem:[%s11806_s2 + $0x5a0] sm:$0xff] }
0x11d9   : > { %3540 = vmatprep.mubr.f32.mxu1 %v10363_v1  ;;  %7922 = vmatpush3.bf16.msra.mxu1 %v7921_v7  ;;  %v7959_v5 = vpack.c.bf16 %v6117_v2, %v6116_v0  ;;  %v7961_v7 = vpack.c.bf16 %v6101_v16, %v6100_v24  ;;  %v6151_v0 = vld [vmem:[%s11808_s3 + $0x5a8] sm:$0xff]  ;;  %v7989_v2 = vpack.c.bf16 %v6133_v62, %v6132_v61  ;;  %v6152_v24 = vld [vmem:[%s11808_s3 + $0x5b0] sm:$0xff]  ;;  %v6153_v16 = vld [vmem:[%s11808_s3 + $0x5b8] sm:$0xff] }
0x11da   : > { %7924 = vmatprep.subr.bf16.mxu1 %v7923_v10  ;;  %v6103_v10 = vld [vmem:[%s11806_s2 + $0x538] sm:$0xff]  ;;  %v7995_v34 = vpack.c.bf16 %v6153_v16, %v6152_v24  ;;  %v6167_v62 = vld [vmem:[%s11772_s7 + $0x140] sm:$0xff] }
0x11db   : > { %v6171_v16 = vld [vmem:[%s11772_s7 + $0x160] sm:$0xff] }
0x11dd   : > { %7926 = vmatpush3.bf16.msra.mxu1 %v7925_v13  ;;  %v7965_v13 = vpack.c.bf16 %v6103_v10, %v6102_v9  ;;  %v6154_v9 = vld [vmem:[%s11808_s3 + $0x5c0] sm:$0xff]  ;;  %v6155_v10 = vld [vmem:[%s11808_s3 + $0x5c8] sm:$0xff] }
0x11de   : > { %7928 = vmatprep.subr.bf16.mxu1 %v7927_v17  ;;  %v6105_v17 = vld [vmem:[%s11806_s2 + $0x548] sm:$0xff]  ;;  %v7999_v12 = vpack.c.bf16 %v6155_v10, %v6154_v9  ;;  %v6228_v10 = vld [vmem:[%s11806_s2 + $0x690] sm:$0xff] }
0x11e1   : > { %7930 = vmatpush3.bf16.msra.mxu1 %v7929_v21  ;;  %v7969_v21 = vpack.c.bf16 %v6105_v17, %v6104_v15  ;;  %v6156_v15 = vld [vmem:[%s11808_s3 + $0x5d0] sm:$0xff]  ;;  %v6157_v17 = vld [vmem:[%s11808_s3 + $0x5d8] sm:$0xff] }
0x11e2   : > { %7932 = vmatprep.subr.bf16.mxu1 %v7931_v25  ;;  %v6107_v25 = vld [vmem:[%s11806_s2 + $0x558] sm:$0xff]  ;;  %v8003_v20 = vpack.c.bf16 %v6157_v17, %v6156_v15  ;;  %v6230_v17 = vld [vmem:[%s11806_s2 + $0x6a0] sm:$0xff] }
0x11e5   : > { %7934 = vmatpush3.bf16.msra.mxu1 %v7933_v28  ;;  %v7973_v28 = vpack.c.bf16 %v6107_v25, %v6106_v23  ;;  %v6158_v23 = vld [vmem:[%s11808_s3 + $0x5e0] sm:$0xff]  ;;  %v6159_v25 = vld [vmem:[%s11808_s3 + $0x5e8] sm:$0xff] }
0x11e6   : > { %7936 = vmatprep.subr.bf16.mxu1 %v7935_v31  ;;  %v6109_v31 = vld [vmem:[%s11806_s2 + $0x568] sm:$0xff]  ;;  %v8007_v27 = vpack.c.bf16 %v6159_v25, %v6158_v23  ;;  %v6232_v25 = vld [vmem:[%s11806_s2 + $0x6b0] sm:$0xff] }
0x11e9   : > { %7938 = vmatpush3.bf16.msra.mxu1 %v7937_v35  ;;  %v7977_v35 = vpack.c.bf16 %v6109_v31, %v6108_v30  ;;  %v6160_v30 = vld [vmem:[%s11808_s3 + $0x5f0] sm:$0xff]  ;;  %v6161_v31 = vld [vmem:[%s11808_s3 + $0x5f8] sm:$0xff] }
0x11ea   : > { %7940 = vmatprep.subr.bf16.mxu1 %v7939_v39  ;;  %v6111_v39 = vld [vmem:[%s11806_s2 + $0x578] sm:$0xff]  ;;  %v8011_v33 = vpack.c.bf16 %v6161_v31, %v6160_v30  ;;  %v6234_v31 = vld [vmem:[%s11806_s2 + $0x6c0] sm:$0xff] }
0x11eb   : > { %v7981_v42 = vpack.c.bf16 %v6111_v39, %v6110_v38 }
0x11ed   : > { %7942 = vmatpush3.bf16.msra.mxu1 %v7941_v45 }
0x11ee   : > { %7944 = vmatprep.subr.bf16.mxu1 %v7943_v40 }
0x11f1   : > { %7946 = vmatpush3.bf16.msra.mxu1 %v7945_v49 }
0x11f2   : > { %7948 = vmatprep.subr.bf16.mxu1 %v7947_v52 }
0x11f5   : > { %7950 = vmatpush3.bf16.msra.mxu1 %v7949_v55  ;;  %v6130_v55 = vld [vmem:[%s11808_s3 + $0x500] sm:$0xff] }
0x11f6   : > { %7984 = vmatprep.subr.bf16.mxu1 %v7983_v56  ;;  %v6226_v56 = vld [vmem:[%s11806_s2 + $0x680] sm:$0xff] }
0x11f8   : > { %3541 = vmatmul.mubr.f32.vlgmr.msra.gmra.mrb[20].mxu1 %v10218_v41 }
0x11f9   : > { %3762 = vmatprep.mubr.f32.mxu1 %v10363_v1 }
0x12ab   : > { %v3346_v63 = vpop.f32.mrb[18].mxu1 }
0x12ac   : > { %v7368_v3 = vpop.f32.mrb[19].mxu1  ;;  %6061 = vmatmul.mubr.msk.f32.vlgmr.msra.gmra.mrb[14].mxu0 %vm877_vm1, %v3346_v63  ;;  %v6150_v63 = vld [vmem:[%s11808_s3 + $0x5a0] sm:$0xff] }
0x12ad   : > { %7954 = vmatpush3.bf16.msra.mxu0 %v7953_v60  ;;  %3651 = vmatprep.mubr.f32.mxu0 %v10363_v1  ;;  %v7985_v60 = vpack.c.bf16 %v6131_v57, %v6130_v55  ;;  %v7991_v3 = vpack.c.bf16 %v6151_v0, %v6150_v63  ;;  %v8015_v55 = vpack.c.bf16 %v6170_v54, %v6168_v53  ;;  %v6227_v57 = vld [vmem:[%s11806_s2 + $0x688] sm:$0xff]  ;;  %v6169_v63 = vld [vmem:[%s11772_s7 + $0x150] sm:$0xff]  ;;  %v6241_v53 = vld [vmem:[%s11806_s2 + $0x6f8] sm:$0xff] }
0x12ae   : > { %7956 = vmatprep.subr.bf16.mxu0 %v7955_v37  ;;  %v7987_v37 = vpack.c.bf16 %v6149_v59, %v6148_v58  ;;  %v6210_v58 = vld [vmem:[%s11806_s2 + $0x600] sm:$0xff]  ;;  %v8055_v59 = vpack.c.bf16 %v6227_v57, %v6226_v56  ;;  %v6172_v0 = vld [vmem:[%s11772_s7 + $0x168] sm:$0xff]  ;;  %v6225_v56 = vld [vmem:[%s11806_s2 + $0x678] sm:$0xff] }
0x12af   : > { %7986 = vmatpush3.bf16.msra.mxu1 %v7985_v60  ;;  %v6211_v60 = vld [vmem:[%s11806_s2 + $0x608] sm:$0xff] }
0x12b0   : > { %7988 = vmatprep.subr.bf16.mxu1 %v7987_v37  ;;  %v8057_v37 = vpack.c.bf16 %v6211_v60, %v6210_v58  ;;  %v6176_v58 = vld [vmem:[%s11805_s23 + $0x600] sm:$0xff]  ;;  %v6194_v60 = vld [vmem:[%s11805_s23 + $0x690] sm:$0xff] }
0x12b1   : > { %7958 = vmatpush3.bf16.msra.mxu0 %v7957_v4  ;;  %v6134_v4 = vld [vmem:[%s11808_s3 + $0x520] sm:$0xff] }
0x12b2   : > { %7960 = vmatprep.subr.bf16.mxu0 %v7959_v5  ;;  %v6135_v5 = vld [vmem:[%s11808_s3 + $0x528] sm:$0xff] }
0x12b3   : > { %7990 = vmatpush3.bf16.msra.mxu1 %v7989_v2  ;;  %v7993_v6 = vpack.c.bf16 %v6135_v5, %v6134_v4  ;;  %v6174_v2 = vld [vmem:[%s11772_s7 + $0x178] sm:$0xff]  ;;  %v8017_v4 = vpack.c.bf16 %v6169_v63, %v6167_v62  ;;  %v6178_v62 = vld [vmem:[%s11805_s23 + $0x610] sm:$0xff] }
0x12b4   : > { %7992 = vmatprep.subr.bf16.mxu1 %v7991_v3  ;;  %v8019_v24 = vpack.c.bf16 %v6174_v2, %v6172_v0  ;;  %v6179_v63 = vld [vmem:[%s11805_s23 + $0x618] sm:$0xff]  ;;  %v6196_v2 = vld [vmem:[%s11805_s23 + $0x6a0] sm:$0xff] }
0x12b5   : > { %7962 = vmatpush3.bf16.msra.mxu0 %v7961_v7  ;;  %v6136_v7 = vld [vmem:[%s11808_s3 + $0x530] sm:$0xff] }
0x12b6   : > { %7964 = vmatprep.subr.bf16.mxu0 %v7963_v8  ;;  %v6137_v8 = vld [vmem:[%s11808_s3 + $0x538] sm:$0xff] }
0x12b7   : > { %7994 = vmatpush3.bf16.msra.mxu1 %v7993_v6  ;;  %v7997_v11 = vpack.c.bf16 %v6137_v8, %v6136_v7  ;;  %v6173_v6 = vld [vmem:[%s11772_s7 + $0x170] sm:$0xff]  ;;  %v6192_v7 = vld [vmem:[%s11805_s23 + $0x680] sm:$0xff]  ;;  %v6193_v8 = vld [vmem:[%s11805_s23 + $0x688] sm:$0xff] }
0x12b8   : > { %7996 = vmatprep.subr.bf16.mxu1 %v7995_v34  ;;  %v8021_v34 = vpack.c.bf16 %v6173_v6, %v6171_v16  ;;  %v8023_v9 = vpack.c.bf16 %v6193_v8, %v6192_v7  ;;  %v6180_v16 = vld [vmem:[%s11805_s23 + $0x620] sm:$0xff]  ;;  %v6181_v6 = vld [vmem:[%s11805_s23 + $0x628] sm:$0xff]  ;;  %v6199_v7 = vld [vmem:[%s11805_s23 + $0x6b8] sm:$0xff] }
0x12b9   : > { %7966 = vmatpush3.bf16.msra.mxu0 %v7965_v13  ;;  %v6138_v13 = vld [vmem:[%s11808_s3 + $0x540] sm:$0xff]  ;;  %v8033_v8 = vpack.c.bf16 %v6181_v6, %v6180_v16  ;;  %v6267_v16 = vld [vmem:[%s11808_s3 + $0x6b8] sm:$0xff] }
0x12ba   : > { %7968 = vmatprep.subr.bf16.mxu0 %v7967_v14  ;;  %v6139_v14 = vld [vmem:[%s11808_s3 + $0x548] sm:$0xff] }
0x12bb   : > { %7998 = vmatpush3.bf16.msra.mxu1 %v7997_v11  ;;  %v8001_v18 = vpack.c.bf16 %v6139_v14, %v6138_v13  ;;  %v6229_v11 = vld [vmem:[%s11806_s2 + $0x698] sm:$0xff]  ;;  %v6212_v13 = vld [vmem:[%s11806_s2 + $0x610] sm:$0xff] }
0x12bc   : > { %8000 = vmatprep.subr.bf16.mxu1 %v7999_v12  ;;  %v8059_v12 = vpack.c.bf16 %v6229_v11, %v6228_v10  ;;  %v6213_v14 = vld [vmem:[%s11806_s2 + $0x618] sm:$0xff]  ;;  %v6182_v10 = vld [vmem:[%s11805_s23 + $0x630] sm:$0xff] }
0x12bd   : > { %7970 = vmatpush3.bf16.msra.mxu0 %v7969_v21  ;;  %v6140_v21 = vld [vmem:[%s11808_s3 + $0x550] sm:$0xff]  ;;  %v8061_v15 = vpack.c.bf16 %v6213_v14, %v6212_v13  ;;  %v6183_v11 = vld [vmem:[%s11805_s23 + $0x638] sm:$0xff]  ;;  %v6201_v13 = vld [vmem:[%s11805_s23 + $0x6c8] sm:$0xff] }
0x12be   : > { %7972 = vmatprep.subr.bf16.mxu0 %v7971_v22  ;;  %v6141_v22 = vld [vmem:[%s11808_s3 + $0x558] sm:$0xff]  ;;  %v8037_v14 = vpack.c.bf16 %v6183_v11, %v6182_v10  ;;  %v6269_v10 = vld [vmem:[%s11808_s3 + $0x6c8] sm:$0xff] }
0x12bf   : > { %8002 = vmatpush3.bf16.msra.mxu1 %v8001_v18  ;;  %v8005_v26 = vpack.c.bf16 %v6141_v22, %v6140_v21  ;;  %v6231_v18 = vld [vmem:[%s11806_s2 + $0x6a8] sm:$0xff]  ;;  %v6214_v21 = vld [vmem:[%s11806_s2 + $0x620] sm:$0xff] }
0x12c0   : > { %8004 = vmatprep.subr.bf16.mxu1 %v8003_v20  ;;  %v8063_v20 = vpack.c.bf16 %v6231_v18, %v6230_v17  ;;  %v6215_v22 = vld [vmem:[%s11806_s2 + $0x628] sm:$0xff]  ;;  %v6184_v17 = vld [vmem:[%s11805_s23 + $0x640] sm:$0xff] }
0x12c1   : > { %7974 = vmatpush3.bf16.msra.mxu0 %v7973_v28  ;;  %v6142_v28 = vld [vmem:[%s11808_s3 + $0x560] sm:$0xff]  ;;  %v8065_v23 = vpack.c.bf16 %v6215_v22, %v6214_v21  ;;  %v6185_v18 = vld [vmem:[%s11805_s23 + $0x648] sm:$0xff]  ;;  %v6203_v21 = vld [vmem:[%s11805_s23 + $0x6d8] sm:$0xff] }
0x12c2   : > { %7976 = vmatprep.subr.bf16.mxu0 %v7975_v29  ;;  %v6143_v29 = vld [vmem:[%s11808_s3 + $0x568] sm:$0xff]  ;;  %v8041_v22 = vpack.c.bf16 %v6185_v18, %v6184_v17  ;;  %v6271_v17 = vld [vmem:[%s11808_s3 + $0x6d8] sm:$0xff] }
0x12c3   : > { %8006 = vmatpush3.bf16.msra.mxu1 %v8005_v26  ;;  %v8009_v32 = vpack.c.bf16 %v6143_v29, %v6142_v28  ;;  %v6233_v26 = vld [vmem:[%s11806_s2 + $0x6b8] sm:$0xff]  ;;  %v6216_v28 = vld [vmem:[%s11806_s2 + $0x630] sm:$0xff] }
0x12c4   : > { %8008 = vmatprep.subr.bf16.mxu1 %v8007_v27  ;;  %v8067_v27 = vpack.c.bf16 %v6233_v26, %v6232_v25  ;;  %v6217_v29 = vld [vmem:[%s11806_s2 + $0x638] sm:$0xff]  ;;  %v6186_v25 = vld [vmem:[%s11805_s23 + $0x650] sm:$0xff] }
0x12c5   : > { %7978 = vmatpush3.bf16.msra.mxu0 %v7977_v35  ;;  %v6144_v35 = vld [vmem:[%s11808_s3 + $0x570] sm:$0xff]  ;;  %v8069_v30 = vpack.c.bf16 %v6217_v29, %v6216_v28  ;;  %v6187_v26 = vld [vmem:[%s11805_s23 + $0x658] sm:$0xff]  ;;  %v6205_v28 = vld [vmem:[%s11805_s23 + $0x6e8] sm:$0xff] }
0x12c6   : > { %7980 = vmatprep.subr.bf16.mxu0 %v7979_v36  ;;  %v6145_v36 = vld [vmem:[%s11808_s3 + $0x578] sm:$0xff]  ;;  %v8045_v29 = vpack.c.bf16 %v6187_v26, %v6186_v25  ;;  %v6273_v25 = vld [vmem:[%s11808_s3 + $0x6e8] sm:$0xff] }
0x12c7   : > { %8010 = vmatpush3.bf16.msra.mxu1 %v8009_v32  ;;  %v8013_v38 = vpack.c.bf16 %v6145_v36, %v6144_v35  ;;  %v6235_v32 = vld [vmem:[%s11806_s2 + $0x6c8] sm:$0xff]  ;;  %v6218_v35 = vld [vmem:[%s11806_s2 + $0x640] sm:$0xff] }
0x12c8   : > { %8012 = vmatprep.subr.bf16.mxu1 %v8011_v33  ;;  %v8071_v33 = vpack.c.bf16 %v6235_v32, %v6234_v31  ;;  %v6219_v36 = vld [vmem:[%s11806_s2 + $0x648] sm:$0xff]  ;;  %v6188_v31 = vld [vmem:[%s11805_s23 + $0x660] sm:$0xff] }
0x12c9   : > { %7982 = vmatpush3.bf16.msra.mxu0 %v7981_v42  ;;  %v6189_v32 = vld [vmem:[%s11805_s23 + $0x668] sm:$0xff] }
0x12ca   : > { %7369 = vmatprep.subr.mxu0 %v8488_v19 }
0x12cb   : > { %v6989_v44 = vpop.f32.mrb[20].mxu1  ;;  %8014 = vmatpush3.bf16.msra.mxu1 %v8013_v38  ;;  %v8073_v38 = vpack.c.bf16 %v6219_v36, %v6218_v35  ;;  %v6207_v35 = vld [vmem:[%s11805_s23 + $0x6f8] sm:$0xff]  ;;  %v8049_v36 = vpack.c.bf16 %v6189_v32, %v6188_v31 }
0x12cc   : > { %3652 = vmatmul.mubr.f32.vlgmr.msra.gmra.mrb[32].mxu0 %v10218_v41  ;;  %v6990_v45 = vpop.f32.mrb[21].mxu1  ;;  %8056 = vmatprep.subr.bf16.mxu1 %v8055_v59  ;;  %v6177_v59 = vld [vmem:[%s11805_s23 + $0x608] sm:$0xff]  ;;  %v6275_v31 = vld [vmem:[%s11808_s3 + $0x6f8] sm:$0xff] }
0x12cd   : > { %7371 = vmatprep.mubr.msk.f32.mxu0 %vm8489_vm0, %v8488_v19  ;;  %v6991_v46 = vadd.f32 %v6990_v45, %v6989_v44 }
0x12ce   : > { %3763 = vmatmul.mubr.f32.vlgmr.msra.gmra.mrb[22].mxu1 %v10218_v41 }
0x12cf   : > { %v3543_v48 = vadd.f32 %v6991_v46, %v6095_v47  ;;  %4230 = vmatprep.mubr.f32.mxu1 %v10363_v1  ;;  %8058 = vmatpush3.bf16.msra.mxu1 %v8057_v37  ;;  %v6195_v37 = vld [vmem:[%s11805_s23 + $0x698] sm:$0xff] }
0x12d0   : > { %8060 = vmatprep.subr.bf16.mxu1 %v8059_v12  ;;  %v6200_v12 = vld [vmem:[%s11805_s23 + $0x6c0] sm:$0xff] }
0x12d1   : > { %v3768_v52 = vmul.f32 0.17677669, %v3543_v48 }
0x12d3   : > { %8062 = vmatpush3.bf16.msra.mxu1 %v8061_v15  ;;  %v8039_v15 = vpack.c.bf16 %v6201_v13, %v6200_v12  ;;  %v6252_v13 = vld [vmem:[%s11808_s3 + $0x640] sm:$0xff] }
0x12d4   : > { %8064 = vmatprep.subr.bf16.mxu1 %v8063_v20  ;;  %v6202_v20 = vld [vmem:[%s11805_s23 + $0x6d0] sm:$0xff] }
0x12d7   : > { %8066 = vmatpush3.bf16.msra.mxu1 %v8065_v23  ;;  %v8043_v23 = vpack.c.bf16 %v6203_v21, %v6202_v20  ;;  %v6254_v21 = vld [vmem:[%s11808_s3 + $0x650] sm:$0xff] }
0x12d8   : > { %8068 = vmatprep.subr.bf16.mxu1 %v8067_v27  ;;  %v6204_v27 = vld [vmem:[%s11805_s23 + $0x6e0] sm:$0xff] }
0x12db   : > { %8070 = vmatpush3.bf16.msra.mxu1 %v8069_v30  ;;  %v8047_v30 = vpack.c.bf16 %v6205_v28, %v6204_v27  ;;  %v6256_v28 = vld [vmem:[%s11808_s3 + $0x660] sm:$0xff] }
0x12dc   : > { %8072 = vmatprep.subr.bf16.mxu1 %v8071_v33  ;;  %v6206_v33 = vld [vmem:[%s11805_s23 + $0x6f0] sm:$0xff] }
0x12df   : > { %8074 = vmatpush3.bf16.msra.mxu1 %v8073_v38  ;;  %v8051_v38 = vpack.c.bf16 %v6207_v35, %v6206_v33  ;;  %v6258_v35 = vld [vmem:[%s11808_s3 + $0x670] sm:$0xff] }
0x139f   : > { %v7024_v40 = vpop.f32.mrb[32].mxu0 }
0x13a0   : > { %v7025_v49 = vpop.f32.mrb[33].mxu0 }
0x13a1   : > { %v7026_v50 = vadd.f32 %v7025_v49, %v7024_v40 }
0x13a3   : > { %v3654_v51 = vadd.f32 %v7026_v50, %v6129_v43  ;;  %v7059_v43 = vpop.f32.mrb[22].mxu1 }
0x13a4   : > { %v7060_v49 = vpop.f32.mrb[23].mxu1 }
0x13a5   : > { %7370 = vmatpush3.xpose.msk.msra.mxu0 %vm877_vm1, %v3654_v51  ;;  %v7061_v50 = vadd.f32 %v7060_v49, %v7059_v43  ;;  %v6163_v51 = vld [vmem:[%s11771_s6 + $0x5] ss:$0 sm:$0xff] }
0x13a6   : > { %7374 = vmatprep.subr.mxu0 %v8488_v19  ;;  %v6222_v49 = vld [vmem:[%s11806_s2 + $0x660] sm:$0xff] }
0x13a8   : > { %7372 = vmatmul.mubr.msk.f32.vlgmr.msra.gmra.mrb[34].mxu0 %vm877_vm1, %v3768_v52  ;;  %v3765_v52 = vadd.f32 %v7061_v50, %v6163_v51  ;;  %v6223_v50 = vld [vmem:[%s11806_s2 + $0x668] sm:$0xff] }
0x13a9   : > { %7376 = vmatprep.mubr.msk.f32.mxu0 %vm8489_vm0, %v8488_v19  ;;  %v8081_v51 = vpack.c.bf16 %v6223_v50, %v6222_v49  ;;  %v6209_v50 = vld [vmem:[%s11769_s4 + $0x6] ss:$0 sm:$0xff] }
0x13aa   : > { %7375 = vmatpush3.msra.mxu0 %v3765_v52  ;;  %v6240_v52 = vld [vmem:[%s11806_s2 + $0x6f0] sm:$0xff] }
0x13ab   : > { %8016 = vmatprep.subr.bf16.mxu0 %v8015_v55  ;;  %v8083_v54 = vpack.c.bf16 %v6241_v53, %v6240_v52  ;;  %v6224_v55 = vld [vmem:[%s11806_s2 + $0x670] sm:$0xff] }
0x13ac   : > { %v8085_v57 = vpack.c.bf16 %v6225_v56, %v6224_v55  ;;  %v6261_v55 = vld [vmem:[%s11808_s3 + $0x688] sm:$0xff]  ;;  %v6244_v56 = vld [vmem:[%s11808_s3 + $0x600] sm:$0xff] }
0x147b   : > { %v3841_v39 = vpop.f32.mrb[34].mxu0 }
0x147c   : > { %v7373_v42 = vpop.f32.mrb[35].mxu0  ;;  %v3845_v44 = vsel %vm954_vm2, %v3841_v39, -inf }
0x147d   : > { %3846 = vmax.xlane.f32.xlu0 %v3845_v44  ;;  %v6237_v42 = vld [vmem:[%s11806_s2 + $0x6d8] sm:$0xff] }
0x150a   : > { %v3847_v45 = vpop.xlane.xlu0 %3846 }
0x150b   : > { %v3848_v46 = vsub.f32 %v3841_v39, %v3847_v45  ;;  %v6236_v39 = vld [vmem:[%s11806_s2 + $0x6d0] sm:$0xff] }
0x150c   : > { %v8075_v44 = vpack.c.bf16 %v6237_v42, %v6236_v39  ;;  %v6220_v45 = vld [vmem:[%s11806_s2 + $0x650] sm:$0xff]  ;;  %v6191_v42 = vld [vmem:[%s11805_s23 + $0x678] sm:$0xff] }
0x150d   : > { %v3849_v47 = vmul.f32 1.442695, %v3848_v46  ;;  %v6221_v46 = vld [vmem:[%s11806_s2 + $0x658] sm:$0xff]  ;;  %v6190_v39 = vld [vmem:[%s11805_s23 + $0x670] sm:$0xff] }
0x150e   : > { %8076 = vmatprep.subr.bf16.mxu1 %v8075_v44  ;;  %v8053_v44 = vpack.c.bf16 %v6191_v42, %v6190_v39 }
0x150f   : > { %8402 = vpow2.f32 %v3849_v47  ;;  %v8077_v47 = vpack.c.bf16 %v6221_v46, %v6220_v45  ;;  %v10905_v45 = vld [vmem:[%s8789_s16] sm:$0xff] }
0x1511   : > { %8078 = vmatpush3.bf16.msra.mxu1 %v8077_v47  ;;  %v6243_v47 = vld [vmem:[%s11770_s5 + $0x6] ss:$0 sm:$0xff] }
0x1519   : > { %v8403_v40 = vpop.eup %8402 }
0x151a   : > { %v3851_v48 = vsel %vm954_vm2, %v8403_v40, 0.0 }
0x151b   : > { %3852 = vadd.xlane.f32.xlu1 %v3851_v48  ;;  %v6239_v48 = vld [vmem:[%s11806_s2 + $0x6e8] sm:$0xff] }
0x15a8   : > { %v3853_v61 = vpop.xlane.xlu1 %3852 }
0x15a9   : > { %8404 = vrcp.f32 %v3853_v61  ;;  %v8027_v61 = vpack.c.bf16 %v6195_v37, %v6194_v60  ;;  %v6263_v60 = vld [vmem:[%s11808_s3 + $0x698] sm:$0xff] }
0x15b3   : > { %v8405_v3 = vpop.eup %8404 }
0x15b4   : > { %v3855_v5 = vmul.f32 %v8405_v3, %v8403_v40  ;;  %v6238_v40 = vld [vmem:[%s11806_s2 + $0x6e0] sm:$0xff]  ;;  %v6197_v3 = vld [vmem:[%s11805_s23 + $0x6a8] sm:$0xff] }
0x15b5   : > { %v8079_v43 = vpack.c.bf16 %v6239_v48, %v6238_v40 }
0x15b6   : > { %7377 = vmatmul.mubr.msk.f32.vlgmr.msra.gmra.mrb[36].mxu0 %vm954_vm2, %v3855_v5  ;;  %v8029_v5 = vpack.c.bf16 %v6179_v63, %v6178_v62  ;;  %v6247_v62 = vld [vmem:[%s11808_s3 + $0x618] sm:$0xff]  ;;  %v6264_v63 = vld [vmem:[%s11808_s3 + $0x6a0] sm:$0xff] }
0x15b7   : > { %8018 = vmatpush1.bf16.msra.mxu0 %v8017_v4  ;;  %4005 = vmatprep.mubr.f32.mxu0 %v8488_v19 }
0x15b8   : > { %8020 = vmatprep.subr.bf16.mxu0 %v8019_v24  ;;  %8080 = vmatprep.subr.bf16.mxu1 %v8079_v43  ;;  %v8031_v24 = vpack.c.bf16 %v6197_v3, %v6196_v2 }
0x15b9   : > { %8082 = vmatpush3.bf16.msra.mxu1 %v8081_v51 }
0x15ba   : > { %8084 = vmatprep.subr.bf16.mxu1 %v8083_v54  ;;  %v6260_v54 = vld [vmem:[%s11808_s3 + $0x680] sm:$0xff] }
0x15bb   : > { %8022 = vmatpush1.bf16.msra.mxu0 %v8021_v34  ;;  %v6198_v34 = vld [vmem:[%s11805_s23 + $0x6b0] sm:$0xff] }
0x15bc   : > { %8024 = vmatprep.subr.bf16.mxu0 %v8023_v9  ;;  %v8035_v9 = vpack.c.bf16 %v6199_v7, %v6198_v34  ;;  %v6250_v7 = vld [vmem:[%s11808_s3 + $0x630] sm:$0xff] }
0x15bd   : > { %8086 = vmatpush3.bf16.msra.mxu1 %v8085_v57  ;;  %v8087_v57 = vpack.c.bf16 %v6261_v55, %v6260_v54  ;;  %v6284_v54 = vld [vmem:[%s11772_s7 + $0x198] sm:$0xff]  ;;  %v6281_v55 = vld [vmem:[%s11772_s7 + $0x180] sm:$0xff] }
0x15be   : > { %7379 = vmatprep.subr.mxu1 %v8488_v19 }
0x15c0   : > { %4231 = vmatmul.mubr.f32.vlgmr.msra.gmra.mrb[24].mxu1 %v10218_v41  ;;  %v8025_v41 = vpack.c.bf16 %v6177_v59, %v6176_v58  ;;  %v6245_v58 = vld [vmem:[%s11808_s3 + $0x608] sm:$0xff]  ;;  %v6262_v59 = vld [vmem:[%s11808_s3 + $0x690] sm:$0xff] }
0x15c1   : > { %7381 = vmatprep.mubr.msk.f32.mxu1 %vm8489_vm0, %v8488_v19  ;;  %v8089_v37 = vpack.c.bf16 %v6245_v58, %v6244_v56  ;;  %v6286_v58 = vld [vmem:[%s11772_s7 + $0x1a8] sm:$0xff] }
0x1689   : > { %v3925_v0 = vpop.f32.mrb[36].mxu0 }
0x168a   : > { %v7378_v4 = vpop.f32.mrb[37].mxu0  ;;  %6175 = vmatmul.mubr.msk.f32.vlgmr.msra.gmra.mrb[14].mxu0 %vm877_vm1, %v3925_v0  ;;  %v6265_v0 = vld [vmem:[%s11808_s3 + $0x6a8] sm:$0xff] }
0x168b   : > { %8026 = vmatpush3.bf16.msra.mxu0 %v8025_v41  ;;  %4119 = vmatprep.mubr.f32.mxu0 %v10363_v1  ;;  %v8091_v41 = vpack.c.bf16 %v6263_v60, %v6262_v59  ;;  %v8095_v3 = vpack.c.bf16 %v6265_v0, %v6264_v63  ;;  %v6248_v4 = vld [vmem:[%s11808_s3 + $0x620] sm:$0xff]  ;;  %v6288_v59 = vld [vmem:[%s11772_s7 + $0x1b8] sm:$0xff] }
0x168c   : > { %8028 = vmatprep.subr.bf16.mxu0 %v8027_v61  ;;  %v6246_v61 = vld [vmem:[%s11808_s3 + $0x610] sm:$0xff] }
0x168d   : > { %v8093_v2 = vpack.c.bf16 %v6247_v62, %v6246_v61  ;;  %v6287_v61 = vld [vmem:[%s11772_s7 + $0x1b0] sm:$0xff] }
0x168f   : > { %8030 = vmatpush3.bf16.msra.mxu0 %v8029_v5  ;;  %v6249_v5 = vld [vmem:[%s11808_s3 + $0x628] sm:$0xff] }
0x1690   : > { %8032 = vmatprep.subr.bf16.mxu0 %v8031_v24  ;;  %v6266_v24 = vld [vmem:[%s11808_s3 + $0x6b0] sm:$0xff]  ;;  %v8097_v6 = vpack.c.bf16 %v6249_v5, %v6248_v4  ;;  %v6340_v4 = vld [vmem:[%s11806_s2 + $0x780] sm:$0xff]  ;;  %v6341_v5 = vld [vmem:[%s11806_s2 + $0x788] sm:$0xff] }
0x1691   : > { %v8099_v34 = vpack.c.bf16 %v6267_v16, %v6266_v24  ;;  %v6306_v24 = vld [vmem:[%s11805_s23 + $0x780] sm:$0xff]  ;;  %v8159_v16 = vpack.c.bf16 %v6341_v5, %v6340_v4  ;;  %v6345_v4 = vld [vmem:[%s11806_s2 + $0x7a8] sm:$0xff] }
0x1693   : > { %8034 = vmatpush3.bf16.msra.mxu0 %v8033_v8  ;;  %v7133_v46 = vpop.f32.mrb[24].mxu1  ;;  %v6251_v8 = vld [vmem:[%s11808_s3 + $0x638] sm:$0xff] }
0x1694   : > { %8036 = vmatprep.subr.bf16.mxu0 %v8035_v9  ;;  %v7134_v40 = vpop.f32.mrb[25].mxu1  ;;  %v6268_v9 = vld [vmem:[%s11808_s3 + $0x6c0] sm:$0xff]  ;;  %v8101_v11 = vpack.c.bf16 %v6251_v8, %v6250_v7  ;;  %v6291_v8 = vld [vmem:[%s11805_s23 + $0x708] sm:$0xff] }
0x1695   : > { %v7135_v48 = vadd.f32 %v7134_v40, %v7133_v46  ;;  %v8103_v12 = vpack.c.bf16 %v6269_v10, %v6268_v9  ;;  %v6290_v7 = vld [vmem:[%s11805_s23 + $0x700] sm:$0xff]  ;;  %v6308_v10 = vld [vmem:[%s11805_s23 + $0x790] sm:$0xff] }
0x1696   : > { %v8129_v9 = vpack.c.bf16 %v6291_v8, %v6290_v7  ;;  %v6346_v7 = vld [vmem:[%s11806_s2 + $0x7b0] sm:$0xff]  ;;  %v6347_v8 = vld [vmem:[%s11806_s2 + $0x7b8] sm:$0xff] }
0x1697   : > { %8038 = vmatpush3.bf16.msra.mxu0 %v8037_v14  ;;  %v4233_v43 = vadd.f32 %v7135_v48, %v6243_v47  ;;  %v6253_v14 = vld [vmem:[%s11808_s3 + $0x648] sm:$0xff] }
0x1698   : > { %8040 = vmatprep.subr.bf16.mxu0 %v8039_v15  ;;  %v6270_v15 = vld [vmem:[%s11808_s3 + $0x6d0] sm:$0xff]  ;;  %v8105_v18 = vpack.c.bf16 %v6253_v14, %v6252_v13  ;;  %v6293_v14 = vld [vmem:[%s11805_s23 + $0x718] sm:$0xff] }
0x1699   : > { %7380 = vmatpush3.xpose.msk.msra.mxu1 %vm877_vm1, %v4233_v43  ;;  %v8107_v20 = vpack.c.bf16 %v6271_v17, %v6270_v15  ;;  %v6292_v13 = vld [vmem:[%s11805_s23 + $0x710] sm:$0xff]  ;;  %v6310_v17 = vld [vmem:[%s11805_s23 + $0x7a0] sm:$0xff] }
0x169a   : > { %7384 = vmatprep.subr.mxu1 %v8488_v19  ;;  %v8133_v15 = vpack.c.bf16 %v6293_v14, %v6292_v13  ;;  %v6349_v13 = vld [vmem:[%s11806_s2 + $0x7c8] sm:$0xff] }
0x169b   : > { %8042 = vmatpush3.bf16.msra.mxu0 %v8041_v22  ;;  %v6255_v22 = vld [vmem:[%s11808_s3 + $0x658] sm:$0xff] }
0x169c   : > { %8044 = vmatprep.subr.bf16.mxu0 %v8043_v23  ;;  %v6272_v23 = vld [vmem:[%s11808_s3 + $0x6e0] sm:$0xff]  ;;  %v8109_v26 = vpack.c.bf16 %v6255_v22, %v6254_v21  ;;  %v6295_v22 = vld [vmem:[%s11805_s23 + $0x728] sm:$0xff] }
0x169d   : > { %v8111_v27 = vpack.c.bf16 %v6273_v25, %v6272_v23  ;;  %v6294_v21 = vld [vmem:[%s11805_s23 + $0x720] sm:$0xff]  ;;  %v6312_v25 = vld [vmem:[%s11805_s23 + $0x7b0] sm:$0xff] }
0x169e   : > { %v8137_v23 = vpack.c.bf16 %v6295_v22, %v6294_v21  ;;  %v6351_v21 = vld [vmem:[%s11806_s2 + $0x7d8] sm:$0xff] }
0x169f   : > { %8046 = vmatpush3.bf16.msra.mxu0 %v8045_v29  ;;  %v6257_v29 = vld [vmem:[%s11808_s3 + $0x668] sm:$0xff] }
0x16a0   : > { %8048 = vmatprep.subr.bf16.mxu0 %v8047_v30  ;;  %v6274_v30 = vld [vmem:[%s11808_s3 + $0x6f0] sm:$0xff]  ;;  %v8113_v32 = vpack.c.bf16 %v6257_v29, %v6256_v28  ;;  %v6297_v29 = vld [vmem:[%s11805_s23 + $0x738] sm:$0xff] }
0x16a1   : > { %v8115_v33 = vpack.c.bf16 %v6275_v31, %v6274_v30  ;;  %v6296_v28 = vld [vmem:[%s11805_s23 + $0x730] sm:$0xff]  ;;  %v6314_v31 = vld [vmem:[%s11805_s23 + $0x7c0] sm:$0xff] }
0x16a2   : > { %v8141_v30 = vpack.c.bf16 %v6297_v29, %v6296_v28  ;;  %v6353_v28 = vld [vmem:[%s11806_s2 + $0x7e8] sm:$0xff] }
0x16a3   : > { %8050 = vmatpush3.bf16.msra.mxu0 %v8049_v36  ;;  %v6259_v36 = vld [vmem:[%s11808_s3 + $0x678] sm:$0xff] }
0x16a4   : > { %8052 = vmatprep.subr.bf16.mxu0 %v8051_v38  ;;  %v8117_v38 = vpack.c.bf16 %v6259_v36, %v6258_v35  ;;  %v6298_v35 = vld [vmem:[%s11805_s23 + $0x740] sm:$0xff]  ;;  %v6299_v36 = vld [vmem:[%s11805_s23 + $0x748] sm:$0xff] }
0x16a7   : > { %8054 = vmatpush3.bf16.msra.mxu0 %v8053_v44 }
0x16a8   : > { %8088 = vmatprep.subr.bf16.mxu0 %v8087_v57  ;;  %v6283_v57 = vld [vmem:[%s11772_s7 + $0x190] sm:$0xff] }
0x16a9   : > { %v8121_v60 = vpack.c.bf16 %v6283_v57, %v6281_v55  ;;  %v6304_v55 = vld [vmem:[%s11805_s23 + $0x770] sm:$0xff] }
0x16aa   : > { %4120 = vmatmul.mubr.f32.vlgmr.msra.gmra.mrb[38].mxu0 %v10905_v45 }
0x16ab   : > { %4341 = vmatprep.mubr.f32.mxu0 %v10363_v1  ;;  %8090 = vmatpush3.bf16.msra.mxu0 %v8089_v37  ;;  %v8123_v37 = vpack.c.bf16 %v6288_v59, %v6286_v58  ;;  %v6324_v58 = vld [vmem:[%s11806_s2 + $0x700] sm:$0xff]  ;;  %v6325_v59 = vld [vmem:[%s11806_s2 + $0x708] sm:$0xff] }
0x16ac   : > { %8092 = vmatprep.subr.bf16.mxu0 %v8091_v41  ;;  %v6285_v41 = vld [vmem:[%s11772_s7 + $0x1a0] sm:$0xff] }
0x16ad   : > { %v8125_v62 = vpack.c.bf16 %v6287_v61, %v6285_v41  ;;  %v8161_v41 = vpack.c.bf16 %v6325_v59, %v6324_v58  ;;  %v6359_v58 = vld [vmem:[%s11808_s3 + $0x708] sm:$0xff]  ;;  %v6376_v59 = vld [vmem:[%s11808_s3 + $0x790] sm:$0xff] }
0x16af   : > { %8094 = vmatpush3.bf16.msra.mxu0 %v8093_v2 }
0x16b0   : > { %8096 = vmatprep.subr.bf16.mxu0 %v8095_v3  ;;  %v11049_v3 = vld [vmem:[%s8789_s16 + $0x8] sm:$0xff]  ;;  %s541_s16 = scalar_lea.vmem [#allocation2], %s5596_s17  ;;  %s8428_s17 = sshll.u32 %s8490_s28, 4  ;;  %s8429_s17 = int_to_ptr.vmem [resolvable:$false] %s8428_s17 }
0x16b1   : > { %s5533_s26 = sshll.u32 %s541_s16, 4  ;;  %s8430_s18 = scalar_lea.vmem %s8429_s17, 256  ;;  %s11725_s26 = int_to_ptr.vmem [resolvable:$true] %s5533_s26 }
0x16b2   : > { %s8424_s22 = scalar_lea.vmem %s11725_s26, 128  ;;  %p8431_p0 = scmp.lt.s32.totalorder %s11725_s26, %s8429_s17 }
0x16b3   : > { %8098 = vmatpush3.bf16.msra.mxu0 %v8097_v6  ;;  %v6307_v6 = vld [vmem:[%s11805_s23 + $0x788] sm:$0xff]  ;;  %p8425_p11 = scmp.ne.s32.totalorder %s11725_s26, %s8424_s22  ;;  %p8432_p1 = scmp.lt.s32.totalorder %s8430_s18, %s8424_s22 }
0x16b4   : > { %8100 = vmatprep.subr.bf16.mxu0 %v8099_v34  ;;  %v8127_v34 = vpack.c.bf16 %v6307_v6, %v6306_v24  ;;  %v6328_v6 = vld [vmem:[%s11806_s2 + $0x720] sm:$0xff] }
0x16b5   : > { %p8426_p12 = pnand %p8425_p11, %p8619_p5  ;;  %p8433_p2 = por %p8432_p1, %p8431_p0 }
0x16b7   : > { %8102 = vmatpush3.bf16.msra.mxu0 %v8101_v11  ;;  %v6309_v11 = vld [vmem:[%s11805_s23 + $0x798] sm:$0xff]  ;;  %p8427_p13 = pneg %p8426_p12 }
0x16b8   : > { %8104 = vmatprep.subr.bf16.mxu0 %v8103_v12  ;;  %v8131_v12 = vpack.c.bf16 %v6309_v11, %v6308_v10  ;;  %v6330_v10 = vld [vmem:[%s11806_s2 + $0x730] sm:$0xff]  ;;  %v6331_v11 = vld [vmem:[%s11806_s2 + $0x738] sm:$0xff] }
0x16b9   : > { %v8173_v14 = vpack.c.bf16 %v6331_v11, %v6330_v10  ;;  %v6383_v10 = vld [vmem:[%s11808_s3 + $0x7c8] sm:$0xff]  ;;  %p8434_p3 = pnand %p8433_p2, %p8427_p13 }
0x16bb   : > { %8106 = vmatpush3.bf16.msra.mxu0 %v8105_v18  ;;  %v6311_v18 = vld [vmem:[%s11805_s23 + $0x7a8] sm:$0xff] }
0x16bc   : > { %8108 = vmatprep.subr.bf16.mxu0 %v8107_v20  ;;  %v8135_v20 = vpack.c.bf16 %v6311_v18, %v6310_v17  ;;  %v6332_v17 = vld [vmem:[%s11806_s2 + $0x740] sm:$0xff]  ;;  %v6333_v18 = vld [vmem:[%s11806_s2 + $0x748] sm:$0xff] }
0x16bd   : > { %v8177_v22 = vpack.c.bf16 %v6333_v18, %v6332_v17  ;;  %v6385_v17 = vld [vmem:[%s11808_s3 + $0x7d8] sm:$0xff] }
0x16bf   : > { %8110 = vmatpush3.bf16.msra.mxu0 %v8109_v26  ;;  %v6313_v26 = vld [vmem:[%s11805_s23 + $0x7b8] sm:$0xff] }
0x16c0   : > { %8112 = vmatprep.subr.bf16.mxu0 %v8111_v27  ;;  %v8139_v27 = vpack.c.bf16 %v6313_v26, %v6312_v25  ;;  %v6334_v25 = vld [vmem:[%s11806_s2 + $0x750] sm:$0xff]  ;;  %v6335_v26 = vld [vmem:[%s11806_s2 + $0x758] sm:$0xff] }
0x16c1   : > { %v8181_v29 = vpack.c.bf16 %v6335_v26, %v6334_v25  ;;  %v6387_v25 = vld [vmem:[%s11808_s3 + $0x7e8] sm:$0xff] }
0x16c3   : > { %8114 = vmatpush3.bf16.msra.mxu0 %v8113_v32  ;;  %v6315_v32 = vld [vmem:[%s11805_s23 + $0x7c8] sm:$0xff] }
0x16c4   : > { %8116 = vmatprep.subr.bf16.mxu0 %v8115_v33  ;;  %v8143_v33 = vpack.c.bf16 %v6315_v32, %v6314_v31  ;;  %v6336_v31 = vld [vmem:[%s11806_s2 + $0x760] sm:$0xff]  ;;  %v6337_v32 = vld [vmem:[%s11806_s2 + $0x768] sm:$0xff] }
0x16c7   : > { %8118 = vmatpush3.bf16.msra.mxu0 %v8117_v38  ;;  %v8145_v38 = vpack.c.bf16 %v6299_v36, %v6298_v35  ;;  %v6355_v35 = vld [vmem:[%s11806_s2 + $0x7f8] sm:$0xff]  ;;  %v8185_v36 = vpack.c.bf16 %v6337_v32, %v6336_v31 }
0x16c8   : > { %v6389_v31 = vld [vmem:[%s11808_s3 + $0x7f8] sm:$0xff] }
0x16ca   : > { %4342 = vmatmul.mubr.f32.vlgmr.msra.gmra.mrb[40].mxu0 %v10905_v45 }
0x16cb   : > { %4584 = vmatprep.mubr.f32.mxu0 %v8488_v19 }
0x177d   : > { %v7098_v49 = vpop.f32.mrb[38].mxu0 }
0x177e   : > { %v7099_v51 = vpop.f32.mrb[39].mxu0 }
0x177f   : > { %v7100_v52 = vadd.f32 %v7099_v51, %v7098_v49 }
0x1781   : > { %v4122_v1 = vadd.f32 %v7100_v52, %v6209_v50  ;;  %v6277_v52 = vld [vmem:[%s11771_s6 + $0x6] ss:$0 sm:$0xff] }
0x1783   : > { %v4347_v53 = vmul.f32 0.17677669, %v4122_v1 }
0x1785   : > { %7382 = vmatmul.mubr.msk.f32.vlgmr.msra.gmra.mrb[26].mxu1 %vm877_vm1, %v4347_v53  ;;  %v6282_v53 = vld [vmem:[%s11772_s7 + $0x188] sm:$0xff] }
0x1786   : > { %7386 = vmatprep.mubr.msk.f32.mxu1 %vm8489_vm0, %v8488_v19  ;;  %v8119_v56 = vpack.c.bf16 %v6284_v54, %v6282_v53  ;;  %v6321_v53 = vld [vmem:[%s11805_s23 + $0x7f8] sm:$0xff] }
0x1788   : > { %8120 = vmatprep.subr.bf16.mxu0 %v8119_v56  ;;  %v6305_v56 = vld [vmem:[%s11805_s23 + $0x778] sm:$0xff] }
0x1789   : > { %8122 = vmatpush1.bf16.msra.mxu0 %v8121_v60  ;;  %v8157_v57 = vpack.c.bf16 %v6305_v56, %v6304_v55  ;;  %v6342_v60 = vld [vmem:[%s11806_s2 + $0x790] sm:$0xff]  ;;  %v6375_v55 = vld [vmem:[%s11808_s3 + $0x788] sm:$0xff]  ;;  %v6358_v56 = vld [vmem:[%s11808_s3 + $0x700] sm:$0xff] }
0x178a   : > { %8124 = vmatprep.subr.bf16.mxu0 %v8123_v37  ;;  %v6343_v37 = vld [vmem:[%s11806_s2 + $0x798] sm:$0xff] }
0x178b   : > { %v8163_v61 = vpack.c.bf16 %v6343_v37, %v6342_v60  ;;  %v6377_v60 = vld [vmem:[%s11808_s3 + $0x798] sm:$0xff]  ;;  %v8193_v37 = vpack.c.bf16 %v6359_v58, %v6358_v56  ;;  %v6395_v56 = vld [vmem:[%s11772_s7 + $0x1c0] sm:$0xff]  ;;  %v6400_v58 = vld [vmem:[%s11772_s7 + $0x1e8] sm:$0xff] }
0x178d   : > { %8126 = vmatpush1.bf16.msra.mxu0 %v8125_v62  ;;  %v6326_v62 = vld [vmem:[%s11806_s2 + $0x710] sm:$0xff] }
0x178e   : > { %8160 = vmatprep.subr.bf16.mxu0 %v8159_v16 }
0x179d   : > { %v7168_v49 = vpop.f32.mrb[40].mxu0 }
0x179e   : > { %v7169_v50 = vpop.f32.mrb[41].mxu0 }
0x179f   : > { %v7170_v51 = vadd.f32 %v7169_v50, %v7168_v49  ;;  %v6302_v50 = vld [vmem:[%s11805_s23 + $0x760] sm:$0xff] }
0x17a1   : > { %v4344_v1 = vadd.f32 %v7170_v51, %v6277_v52  ;;  %v6303_v51 = vld [vmem:[%s11805_s23 + $0x768] sm:$0xff] }
0x17a2   : > { %v8153_v52 = vpack.c.bf16 %v6303_v51, %v6302_v50 }
0x17a3   : > { %7385 = vmatpush3.msra.mxu1 %v4344_v1  ;;  %v6320_v1 = vld [vmem:[%s11805_s23 + $0x7f0] sm:$0xff] }
0x17a4   : > { %8128 = vmatprep.subr.bf16.mxu1 %v8127_v34  ;;  %v8155_v54 = vpack.c.bf16 %v6321_v53, %v6320_v1  ;;  %v6329_v34 = vld [vmem:[%s11806_s2 + $0x728] sm:$0xff] }
0x1858   : > { %v4420_v39 = vpop.f32.mrb[26].mxu1 }
0x1859   : > { %v7383_v42 = vpop.f32.mrb[27].mxu1  ;;  %v4424_v44 = vsel %vm954_vm2, %v4420_v39, -inf }
0x185a   : > { %4425 = vmax.xlane.f32.xlu0 %v4424_v44  ;;  %v6317_v42 = vld [vmem:[%s11805_s23 + $0x7d8] sm:$0xff] }
0x18e7   : > { %v4426_v46 = vpop.xlane.xlu0 %4425 }
0x18e8   : > { %v4427_v47 = vsub.f32 %v4420_v39, %v4426_v46  ;;  %v6316_v39 = vld [vmem:[%s11805_s23 + $0x7d0] sm:$0xff] }
0x18e9   : > { %v8147_v44 = vpack.c.bf16 %v6317_v42, %v6316_v39  ;;  %v6300_v46 = vld [vmem:[%s11805_s23 + $0x750] sm:$0xff]  ;;  %v6339_v42 = vld [vmem:[%s11806_s2 + $0x778] sm:$0xff] }
0x18ea   : > { %v4428_v40 = vmul.f32 1.442695, %v4427_v47  ;;  %v6301_v47 = vld [vmem:[%s11805_s23 + $0x758] sm:$0xff]  ;;  %v6338_v39 = vld [vmem:[%s11806_s2 + $0x770] sm:$0xff] }
0x18ec   : > { %8406 = vpow2.f32 %v4428_v40  ;;  %v8149_v40 = vpack.c.bf16 %v6301_v47, %v6300_v46 }
0x18f6   : > { %v8407_v48 = vpop.eup %8406 }
0x18f7   : > { %v4430_v43 = vsel %vm954_vm2, %v8407_v48, 0.0 }
0x18f8   : > { %4431 = vadd.xlane.f32.xlu1 %v4430_v43  ;;  %v6319_v43 = vld [vmem:[%s11805_s23 + $0x7e8] sm:$0xff] }
0x1985   : > { %v4432_v63 = vpop.xlane.xlu1 %4431 }
0x1986   : > { %8408 = vrcp.f32 %v4432_v63  ;;  %v6327_v63 = vld [vmem:[%s11806_s2 + $0x718] sm:$0xff] }
0x1987   : > { %v8165_v24 = vpack.c.bf16 %v6327_v63, %v6326_v62  ;;  %v6361_v62 = vld [vmem:[%s11808_s3 + $0x718] sm:$0xff]  ;;  %v6378_v63 = vld [vmem:[%s11808_s3 + $0x7a0] sm:$0xff] }
0x1990   : > { %v8409_v0 = vpop.eup %8408 }
0x1991   : > { %v4434_v2 = vmul.f32 %v8409_v0, %v8407_v48  ;;  %v6318_v48 = vld [vmem:[%s11805_s23 + $0x7e0] sm:$0xff] }
0x1992   : > { %v8151_v49 = vpack.c.bf16 %v6319_v43, %v6318_v48  ;;  %v6323_v48 = vld [vmem:[%s11769_s4 + $0x7] ss:$0 sm:$0xff] }
0x1993   : > { %7387 = vmatmul.mubr.msk.f32.vlgmr.msra.gmra.mrb[28].mxu1 %vm954_vm2, %v4434_v2  ;;  %v6344_v2 = vld [vmem:[%s11806_s2 + $0x7a0] sm:$0xff] }
0x1994   : > { %4698 = vmatprep.mubr.f32.mxu1 %v11049_v3  ;;  %8130 = vmatpush3.bf16.msra.mxu1 %v8129_v9  ;;  %v8167_v16 = vpack.c.bf16 %v6345_v4, %v6344_v2  ;;  %v8171_v9 = vpack.c.bf16 %v6347_v8, %v6346_v7  ;;  %v6364_v8 = vld [vmem:[%s11808_s3 + $0x730] sm:$0xff] }
0x1995   : > { %8132 = vmatprep.subr.bf16.mxu1 %v8131_v12  ;;  %v6348_v12 = vld [vmem:[%s11806_s2 + $0x7c0] sm:$0xff] }
0x1998   : > { %8134 = vmatpush3.bf16.msra.mxu1 %v8133_v15  ;;  %v8175_v15 = vpack.c.bf16 %v6349_v13, %v6348_v12  ;;  %v6366_v13 = vld [vmem:[%s11808_s3 + $0x740] sm:$0xff] }
0x1999   : > { %8136 = vmatprep.subr.bf16.mxu1 %v8135_v20  ;;  %v6350_v20 = vld [vmem:[%s11806_s2 + $0x7d0] sm:$0xff] }
0x199c   : > { %8138 = vmatpush3.bf16.msra.mxu1 %v8137_v23  ;;  %v8179_v23 = vpack.c.bf16 %v6351_v21, %v6350_v20  ;;  %v6368_v21 = vld [vmem:[%s11808_s3 + $0x750] sm:$0xff] }
0x199d   : > { %8140 = vmatprep.subr.bf16.mxu1 %v8139_v27  ;;  %v6352_v27 = vld [vmem:[%s11806_s2 + $0x7e0] sm:$0xff] }
0x19a0   : > { %8142 = vmatpush3.bf16.msra.mxu1 %v8141_v30  ;;  %v8183_v30 = vpack.c.bf16 %v6353_v28, %v6352_v27  ;;  %v6370_v28 = vld [vmem:[%s11808_s3 + $0x760] sm:$0xff] }
0x19a1   : > { %8144 = vmatprep.subr.bf16.mxu1 %v8143_v33  ;;  %v6354_v33 = vld [vmem:[%s11806_s2 + $0x7f0] sm:$0xff]  ;;  %s11811_s2 = smov %s11810_s27 }
0x19a4   : > { %8146 = vmatpush3.bf16.msra.mxu1 %v8145_v38  ;;  %v8187_v38 = vpack.c.bf16 %v6355_v35, %v6354_v33  ;;  %v6372_v35 = vld [vmem:[%s11808_s3 + $0x770] sm:$0xff] }
0x19a5   : > { %8148 = vmatprep.subr.bf16.mxu1 %v8147_v44  ;;  %v8189_v44 = vpack.c.bf16 %v6339_v42, %v6338_v39 }
0x19a8   : > { %8150 = vmatpush3.bf16.msra.mxu1 %v8149_v40 }
0x19a9   : > { %8152 = vmatprep.subr.bf16.mxu1 %v8151_v49  ;;  %v6357_v49 = vld [vmem:[%s11770_s5 + $0x7] ss:$0 sm:$0xff] }
0x19ac   : > { %8154 = vmatpush3.bf16.msra.mxu1 %v8153_v52 }
0x19ad   : > { %8156 = vmatprep.subr.bf16.mxu1 %v8155_v54  ;;  %v6374_v54 = vld [vmem:[%s11808_s3 + $0x780] sm:$0xff] }
0x19b0   : > { %8158 = vmatpush3.bf16.msra.mxu1 %v8157_v57  ;;  %v8191_v57 = vpack.c.bf16 %v6375_v55, %v6374_v54 }
0x19b2   : > { %8192 = vmatprep.subr.bf16.mxu1 %v8191_v57  ;;  %v6397_v57 = vld [vmem:[%s11772_s7 + $0x1d0] sm:$0xff] }
0x19b3   : > { %4699 = vmatmul.mubr.f32.vlgmr.msra.gmra.mrb[30].mxu1 %v10905_v45 }
0x19b4   : > { %4920 = vmatprep.mubr.f32.mxu1 %v11049_v3  ;;  %8194 = vmatpush3.bf16.msra.mxu1 %v8193_v37  ;;  %v8225_v37 = vpack.c.bf16 %v6397_v57, %v6395_v56  ;;  %v5223_v56 = vld [vmem:[%s11774_s9 + $0x128] sm:$0xff]  ;;  %v5225_v57 = vld [vmem:[%s11774_s9 + $0x138] sm:$0xff] }
0x1a66   : > { %v4504_v0 = vpop.f32.mrb[28].mxu1 }
0x1a67   : > { %v7388_v5 = vpop.f32.mrb[29].mxu1  ;;  %6289 = vmatmul.mubr.msk.f32.vlgmr.msra.gmra.mrb[14].mxu0 %vm877_vm1, %v4504_v0  ;;  %v6379_v0 = vld [vmem:[%s11808_s3 + $0x7a8] sm:$0xff] }
0x1a68   : > { %8162 = vmatpush3.bf16.msra.mxu0 %v8161_v41  ;;  %4809 = vmatprep.mubr.f32.mxu0 %v11049_v3  ;;  %v8169_v3 = vpack.c.bf16 %v6329_v34, %v6328_v6  ;;  %v8195_v41 = vpack.c.bf16 %v6377_v60, %v6376_v59  ;;  %v8199_v4 = vpack.c.bf16 %v6379_v0, %v6378_v63  ;;  %v6362_v5 = vld [vmem:[%s11808_s3 + $0x720] sm:$0xff]  ;;  %v6381_v6 = vld [vmem:[%s11808_s3 + $0x7b8] sm:$0xff]  ;;  %v6401_v63 = vld [vmem:[%s11772_s7 + $0x1f0] sm:$0xff] }
0x1a69   : > { %8164 = vmatprep.subr.bf16.mxu0 %v8163_v61  ;;  %v6360_v61 = vld [vmem:[%s11808_s3 + $0x710] sm:$0xff]  ;;  %v6402_v59 = vld [vmem:[%s11772_s7 + $0x1f8] sm:$0xff] }
0x1a6a   : > { %v8197_v2 = vpack.c.bf16 %v6361_v62, %v6360_v61  ;;  %8196 = vmatprep.subr.bf16.mxu1 %v8195_v41  ;;  %v8227_v61 = vpack.c.bf16 %v6402_v59, %v6400_v58  ;;  %v6399_v62 = vld [vmem:[%s11772_s7 + $0x1e0] sm:$0xff]  ;;  %v8267_v59 = vpack.c.bf16 %v5225_v57, %v5223_v56  ;;  %v5397_v57 = vld [vmem:[%s11778_s13 + $0x88] sm:$0xff] }
0x1a6b   : > { %v8229_v0 = vpack.c.bf16 %v6401_v63, %v6399_v62  ;;  %v5396_v56 = vld [vmem:[%s11778_s13 + $0x80] sm:$0xff] }
0x1a6c   : > { %8166 = vmatpush3.bf16.msra.mxu0 %v8165_v24  ;;  %v6363_v24 = vld [vmem:[%s11808_s3 + $0x728] sm:$0xff]  ;;  %8198 = vmatpush3.bf16.msra.mxu1 %v8197_v2 }
0x1a6d   : > { %8168 = vmatprep.subr.bf16.mxu0 %v8167_v16  ;;  %v6380_v16 = vld [vmem:[%s11808_s3 + $0x7b0] sm:$0xff]  ;;  %v8201_v34 = vpack.c.bf16 %v6363_v24, %v6362_v5  ;;  %8200 = vmatprep.subr.bf16.mxu1 %v8199_v4  ;;  %v5187_v2 = vld [vmem:[%s11774_s9 + $0x8] sm:$0xff]  ;;  %v5189_v4 = vld [vmem:[%s11774_s9 + $0x18] sm:$0xff] }
0x1a6e   : > { %v8203_v7 = vpack.c.bf16 %v6381_v6, %v6380_v16  ;;  %v5186_v5 = vld [vmem:[%s11774_s9] sm:$0xff]  ;;  %v8231_v24 = vpack.c.bf16 %v5189_v4, %v5187_v2  ;;  %v5188_v16 = vld [vmem:[%s11774_s9 + $0x10] sm:$0xff]  ;;  %v5193_v6 = vld [vmem:[%s11774_s9 + $0x38] sm:$0xff] }
0x1a6f   : > { %v5228_v2 = vld [vmem:[%s11774_s9 + $0x150] sm:$0xff]  ;;  %v5231_v4 = vld [vmem:[%s11774_s9 + $0x168] sm:$0xff] }
0x1a70   : > { %8170 = vmatpush3.bf16.msra.mxu0 %v8169_v3  ;;  %v6365_v3 = vld [vmem:[%s11808_s3 + $0x738] sm:$0xff]  ;;  %8202 = vmatpush3.bf16.msra.mxu1 %v8201_v34  ;;  %v8233_v34 = vpack.c.bf16 %v5188_v16, %v5186_v5 }
0x1a71   : > { %8172 = vmatprep.subr.bf16.mxu0 %v8171_v9  ;;  %v6382_v9 = vld [vmem:[%s11808_s3 + $0x7c0] sm:$0xff]  ;;  %v8205_v11 = vpack.c.bf16 %v6365_v3, %v6364_v8  ;;  %8204 = vmatprep.subr.bf16.mxu1 %v8203_v7  ;;  %v5192_v3 = vld [vmem:[%s11774_s9 + $0x30] sm:$0xff]  ;;  %v5233_v5 = vld [vmem:[%s11774_s9 + $0x178] sm:$0xff] }
0x1a72   : > { %v8207_v12 = vpack.c.bf16 %v6383_v10, %v6382_v9  ;;  %v5190_v8 = vld [vmem:[%s11774_s9 + $0x20] sm:$0xff]  ;;  %v5195_v9 = vld [vmem:[%s11774_s9 + $0x48] sm:$0xff]  ;;  %v5197_v10 = vld [vmem:[%s11774_s9 + $0x58] sm:$0xff]  ;;  %v8275_v16 = vpack.c.bf16 %v5233_v5, %v5231_v4 }
0x1a74   : > { %8174 = vmatpush3.bf16.msra.mxu0 %v8173_v14  ;;  %v6367_v14 = vld [vmem:[%s11808_s3 + $0x748] sm:$0xff]  ;;  %8206 = vmatpush3.bf16.msra.mxu1 %v8205_v11  ;;  %v8237_v11 = vpack.c.bf16 %v5192_v3, %v5190_v8 }
0x1a75   : > { %8176 = vmatprep.subr.bf16.mxu0 %v8175_v15  ;;  %v6384_v15 = vld [vmem:[%s11808_s3 + $0x7d0] sm:$0xff]  ;;  %v8209_v18 = vpack.c.bf16 %v6367_v14, %v6366_v13  ;;  %8208 = vmatprep.subr.bf16.mxu1 %v8207_v12  ;;  %v8239_v12 = vpack.c.bf16 %v5197_v10, %v5195_v9  ;;  %v5194_v13 = vld [vmem:[%s11774_s9 + $0x40] sm:$0xff] }
0x1a76   : > { %v8211_v20 = vpack.c.bf16 %v6385_v17, %v6384_v15  ;;  %v5196_v14 = vld [vmem:[%s11774_s9 + $0x50] sm:$0xff]  ;;  %v5199_v15 = vld [vmem:[%s11774_s9 + $0x68] sm:$0xff]  ;;  %v5201_v17 = vld [vmem:[%s11774_s9 + $0x78] sm:$0xff] }
0x1a77   : > { %v5234_v9 = vld [vmem:[%s11774_s9 + $0x180] sm:$0xff]  ;;  %v5236_v10 = vld [vmem:[%s11774_s9 + $0x190] sm:$0xff] }
0x1a78   : > { %8178 = vmatpush3.bf16.msra.mxu0 %v8177_v22  ;;  %v6369_v22 = vld [vmem:[%s11808_s3 + $0x758] sm:$0xff]  ;;  %8210 = vmatpush3.bf16.msra.mxu1 %v8209_v18  ;;  %v8241_v18 = vpack.c.bf16 %v5196_v14, %v5194_v13  ;;  %v8281_v13 = vpack.c.bf16 %v5236_v10, %v5234_v9  ;;  %v5384_v9 = vld [vmem:[%s11778_s13 + $0x20] sm:$0xff]  ;;  %v5385_v10 = vld [vmem:[%s11778_s13 + $0x28] sm:$0xff] }
0x1a79   : > { %8180 = vmatprep.subr.bf16.mxu0 %v8179_v23  ;;  %v6386_v23 = vld [vmem:[%s11808_s3 + $0x7e0] sm:$0xff]  ;;  %v8213_v26 = vpack.c.bf16 %v6369_v22, %v6368_v21  ;;  %8212 = vmatprep.subr.bf16.mxu1 %v8211_v20  ;;  %v8243_v20 = vpack.c.bf16 %v5201_v17, %v5199_v15  ;;  %v5200_v22 = vld [vmem:[%s11774_s9 + $0x70] sm:$0xff] }
0x1a7a   : > { %v8215_v27 = vpack.c.bf16 %v6387_v25, %v6386_v23  ;;  %v5198_v21 = vld [vmem:[%s11774_s9 + $0x60] sm:$0xff]  ;;  %v5203_v23 = vld [vmem:[%s11774_s9 + $0x88] sm:$0xff]  ;;  %v5205_v25 = vld [vmem:[%s11774_s9 + $0x98] sm:$0xff] }
0x1a7b   : > { %v5238_v15 = vld [vmem:[%s11774_s9 + $0x1a0] sm:$0xff]  ;;  %v5240_v17 = vld [vmem:[%s11774_s9 + $0x1b0] sm:$0xff] }
0x1a7c   : > { %8182 = vmatpush3.bf16.msra.mxu0 %v8181_v29  ;;  %v6371_v29 = vld [vmem:[%s11808_s3 + $0x768] sm:$0xff]  ;;  %8214 = vmatpush3.bf16.msra.mxu1 %v8213_v26  ;;  %v8245_v26 = vpack.c.bf16 %v5200_v22, %v5198_v21  ;;  %v8285_v21 = vpack.c.bf16 %v5240_v17, %v5238_v15  ;;  %v5386_v15 = vld [vmem:[%s11778_s13 + $0x30] sm:$0xff]  ;;  %v5387_v17 = vld [vmem:[%s11778_s13 + $0x38] sm:$0xff] }
0x1a7d   : > { %8184 = vmatprep.subr.bf16.mxu0 %v8183_v30  ;;  %v6388_v30 = vld [vmem:[%s11808_s3 + $0x7f0] sm:$0xff]  ;;  %v8217_v32 = vpack.c.bf16 %v6371_v29, %v6370_v28  ;;  %8216 = vmatprep.subr.bf16.mxu1 %v8215_v27  ;;  %v8247_v27 = vpack.c.bf16 %v5205_v25, %v5203_v23  ;;  %v5202_v28 = vld [vmem:[%s11774_s9 + $0x80] sm:$0xff] }
0x1a7e   : > { %v8219_v33 = vpack.c.bf16 %v6389_v31, %v6388_v30  ;;  %v5204_v29 = vld [vmem:[%s11774_s9 + $0x90] sm:$0xff]  ;;  %v5207_v30 = vld [vmem:[%s11774_s9 + $0xa8] sm:$0xff]  ;;  %v5209_v31 = vld [vmem:[%s11774_s9 + $0xb8] sm:$0xff] }
0x1a7f   : > { %v5242_v23 = vld [vmem:[%s11774_s9 + $0x1c0] sm:$0xff]  ;;  %v5244_v25 = vld [vmem:[%s11774_s9 + $0x1d0] sm:$0xff] }
0x1a80   : > { %8186 = vmatpush3.bf16.msra.mxu0 %v8185_v36  ;;  %v6373_v36 = vld [vmem:[%s11808_s3 + $0x778] sm:$0xff]  ;;  %8218 = vmatpush3.bf16.msra.mxu1 %v8217_v32  ;;  %v8249_v32 = vpack.c.bf16 %v5204_v29, %v5202_v28  ;;  %v5247_v29 = vld [vmem:[%s11774_s9 + $0x1e8] sm:$0xff]  ;;  %s11723_s3 = scalar_lea.hbm %s11810_s27, %s6408_s0 }
0x1a81   : > { %8188 = vmatprep.subr.bf16.mxu0 %v8187_v38  ;;  %v8221_v38 = vpack.c.bf16 %v6373_v36, %v6372_v35  ;;  %8220 = vmatprep.subr.bf16.mxu1 %v8219_v33  ;;  %v8251_v33 = vpack.c.bf16 %v5209_v31, %v5207_v30  ;;  %v5206_v35 = vld [vmem:[%s11774_s9 + $0xa0] sm:$0xff]  ;;  %v5208_v36 = vld [vmem:[%s11774_s9 + $0xb0] sm:$0xff]  ;;  %v5249_v30 = vld [vmem:[%s11774_s9 + $0x1f8] sm:$0xff] }
0x1a82   : > { %v8291_v31 = vpack.c.bf16 %v5249_v30, %v5247_v29  ;;  %v5390_v30 = vld [vmem:[%s11778_s13 + $0x50] sm:$0xff] }
0x1a84   : > { %8190 = vmatpush3.bf16.msra.mxu0 %v8189_v44  ;;  %8222 = vmatpush3.bf16.msra.mxu1 %v8221_v38  ;;  %v5211_v38 = vld [vmem:[%s11774_s9 + $0xc8] sm:$0xff] }
0x1a85   : > { %7389 = vmatprep.subr.mxu0 %v8488_v19  ;;  %8232 = vmatprep.subr.bf16.mxu1 %v8231_v24 }
0x1a86   : > { %v7207_v46 = vpop.f32.mrb[30].mxu1 }
0x1a87   : > { %4810 = vmatmul.mubr.f32.vlgmr.msra.gmra.mrb[42].mxu0 %v10905_v45  ;;  %v7208_v47 = vpop.f32.mrb[31].mxu1  ;;  %4921 = vmatmul.mubr.f32.vlgmr.msra.gmra.mrb[32].mxu1 %v10905_v45  ;;  %v6391_v45 = vld [vmem:[%s11771_s6 + $0x7] ss:$0 sm:$0xff] }
0x1a88   : > { %7391 = vmatprep.mubr.msk.f32.mxu0 %vm8489_vm0, %v8488_v19  ;;  %v7209_v40 = vadd.f32 %v7208_v47, %v7207_v46  ;;  %8234 = vmatpush1.bf16.msra.mxu1 %v8233_v34  ;;  %v5235_v34 = vld [vmem:[%s11774_s9 + $0x188] sm:$0xff] }
0x1a8a   : > { %v4701_v51 = vadd.f32 %v7209_v40, %v6323_v48 }
0x1a8c   : > { %v4926_v53 = vmul.f32 0.17677669, %v4701_v51 }
0x1b5a   : > { %v7242_v43 = vpop.f32.mrb[42].mxu0 }
0x1b5b   : > { %v7243_v50 = vpop.f32.mrb[43].mxu0 }
0x1b5c   : > { %v7244_v52 = vadd.f32 %v7243_v50, %v7242_v43 }
0x1b5e   : > { %v4812_v1 = vadd.f32 %v7244_v52, %v6357_v49  ;;  %v7277_v49 = vpop.f32.mrb[32].mxu1 }
0x1b5f   : > { %v7278_v50 = vpop.f32.mrb[33].mxu1 }
0x1b60   : > { %7390 = vmatpush3.xpose.msk.msra.mxu0 %vm877_vm1, %v4812_v1  ;;  %v7279_v51 = vadd.f32 %v7278_v50, %v7277_v49  ;;  %v6396_v1 = vld [vmem:[%s11772_s7 + $0x1c8] sm:$0xff]  ;;  %v5214_v50 = vld [vmem:[%s11774_s9 + $0xe0] sm:$0xff] }
0x1b61   : > { %7394 = vmatprep.subr.mxu0 %v8488_v19 }
0x1b62   : > { %v4923_v52 = vadd.f32 %v7279_v51, %v6391_v45  ;;  %v5216_v51 = vld [vmem:[%s11774_s9 + $0xf0] sm:$0xff]  ;;  %v5219_v45 = vld [vmem:[%s11774_s9 + $0x108] sm:$0xff] }
0x1b63   : > { %7392 = vmatmul.mubr.msk.f32.vlgmr.msra.gmra.mrb[44].mxu0 %vm877_vm1, %v4926_v53  ;;  %v6398_v53 = vld [vmem:[%s11772_s7 + $0x1d8] sm:$0xff] }
0x1b64   : > { %7396 = vmatprep.mubr.msk.f32.mxu0 %vm8489_vm0, %v8488_v19  ;;  %7395 = vmatpush3.msra.mxu0 %v4923_v52  ;;  %v8223_v54 = vpack.c.bf16 %v6398_v53, %v6396_v1  ;;  %v5221_v52 = vld [vmem:[%s11774_s9 + $0x118] sm:$0xff]  ;;  %v8261_v1 = vpack.c.bf16 %v5216_v51, %v5214_v50  ;;  %v5250_v50 = vld [vmem:[%s11775_s10] sm:$0x3] }
0x1b65   : > { %v8263_v53 = vpack.c.bf16 %v5221_v52, %v5219_v45 }
0x1b66   : > { %8224 = vmatprep.subr.bf16.mxu0 %v8223_v54  ;;  %v5218_v54 = vld [vmem:[%s11774_s9 + $0x100] sm:$0xff] }
0x1c36   : > { %v4999_v39 = vpop.f32.mrb[44].mxu0 }
0x1c37   : > { %v7393_v42 = vpop.f32.mrb[45].mxu0  ;;  %v5003_v44 = vsel %vm954_vm2, %v4999_v39, -inf }
0x1c38   : > { %5004 = vmax.xlane.f32.xlu0 %v5003_v44  ;;  %v8253_v42 = vpack.c.bf16 %v5208_v36, %v5206_v35  ;;  %v5174_v36 = vlaneseq }
0x1cc5   : > { %v5005_v46 = vpop.xlane.xlu0 %5004 }
0x1cc6   : > { %v5006_v47 = vsub.f32 %v4999_v39, %v5005_v46  ;;  %v5213_v39 = vld [vmem:[%s11774_s9 + $0xd8] sm:$0xff]  ;;  %v5210_v46 = vld [vmem:[%s11774_s9 + $0xc0] sm:$0xff] }
0x1cc7   : > { %v8255_v44 = vpack.c.bf16 %v5213_v39, %v5211_v38  ;;  %v5175_v38 = vshrl.u32 %v5174_v36, 7 }
0x1cc8   : > { %v5007_v40 = vmul.f32 1.442695, %v5006_v47  ;;  %v5212_v47 = vld [vmem:[%s11774_s9 + $0xd0] sm:$0xff] }
0x1cc9   : > { %v11584_v39 = vsub.s32 1, %v5175_v38 }
0x1cca   : > { %8410 = vpow2.f32 %v5007_v40  ;;  %v5215_v40 = vld [vmem:[%s11774_s9 + $0xe8] sm:$0xff] }
0x1ccb   : > { %v5259_v45 = vrot.slane %v5250_v50, %v11584_v39 }
0x1cd4   : > { %v8411_v48 = vpop.eup %8410 }
0x1cd5   : > { %v5009_v43 = vsel %vm954_vm2, %v8411_v48, 0.0 }
0x1cd6   : > { %5010 = vadd.xlane.f32.xlu1 %v5009_v43  ;;  %v8257_v43 = vpack.c.bf16 %v5212_v47, %v5210_v46 }
0x1d63   : > { %v5011_v55 = vpop.xlane.xlu1 %5010 }
0x1d64   : > { %8412 = vrcp.f32 %v5011_v55  ;;  %v5220_v55 = vld [vmem:[%s11774_s9 + $0x110] sm:$0xff] }
0x1d65   : > { %v8265_v58 = vpack.c.bf16 %v5220_v55, %v5218_v54 }
0x1d6e   : > { %v8413_v60 = vpop.eup %8412 }
0x1d6f   : > { %v5013_v41 = vmul.f32 %v8413_v60, %v8411_v48  ;;  %v5217_v48 = vld [vmem:[%s11774_s9 + $0xf8] sm:$0xff]  ;;  %v5222_v60 = vld [vmem:[%s11774_s9 + $0x120] sm:$0xff] }
0x1d70   : > { %v8259_v49 = vpack.c.bf16 %v5217_v48, %v5215_v40 }
0x1d71   : > { %7397 = vmatmul.mubr.msk.f32.vlgmr.msra.gmra.mrb[46].mxu0 %vm954_vm2, %v5013_v41  ;;  %v5227_v41 = vld [vmem:[%s11774_s9 + $0x148] sm:$0xff] }
0x1d72   : > { %8226 = vmatpush1.bf16.msra.mxu0 %v8225_v37  ;;  %5163 = vmatprep.mubr.f32.mxu0 %v8488_v19  ;;  %v5191_v19 = vld [vmem:[%s11774_s9 + $0x28] sm:$0xff]  ;;  %v5224_v37 = vld [vmem:[%s11774_s9 + $0x130] sm:$0xff] }
0x1d73   : > { %8228 = vmatprep.subr.bf16.mxu0 %v8227_v61  ;;  %v8235_v7 = vpack.c.bf16 %v5193_v6, %v5191_v19  ;;  %v5229_v61 = vld [vmem:[%s11774_s9 + $0x158] sm:$0xff]  ;;  %v8269_v62 = vpack.c.bf16 %v5224_v37, %v5222_v60  ;;  %v5230_v19 = vld [vmem:[%s11774_s9 + $0x160] sm:$0xff]  ;;  %v5232_v6 = vld [vmem:[%s11774_s9 + $0x170] sm:$0xff] }
0x1d74   : > { %v8271_v63 = vpack.c.bf16 %v5229_v61, %v5227_v41  ;;  %v8277_v8 = vpack.c.bf16 %v5232_v6, %v5230_v19  ;;  %v5381_v60 = vld [vmem:[%s11778_s13 + $0x8] sm:$0xff]  ;;  %v5398_v37 = vld [vmem:[%s11778_s13 + $0x90] sm:$0xff]  ;;  %v5399_v41 = vld [vmem:[%s11778_s13 + $0x98] sm:$0xff] }
0x1d75   : > { %8236 = vmatprep.subr.bf16.mxu1 %v8235_v7  ;;  %v5237_v7 = vld [vmem:[%s11774_s9 + $0x198] sm:$0xff] }
0x1d76   : > { %8230 = vmatpush1.bf16.msra.mxu0 %v8229_v0  ;;  %8238 = vmatpush1.bf16.msra.mxu1 %v8237_v11  ;;  %v5226_v0 = vld [vmem:[%s11774_s9 + $0x140] sm:$0xff]  ;;  %v8279_v3 = vpack.c.bf16 %v5237_v7, %v5235_v34  ;;  %v5239_v11 = vld [vmem:[%s11774_s9 + $0x1a8] sm:$0xff] }
0x1d77   : > { %8240 = vmatprep.subr.bf16.mxu1 %v8239_v12  ;;  %v8273_v24 = vpack.c.bf16 %v5228_v2, %v5226_v0  ;;  %v5241_v12 = vld [vmem:[%s11774_s9 + $0x1b8] sm:$0xff]  ;;  %v5400_v7 = vld [vmem:[%s11778_s13 + $0xa0] sm:$0xff] }
0x1d78   : > { %v8283_v14 = vpack.c.bf16 %v5241_v12, %v5239_v11  ;;  %v5383_v0 = vld [vmem:[%s11778_s13 + $0x18] sm:$0xff]  ;;  %v8305_v11 = vpack.c.bf16 %v5385_v10, %v5384_v9  ;;  %v5402_v12 = vld [vmem:[%s11778_s13 + $0xb0] sm:$0xff]  ;;  %v6405_v9 = vld [vmem:[%s11780_s15] ss:$0 sm:$0xff] }
0x1d7a   : > { %8242 = vmatpush1.bf16.msra.mxu1 %v8241_v18  ;;  %v5243_v18 = vld [vmem:[%s11774_s9 + $0x1c8] sm:$0xff] }
0x1d7b   : > { %8244 = vmatprep.subr.bf16.mxu1 %v8243_v20  ;;  %v5245_v20 = vld [vmem:[%s11774_s9 + $0x1d8] sm:$0xff] }
0x1d7c   : > { %v8287_v22 = vpack.c.bf16 %v5245_v20, %v5243_v18  ;;  %v8309_v18 = vpack.c.bf16 %v5387_v17, %v5386_v15  ;;  %v5404_v20 = vld [vmem:[%s11778_s13 + $0xc0] sm:$0xff] }
0x1d7e   : > { %8246 = vmatpush1.bf16.msra.mxu1 %v8245_v26  ;;  %v8289_v26 = vpack.c.bf16 %v5244_v25, %v5242_v23  ;;  %v5389_v25 = vld [vmem:[%s11778_s13 + $0x48] sm:$0xff] }
0x1d7f   : > { %8248 = vmatprep.subr.bf16.mxu1 %v8247_v27 }
0x1d82   : > { %8250 = vmatpush1.bf16.msra.mxu1 %v8249_v32  ;;  %v5246_v32 = vld [vmem:[%s11774_s9 + $0x1e0] sm:$0xff] }
0x1d83   : > { %8252 = vmatprep.subr.bf16.mxu1 %v8251_v33  ;;  %v5248_v33 = vld [vmem:[%s11774_s9 + $0x1f0] sm:$0xff] }
0x1d84   : > { %v8293_v35 = vpack.c.bf16 %v5248_v33, %v5246_v32  ;;  %v5408_v32 = vld [vmem:[%s11778_s13 + $0xe0] sm:$0xff]  ;;  %v5409_v33 = vld [vmem:[%s11778_s13 + $0xe8] sm:$0xff] }
0x1d85   : > { %v8319_v36 = vpack.c.bf16 %v5409_v33, %v5408_v32 }
0x1d86   : > { %8254 = vmatpush1.bf16.msra.mxu1 %v8253_v42  ;;  %v5172_v42 = vld [vmem:[%s11773_s8] sm:$0x3] }
0x1d87   : > { %8256 = vmatprep.subr.bf16.mxu1 %v8255_v44  ;;  %v11589_v44 = vsub.s32 0, %v5175_v38  ;;  %v5181_v46 = vrot.slane %v5172_v42, %v11584_v39  ;;  %v5392_v38 = vld [vmem:[%s11778_s13 + $0x60] sm:$0xff] }
0x1d89   : > { %v5177_v47 = vrot.slane %v5172_v42, %v11589_v44  ;;  %v5255_v51 = vrot.slane %v5250_v50, %v11589_v44  ;;  %v5393_v42 = vld [vmem:[%s11778_s13 + $0x68] sm:$0xff] }
0x1d8a   : > { %8258 = vmatpush1.bf16.msra.mxu1 %v8257_v43 }
0x1d8b   : > { %8260 = vmatprep.subr.bf16.mxu1 %v8259_v49 }
0x1d8e   : > { %8262 = vmatpush1.bf16.msra.mxu1 %v8261_v1 }
0x1d8f   : > { %8264 = vmatprep.subr.bf16.mxu1 %v8263_v53 }
0x1d92   : > { %8266 = vmatpush1.bf16.msra.mxu1 %v8265_v58  ;;  %v5380_v58 = vld [vmem:[%s11778_s13] sm:$0xff] }
0x1d93   : > { %8268 = vmatprep.subr.bf16.mxu1 %v8267_v59  ;;  %v8295_v59 = vpack.c.bf16 %v5397_v57, %v5396_v56  ;;  %v8297_v61 = vpack.c.bf16 %v5381_v60, %v5380_v58 }
0x1d95   : > { %8296 = vmatprep.subr.bf16.mxu0 %v8295_v59 }
0x1d96   : > { %8270 = vmatpush1.bf16.msra.mxu1 %v8269_v62  ;;  %v8299_v62 = vpack.c.bf16 %v5399_v41, %v5398_v37 }
0x1d97   : > { %8272 = vmatprep.subr.bf16.mxu1 %v8271_v63  ;;  %v5382_v63 = vld [vmem:[%s11778_s13 + $0x10] sm:$0xff] }
0x1d98   : > { %v8301_v2 = vpack.c.bf16 %v5383_v0, %v5382_v63 }
0x1d9a   : > { %8274 = vmatpush1.bf16.msra.mxu1 %v8273_v24 }
0x1d9b   : > { %8276 = vmatprep.subr.bf16.mxu1 %v8275_v16 }
0x1d9e   : > { %8278 = vmatpush1.bf16.msra.mxu1 %v8277_v8  ;;  %v5401_v8 = vld [vmem:[%s11778_s13 + $0xa8] sm:$0xff] }
0x1d9f   : > { %8280 = vmatprep.subr.bf16.mxu1 %v8279_v3  ;;  %v8303_v3 = vpack.c.bf16 %v5401_v8, %v5400_v7 }
0x1da2   : > { %8282 = vmatpush1.bf16.msra.mxu1 %v8281_v13  ;;  %v5403_v13 = vld [vmem:[%s11778_s13 + $0xb8] sm:$0xff] }
0x1da3   : > { %8284 = vmatprep.subr.bf16.mxu1 %v8283_v14  ;;  %v8307_v14 = vpack.c.bf16 %v5403_v13, %v5402_v12 }
0x1da6   : > { %8286 = vmatpush1.bf16.msra.mxu1 %v8285_v21  ;;  %v5405_v21 = vld [vmem:[%s11778_s13 + $0xc8] sm:$0xff] }
0x1da7   : > { %8288 = vmatprep.subr.bf16.mxu1 %v8287_v22  ;;  %v5388_v22 = vld [vmem:[%s11778_s13 + $0x40] sm:$0xff]  ;;  %v8311_v23 = vpack.c.bf16 %v5405_v21, %v5404_v20 }
0x1daa   : > { %8290 = vmatpush1.bf16.msra.mxu1 %v8289_v26  ;;  %v5406_v26 = vld [vmem:[%s11778_s13 + $0xd0] sm:$0xff] }
0x1dab   : > { %8292 = vmatprep.subr.bf16.mxu1 %v8291_v31  ;;  %v5391_v31 = vld [vmem:[%s11778_s13 + $0x58] sm:$0xff] }
0x1dae   : > { %8294 = vmatpush1.bf16.msra.mxu1 %v8293_v35  ;;  %v8317_v35 = vpack.c.bf16 %v5391_v31, %v5390_v30 }
0x1e44   : > { %v5083_v27 = vpop.f32.mrb[46].mxu0 }
0x1e45   : > { %v7398_v28 = vpop.f32.mrb[47].mxu0  ;;  %6403 = vmatmul.mubr.msk.f32.vlgmr.msra.gmra.mrb[14].mxu0 %vm877_vm1, %v5083_v27  ;;  %v5407_v27 = vld [vmem:[%s11778_s13 + $0xd8] sm:$0xff] }
0x1e46   : > { %8298 = vmatpush3.bf16.msra.mxu0 %v8297_v61  ;;  %v8313_v28 = vpack.c.bf16 %v5389_v25, %v5388_v22  ;;  %v8315_v29 = vpack.c.bf16 %v5407_v27, %v5406_v26 }
0x1e47   : > { %8300 = vmatprep.subr.bf16.mxu0 %v8299_v62 }
0x1e4a   : > { %8302 = vmatpush3.bf16.msra.mxu0 %v8301_v2 }
0x1e4b   : > { %8304 = vmatprep.subr.bf16.mxu0 %v8303_v3 }
0x1e4e   : > { %8306 = vmatpush3.bf16.msra.mxu0 %v8305_v11  ;;  %v6406_v11 = vld [vmem:[%s11809_s29] ss:$0 sm:$0xff] }
0x1e4f   : > { %8308 = vmatprep.subr.bf16.mxu0 %v8307_v14 }
0x1e52   : > { %8310 = vmatpush3.bf16.msra.mxu0 %v8309_v18 }
0x1e53   : > { %8312 = vmatprep.subr.bf16.mxu0 %v8311_v23 }
0x1e56   : > { %8314 = vmatpush3.bf16.msra.mxu0 %v8313_v28 }
0x1e57   : > { %8316 = vmatprep.subr.bf16.mxu0 %v8315_v29 }
0x1e5a   : > { %8318 = vmatpush3.bf16.msra.mxu0 %v8317_v35 }
0x1e5b   : > { %8320 = vmatprep.subr.bf16.mxu0 %v8319_v36 }
0x1f18   : > { %v5165_v40 = vpop.f32.mrb[14].mxu0 }
0x1f19   : > { %v5167_v48 = vpop.f32.mrb[15].mxu0  ;;  %v5184_v49 = vadd.f32 %v5177_v47, %v5165_v40  ;;  %v5411_v47 = vld [vmem:[%s11778_s13 + $0xf8] sm:$0xff]  ;;  %v8321_v40 = vpack.c.bf16 %v5393_v42, %v5392_v38 }
0x1f1a   : > { %v5185_v43 = vadd.f32 %v5181_v46, %v5167_v48  ;;  %v5410_v46 = vld [vmem:[%s11778_s13 + $0xf0] sm:$0xff] }
0x1f1b   : > { %v8323_v48 = vpack.c.bf16 %v5411_v47, %v5410_v46  ;;  %8322 = vmatpush3.bf16.msra.mxu0 %v8321_v40 }
0x1f1c   : > { %5326 = vmatprep.mubr.f32.mxu1 %v5185_v43  ;;  %v5394_v43 = vld [vmem:[%s11778_s13 + $0x70] sm:$0xff] }
0x1f1d   : > { %5327 = vmatmul.mubr.f32.vlgmr.msra.gmra.mrb[34].mxu1 %v5184_v49  ;;  %v5395_v49 = vld [vmem:[%s11778_s13 + $0x78] sm:$0xff]  ;;  %8324 = vmatprep.subr.bf16.mxu0 %v8323_v48 }
0x1f1e   : > { %v8325_v50 = vpack.c.bf16 %v5395_v49, %v5394_v43 }
0x1f20   : > { %8326 = vmatpush3.bf16.msra.mxu0 %v8325_v50 }
0x1ff0   : > { %v5328_v52 = vpop.f32.mrb[34].mxu1 }
0x1ff1   : > { %v5329_v1 = vadd.f32 %v5328_v52, %v5255_v51  ;;  %v5330_v53 = vpop.f32.mrb[35].mxu1 }
0x1ff2   : > { %v5331_v54 = vadd.f32 %v5330_v53, %v5259_v45  ;;  %v5334_v53 = vld [vmem:[%s11777_s12] sm:$0x3] }
0x1ff3   : > { %v5369_v58 = vrot.slane %v5334_v53, %v11589_v44  ;;  %v5373_v59 = vrot.slane %v5334_v53, %v11584_v39 }
0x1ff4   : > { %v5335_v55 = vadd.f32 %v5331_v54, %v5329_v1 }
0x1ff6   : > { %5336 = vadd.xlane.f32.xlu0 %v5335_v55 }
0x2083   : > { %v5337_v4 = vpop.xlane.xlu0 %5336 }
0x2084   : > { %v5339_v5 = vmul.f32 0.00390625, %v5337_v4 }
0x2086   : > { %v11622_v24 = vsub.f32 %v5329_v1, %v5339_v5  ;;  %v5341_v16 = vsub.f32 %v5331_v54, %v5339_v5  ;;  %v5333_v1 = vld [vmem:[%s11776_s11] sm:$0x3] }
0x2087   : > { %v5356_v54 = vrot.slane %v5333_v1, %v11589_v44  ;;  %v5360_v55 = vrot.slane %v5333_v1, %v11584_v39  ;;  %v6404_v5 = vld [vmem:[%s11779_s14] ss:$0 sm:$0xff] }
0x2088   : > { %v5342_v19 = vmul.f32 %v11622_v24, %v11622_v24  ;;  %v5343_v6 = vmul.f32 %v5341_v16, %v5341_v16 }
0x208a   : > { %v5344_v34 = vadd.f32 %v5343_v6, %v5342_v19 }
0x208c   : > { %5345 = vadd.xlane.f32.xlu1 %v5344_v34 }
0x2119   : > { %v5346_v51 = vpop.xlane.xlu1 %5345 }
0x211a   : > { %v5347_v45 = vmul.f32 0.00390625, %v5346_v51 }
0x211c   : > { %v5348_v52 = vadd.f32 1e-05, %v5347_v45 }
0x211e   : > { %8414 = vrsqrt.f32 %v5348_v52 }
0x2128   : > { %v8415_v56 = vpop.eup %8414 }
0x2129   : > { %v5351_v57 = vmul.f32 %v8415_v56, %v5341_v16  ;;  %v5350_v60 = vmul.f32 %v8415_v56, %v11622_v24 }
0x212b   : > { %v5364_v37 = vmul.f32 %v5360_v55, %v5351_v57  ;;  %v5363_v41 = vmul.f32 %v5356_v54, %v5350_v60 }
0x212d   : > { %v5377_v61 = vadd.f32 %v5373_v59, %v5364_v37  ;;  %v5376_v62 = vadd.f32 %v5369_v58, %v5363_v41 }
0x212f   : > { %v5379_v63 = vmax.f32 %v5377_v61, 0.0  ;;  %v5378_v0 = vmax.f32 %v5376_v62, 0.0 }
0x2131   : > { %5483 = vmatprep.mubr.f32.mxu0 %v5379_v63 }
0x2132   : > { %5484 = vmatmul.mubr.f32.vlgmr.msra.gmra.mrb[48].mxu0 %v5378_v0 }
0x2205   : > { %v7316_v2 = vpop.f32.mrb[48].mxu0 }
0x2206   : > { %v7317_v4 = vpop.f32.mrb[49].mxu0 }
0x2207   : > { %v7318_v44 = vadd.f32 %v7317_v4, %v7316_v2 }
0x2209   : > { %v5486_v16 = vadd.f32 %v7318_v44, %v6404_v5 }
0x220b   : > { %5491 = vadd.xlane.f32.xlu0 %v5486_v16 }
0x2298   : > { %v5492_v39 = vpop.xlane.xlu0 %5491 }
0x2299   : > { %v5494_v24 = vmul.f32 0.0078125, %v5492_v39 }
0x229b   : > { %v5495_v19 = vsub.f32 %v5486_v16, %v5494_v24 }
0x229d   : > { %v5496_v6 = vmul.f32 %v5495_v19, %v5495_v19 }
0x229f   : > { %5497 = vadd.xlane.f32.xlu1 %v5496_v6 }
0x232c   : > { %v5498_v34 = vpop.xlane.xlu1 %5497 }
0x232d   : > { %v5499_v7 = vmul.f32 0.0078125, %v5498_v34 }
0x232f   : > { %v5500_v8 = vadd.f32 1e-05, %v5499_v7 }
0x2331   : > { %8416 = vrsqrt.f32 %v5500_v8 }
0x233b   : > { %v8417_v3 = vpop.eup %8416 }
0x233c   : > { %v5502_v10 = vmul.f32 %v8417_v3, %v5495_v19 }
0x233e   : > { %v5509_v12 = vmul.f32 %v6405_v9, %v5502_v10 }
0x2340   : > { %v5516_v13 = vadd.f32 %v6406_v11, %v5509_v12 }
0x2342   : > { %v5517_v14 = vmax.f32 %v5516_v13, 0.0 }
0x2344   : > { %5518 = vst [vmem:[%s541_s16] sm:$0xff] %v5517_v14 }
0x2345   : > { %8437 = shalt.err (!%p8434_p3)
}
0x2346   : > { %s8438_s30 = scalar_lea.hbm %s11723_s3, 128  ;;  %s8442_s0 = scalar_lea.hbm %s11811_s2, 256 }
0x2347   : > { %p8439_p4 = scmp.ne.s32.totalorder %s11723_s3, %s8438_s30  ;;  %p8443_p9 = scmp.lt.u32.totalorder %s11723_s3, %s11811_s2 }
0x2348   : > { %p8444_p10 = scmp.lt.u32.totalorder %s8442_s0, %s8438_s30  ;;  %p8446_p12 = scmp.lt.u32.totalorder %s8438_s30, %s11723_s3 }
0x2349   : > { %p8440_p7 = pnand %p8439_p4, %p8619_p5 }
0x234a   : > { %p8445_p11 = por %p8444_p10, %p8443_p9 }
0x234b   : > { %p8441_p8 = pneg %p8440_p7 }
0x234c   : > { %p8447_p13 = por %p8446_p12, %p8445_p11 }
0x234e   : > { %p8448_p0 = pnand %p8447_p13, %p8441_p8 }
0x2350   : > { %8451 = shalt.err (!%p8448_p0)
}
0x2351   : > { %8341 = dma.vmem_to_hbm [thread:$0]  (%p8619_p5), %s11725_s26, 128, %s11723_s3, %s5520_s21  }
0x2352 PF: > { %s11812_s20 = sld [smem:[#allocation7_spill]]  ;;  %s11813_s27 = sld [smem:[#allocation5_spill]] }
0x2358   : > { %p8347_p1 = scmp.ge.s32.totalorder %s11812_s20, 2  ;;  %s5545_s28 = sand.u32 1, %s11813_s27  }
0x2359   : > { %s5546_s17 = scalar_lea.sflag [#allocation3], %s5545_s28 }
0x235a   : > { %p8344_p2 = pnand %p8347_p1, %p8623_p6 }
0x235c   : > { %8469 = dma.done.wait (!%p8344_p2), %s5546_s17, 128  }
0x235d   : > { %8471 = vsyncadd (!%p8344_p2), %s5546_s17, 4294967168  ;;  %s11815_s27 = sld [smem:[#allocation8_spill]]  ;;  %s11816_s18 = sld [smem:[#allocation6_spill]] }
0x235e   : > { %s11817_s26 = sld [smem:[#allocation9_spill]]  ;;  %s11818_s24 = smov %s8478_s25 }
0x2363   : > { %p27_p3 = scmp.ge.s32.totalorder %s11815_s27, 4   ;;  %s11819_s25 = smov %s11816_s18 }
0x2365   :  { %29 = sbr.rel (!%p27_p3) target bundleno = 10 (0xa), region = 172 }
0x236c   :  { %5551 = vsyncpa [#allocation3], 1 }
0x236d   :  { %5553 = vsyncpa [#allocation3 + $0x1], 1 }

</bundles_post_ra>
